<compile_context>
chip_gen: v5e
topology: v5e:2x2
jax: 0.10.0
libtpu: 0.0.40
codegen_flags: <defaults>
</compile_context>

<pallas_src>
import functools

import jax
import jax.numpy as jnp
from jax import lax
from jax.experimental import pallas as pl
from jax.experimental.pallas import tpu as pltpu


def _round_up(n, m):
    return ((n + m - 1) // m) * m


def _apply_act(y, act):
    if act == "leaky_relu":
        return jnp.where(y > 0, y, 0.2 * y)        # nn.LeakyReLU(0.2)
    if act == "sigmoid":
        return jax.nn.sigmoid(y)                   # nn.Sigmoid
    return y


# ---------------------------------------------------------------------------
# Encoder conv: Conv2d(k=3, stride=2, padding=1) with fused im2col.
# The padded input is split (in the wrapper) into 4 stride-2 phase planes,
# flattened row-major over (Ho+1, Wo+1).  Inside the kernel, tap (dy, dx) is a
# contiguous lane-range slice of plane p=(dy%2)*2+(dx%2) at offset
# (dy//2)*(Wo+1)+(dx//2); every row of the accumulator carries one junk column
# (j == Wo) that the wrapper drops.
# ---------------------------------------------------------------------------
def _conv_s2_kernel(x_ref, w_ref, b_ref, o_ref, *, Wh, R, act):
    # x_ref: (1, 4, Cin, S) bf16   w_ref: (9, Cout, Cin) bf16
    # b_ref: (Cout, 1) f32         o_ref: (1, Cout, R)
    cout = o_ref.shape[1]
    cin = w_ref.shape[2]
    planes = [x_ref[0, p] for p in range(4)]          # 4x (Cin, S), loaded once
    acc = jnp.broadcast_to(b_ref[...], (cout, R)).astype(jnp.float32)
    for dy in range(3):
        for dx in range(3):
            p = (dy % 2) * 2 + (dx % 2)
            off = (dy // 2) * Wh + (dx // 2)
            xs = planes[p][:, off:off + R]            # (Cin, R) bf16
            wt = w_ref[dy * 3 + dx]                   # (Cout, Cin) bf16
            if cin == 1:
                # rank-1 tap -> cheap VPU broadcast-multiply instead of K=1 dot
                acc = acc + wt.astype(jnp.float32) * xs.astype(jnp.float32)
            else:
                acc = acc + jnp.dot(wt, xs, preferred_element_type=jnp.float32)
    o_ref[0] = _apply_act(acc, act).astype(o_ref.dtype)


def conv2d_s2(x, w9, b, act, out_dtype):
    """x: (N, Cin, H, W) -> (N, Cout, H//2, W//2)."""
    N, Cin, H, W = x.shape
    Cout = w9.shape[1]
    Ho, Wo = H // 2, W // 2
    Hh, Wh = Ho + 1, Wo + 1
    xp = jnp.pad(x, ((0, 0), (0, 0), (1, 1), (1, 1))).astype(jnp.bfloat16)
    planes = jnp.stack(
        [xp[:, :, py::2, px::2].reshape(N, Cin, Hh * Wh)
         for py in (0, 1) for px in (0, 1)], axis=1)           # (N, 4, Cin, Hh*Wh)
    S = _round_up(Hh * Wh + 1, 128)
    planes = jnp.pad(planes, ((0, 0), (0, 0), (0, 0), (0, S - Hh * Wh)))
    R = Ho * Wh
    out = pl.pallas_call(
        functools.partial(_conv_s2_kernel, Wh=Wh, R=R, act=act),
        out_shape=jax.ShapeDtypeStruct((N, Cout, R), out_dtype),
        grid=(N,),
        in_specs=[
            pl.BlockSpec((1, 4, Cin, S), lambda n: (n, 0, 0, 0)),
            pl.BlockSpec((9, Cout, Cin), lambda n: (0, 0, 0)),
            pl.BlockSpec((Cout, 1), lambda n: (0, 0)),
        ],
        out_specs=pl.BlockSpec((1, Cout, R), lambda n: (n, 0, 0)),
        compiler_params=pltpu.CompilerParams(dimension_semantics=("parallel",)),
    )(planes, w9, b)
    # drop the junk column (j == Wo) introduced by the flattened-offset trick
    return out.reshape(N, Cout, Ho, Wh)[:, :, :, :Wo]


# ---------------------------------------------------------------------------
# Decoder: ConvTranspose2d(k=3, stride=2, padding=1, output_padding=1) via
# 4-phase sub-pixel decomposition.  With xe = x zero-padded by one row/col at
# the bottom/right:
#   out[2a+py, 2b+px] = sum over (ay, bx, dy, dx) in _TCONV_TAPS[py*2+px] of
#                       w[dy, dx] @ xe[a+ay, b+bx]
# ---------------------------------------------------------------------------
_TCONV_TAPS = (
    ((0, 0, 1, 1),),                                             # phase (0, 0)
    ((0, 1, 1, 0), (0, 0, 1, 2)),                                # phase (0, 1)
    ((1, 0, 0, 1), (0, 0, 2, 1)),                                # phase (1, 0)
    ((1, 1, 0, 0), (1, 0, 0, 2), (0, 1, 2, 0), (0, 0, 2, 2)),    # phase (1, 1)
)


def _tconv_s2_kernel(x_ref, w_ref, b_ref, o_ref, *, We, R, act):
    # x_ref: (1, Cin, S) bf16    w_ref: (9, Cout, Cin) bf16
    # b_ref: (Cout, 1) f32       o_ref: (1, 4, Cout, R)
    cout = o_ref.shape[2]
    xfull = x_ref[0]                                  # (Cin, S), loaded once
    for ph in range(4):
        acc = jnp.broadcast_to(b_ref[...], (cout, R)).astype(jnp.float32)
        for ay, bx, dy, dx in _TCONV_TAPS[ph]:
            off = ay * We + bx
            xs = xfull[:, off:off + R]                # (Cin, R) bf16
            wt = w_ref[dy * 3 + dx]                   # (Cout, Cin) bf16
            acc = acc + jnp.dot(wt, xs, preferred_element_type=jnp.float32)
        o_ref[0, ph] = _apply_act(acc, act).astype(o_ref.dtype)


def conv_transpose2d_s2(x, w9, b, act, out_dtype):
    """x: (N, Cin, H, W) -> (N, Cout, 2H, 2W)."""
    N, Cin, H, W = x.shape
    Cout = w9.shape[1]
    He, We = H + 1, W + 1
    xe = jnp.pad(x, ((0, 0), (0, 0), (0, 1), (0, 1))).astype(jnp.bfloat16)
    xe = xe.reshape(N, Cin, He * We)
    S = _round_up(He * We + 1, 128)
    xe = jnp.pad(xe, ((0, 0), (0, 0), (0, S - He * We)))
    R = H * We
    out = pl.pallas_call(
        functools.partial(_tconv_s2_kernel, We=We, R=R, act=act),
        out_shape=jax.ShapeDtypeStruct((N, 4, Cout, R), out_dtype),
        grid=(N,),
        in_specs=[
            pl.BlockSpec((1, Cin, S), lambda n: (n, 0, 0)),
            pl.BlockSpec((9, Cout, Cin), lambda n: (0, 0, 0)),
            pl.BlockSpec((Cout, 1), lambda n: (0, 0)),
        ],
        out_specs=pl.BlockSpec((1, 4, Cout, R), lambda n: (n, 0, 0, 0)),
        compiler_params=pltpu.CompilerParams(dimension_semantics=("parallel",)),
    )(xe, w9, b)
    # drop junk column (b == W), interleave the 4 output phases -> (N, Cout, 2H, 2W)
    out = out.reshape(N, 2, 2, Cout, H, We)[:, :, :, :, :, :W]
    out = jnp.transpose(out, (0, 3, 4, 1, 5, 2)).reshape(N, Cout, 2 * H, 2 * W)
    return out


# ---------------------------------------------------------------------------
# Fused latent stack: fc1 -> mean / logvar -> reparameterize -> fc2
# (one pallas_call; intermediates never leave VMEM).
# ---------------------------------------------------------------------------
def _latent_kernel(hf_ref, w1_ref, b1_ref, wm_ref, bm_ref, wlv_ref, blv_ref,
                   eps_ref, w2_ref, b2_ref, d_ref, mean_ref, logvar_ref):
    bf, f32 = jnp.bfloat16, jnp.float32
    x1 = jnp.dot(hf_ref[...], w1_ref[...], preferred_element_type=f32) + b1_ref[...]
    x1b = x1.astype(bf)
    mean = jnp.dot(x1b, wm_ref[...], preferred_element_type=f32) + bm_ref[...]
    logvar = jnp.dot(x1b, wlv_ref[...], preferred_element_type=f32) + blv_ref[...]
    z = mean + jnp.exp(0.5 * logvar) * eps_ref[...]        # reparameterization
    d = jnp.dot(z.astype(bf), w2_ref[...], preferred_element_type=f32) + b2_ref[...]
    d_ref[...] = d.astype(d_ref.dtype)
    mean_ref[...] = mean
    logvar_ref[...] = logvar


# ---------------------------------------------------------------------------
# Parameters (deterministic synthetic init; module __init__ supplies shapes).
# ---------------------------------------------------------------------------
def init_params(key, in_channels, hidden_dim, latent_dim, enc_hw):
    h1, h2, h4 = hidden_dim, hidden_dim * 2, hidden_dim * 4
    flat = h4 * enc_hw * enc_hw
    ks = jax.random.split(key, 20)
    bf = jnp.bfloat16

    def conv_w(k, cin, cout):
        return (jax.random.normal(k, (9, cout, cin), jnp.float32)
                / jnp.sqrt(9.0 * cin)).astype(bf)

    def lin_w(k, fin, fout):
        return (jax.random.normal(k, (fin, fout), jnp.float32)
                / jnp.sqrt(float(fin))).astype(bf)

    def conv_b(k, cout):
        return 0.1 * jax.random.normal(k, (cout, 1), jnp.float32)

    def lin_b(k, fout):
        return 0.1 * jax.random.normal(k, (1, fout), jnp.float32)

    p = {
        "ec1_w": conv_w(ks[0], in_channels, h1), "ec1_b": conv_b(ks[10], h1),
        "ec2_w": conv_w(ks[1], h1, h2),          "ec2_b": conv_b(ks[11], h2),
        "ec3_w": conv_w(ks[2], h2, h4),          "ec3_b": conv_b(ks[12], h4),
        "fc1_w": lin_w(ks[3], flat, latent_dim), "fc1_b": lin_b(ks[13], latent_dim),
        "mean_w": lin_w(ks[4], latent_dim, latent_dim),
        "mean_b": lin_b(ks[14], latent_dim),
        "logvar_w": lin_w(ks[5], latent_dim, latent_dim),
        "logvar_b": lin_b(ks[15], latent_dim),
        "fc2_w": lin_w(ks[6], latent_dim, flat), "fc2_b": lin_b(ks[16], flat),
        "dc1_w": conv_w(ks[7], h4, h2),          "dc1_b": conv_b(ks[17], h2),
        "dc2_w": conv_w(ks[8], h2, h1),          "dc2_b": conv_b(ks[18], h1),
        "dc3_w": conv_w(ks[9], h1, in_channels), "dc3_b": conv_b(ks[19], in_channels),
    }
    return p


# ---------------------------------------------------------------------------
# Forward pass (matches VAE_FConnected.forward).
# ---------------------------------------------------------------------------
def vae_fconnected_forward(params, x_nchw, eps, hidden_dim, enc_hw):
    N = x_nchw.shape[0]
    latent = eps.shape[1]
    h4 = hidden_dim * 4
    flat = h4 * enc_hw * enc_hw
    bf = jnp.bfloat16

    # encoder_conv: 3x (Conv2d(s=2, p=1, k=3) + LeakyReLU(0.2))
    h = conv2d_s2(x_nchw, params["ec1_w"], params["ec1_b"], "leaky_relu", bf)
    h = conv2d_s2(h, params["ec2_w"], params["ec2_b"], "leaky_relu", bf)
    h = conv2d_s2(h, params["ec3_w"], params["ec3_b"], "leaky_relu", bf)

    # nn.Flatten on NCHW == channels-first flatten (no transpose needed)
    hf = h.reshape(N, flat)

    # fused fc1 -> mean/logvar -> reparameterize -> fc2
    d, mean, logvar = pl.pallas_call(
        _latent_kernel,
        out_shape=(
            jax.ShapeDtypeStruct((N, flat), bf),
            jax.ShapeDtypeStruct((N, latent), jnp.float32),
            jax.ShapeDtypeStruct((N, latent), jnp.float32),
        ),
    )(hf, params["fc1_w"], params["fc1_b"],
      params["mean_w"], params["mean_b"],
      params["logvar_w"], params["logvar_b"],
      eps, params["fc2_w"], params["fc2_b"])

    # decode: .view(-1, C, H, W) then 3x ConvTranspose2d
    d = d.reshape(N, h4, enc_hw, enc_hw)
    d = conv_transpose2d_s2(d, params["dc1_w"], params["dc1_b"], "leaky_relu", bf)
    d = conv_transpose2d_s2(d, params["dc2_w"], params["dc2_b"], "leaky_relu", bf)
    x_hat = conv_transpose2d_s2(d, params["dc3_w"], params["dc3_b"], "sigmoid",
                                jnp.float32)
    return x_hat, mean, logvar


# ---------------------------------------------------------------------------
# Independent pure-JAX reference (lax.conv_general_dilated) with the same
# bf16 quantization points, used only for verification in __main__.
# ---------------------------------------------------------------------------
def _ref_conv_s2(x, w9, b, act):
    Cout, Cin = w9.shape[1], w9.shape[2]
    w4 = jnp.transpose(w9.reshape(3, 3, Cout, Cin), (2, 3, 0, 1))
    y = lax.conv_general_dilated(
        x.astype(jnp.bfloat16), w4, window_strides=(2, 2),
        padding=((1, 1), (1, 1)),
        dimension_numbers=("NCHW", "OIHW", "NCHW"),
        preferred_element_type=jnp.float32)
    return _apply_act(y + b.reshape(1, -1, 1, 1), act)


def _ref_tconv_s2(x, w9, b, act):
    Cout, Cin = w9.shape[1], w9.shape[2]
    w4 = jnp.transpose(w9.reshape(3, 3, Cout, Cin), (2, 3, 0, 1))[:, :, ::-1, ::-1]
    y = lax.conv_general_dilated(
        x.astype(jnp.bfloat16), w4, window_strides=(1, 1),
        padding=((1, 2), (1, 2)), lhs_dilation=(2, 2),
        dimension_numbers=("NCHW", "OIHW", "NCHW"),
        preferred_element_type=jnp.float32)
    return _apply_act(y + b.reshape(1, -1, 1, 1), act)


def vae_reference(params, x, eps, hidden_dim, enc_hw):
    bf, f32 = jnp.bfloat16, jnp.float32
    N = x.shape[0]
    h = _ref_conv_s2(x, params["ec1_w"], params["ec1_b"], "leaky_relu").astype(bf)
    h = _ref_conv_s2(h, params["ec2_w"], params["ec2_b"], "leaky_relu").astype(bf)
    h = _ref_conv_s2(h, params["ec3_w"], params["ec3_b"], "leaky_relu").astype(bf)
    hf = h.reshape(N, -1)
    x1 = (jnp.dot(hf, params["fc1_w"], preferred_element_type=f32)
          + params["fc1_b"]).astype(bf)
    mean = jnp.dot(x1, params["mean_w"], preferred_element_type=f32) + params["mean_b"]
    logvar = jnp.dot(x1, params["logvar_w"], preferred_element_type=f32) + params["logvar_b"]
    z = (mean + jnp.exp(0.5 * logvar) * eps).astype(bf)
    d = (jnp.dot(z, params["fc2_w"], preferred_element_type=f32)
         + params["fc2_b"]).astype(bf)
    d = d.reshape(N, hidden_dim * 4, enc_hw, enc_hw)
    d = _ref_tconv_s2(d, params["dc1_w"], params["dc1_b"], "leaky_relu").astype(bf)
    d = _ref_tconv_s2(d, params["dc2_w"], params["dc2_b"], "leaky_relu").astype(bf)
    x_hat = _ref_tconv_s2(d, params["dc3_w"], params["dc3_b"], "sigmoid")
    return x_hat, mean, logvar


# ---------------------------------------------------------------------------
if __name__ == "__main__":
    B, Cin, HW = 2, 1, 32
    hidden_dim, latent_dim = 8, 16
    enc_hw = HW // 8          # three stride-2 convs: 32 -> 16 -> 8 -> 4

    key = jax.random.PRNGKey(0)
    kp, kx, ke = jax.random.split(key, 3)
    params = init_params(kp, Cin, hidden_dim, latent_dim, enc_hw)
    x = jax.random.normal(kx, (B, Cin, HW, HW), jnp.float32)
    # TODO(synk): torch.randn_like inside reparameterization is replaced by an
    # explicit deterministic epsilon argument (no in-kernel Gaussian sampling).
    eps = jax.random.normal(ke, (B, latent_dim), jnp.float32)

    fwd = jax.jit(functools.partial(vae_fconnected_forward,
                                    hidden_dim=hidden_dim, enc_hw=enc_hw))
    x_hat, mean, logvar = fwd(params, x, eps)
    jax.block_until_ready((x_hat, mean, logvar))
    assert x_hat.shape == (B, Cin, HW, HW)
    assert mean.shape == (B, latent_dim) and logvar.shape == (B, latent_dim)

    # verify against an independent lax-conv reference
    ref = jax.jit(functools.partial(vae_reference,
                                    hidden_dim=hidden_dim, enc_hw=enc_hw))
    xr, mr, lvr = ref(params, x, eps)
    jax.block_until_ready((xr, mr, lvr))

    def _maxdiff(a, b):
        return float(jnp.max(jnp.abs(a.astype(jnp.float32) - b.astype(jnp.float32))))

    assert _maxdiff(x_hat, xr) < 5e-2, _maxdiff(x_hat, xr)
    assert _maxdiff(mean, mr) < 5e-2, _maxdiff(mean, mr)
    assert _maxdiff(logvar, lvr) < 5e-2, _maxdiff(logvar, lvr)
    print("KERNEL_OK")
</pallas_src>

<mosaic_0001>
module attributes {stable_mosaic.version = 11 : i64} {
  func.func @_conv_s2_kernel(%arg0: i32, %arg1: memref<1x4x1x384xbf16, #tpu.memory_space<vmem>>, %arg2: memref<9x8x1xbf16, #tpu.memory_space<vmem>>, %arg3: memref<8x1xf32, #tpu.memory_space<vmem>>, %arg4: memref<1x8x272xbf16, #tpu.memory_space<vmem>>) attributes {dimension_semantics = [#tpu.dimension_semantics<parallel>], iteration_bounds = array<i64: 2>, scalar_prefetch = 0 : i64, scratch_operands = 0 : i64, tpu.core_type = #tpu.core_type<tc>, window_params = [{transform_indices = @transform_0, window_bounds = array<i64: 1, 4, 1, 384>}, {pipeline_mode = #tpu.pipeline_mode<synchronous>, transform_indices = @transform_1, window_bounds = array<i64: 9, 8, 1>}, {pipeline_mode = #tpu.pipeline_mode<synchronous>, transform_indices = @transform_2, window_bounds = array<i64: 8, 1>}, {transform_indices = @transform_3, window_bounds = array<i64: 1, 8, 272>}]} {
    %c0 = arith.constant 0 : index
    %c0_0 = arith.constant 0 : index
    %c0_1 = arith.constant 0 : index
    %c0_2 = arith.constant 0 : index
    %0 = vector.load %arg1[%c0, %c0_0, %c0_1, %c0_2] : memref<1x4x1x384xbf16, #tpu.memory_space<vmem>>, vector<1x1x1x384xbf16>
    %1 = vector.shape_cast %0 : vector<1x1x1x384xbf16> to vector<1x384xbf16>
    %c0_3 = arith.constant 0 : index
    %c1 = arith.constant 1 : index
    %c0_4 = arith.constant 0 : index
    %c0_5 = arith.constant 0 : index
    %2 = vector.load %arg1[%c0_3, %c1, %c0_4, %c0_5] : memref<1x4x1x384xbf16, #tpu.memory_space<vmem>>, vector<1x1x1x384xbf16>
    %3 = vector.shape_cast %2 : vector<1x1x1x384xbf16> to vector<1x384xbf16>
    %c0_6 = arith.constant 0 : index
    %c2 = arith.constant 2 : index
    %c0_7 = arith.constant 0 : index
    %c0_8 = arith.constant 0 : index
    %4 = vector.load %arg1[%c0_6, %c2, %c0_7, %c0_8] : memref<1x4x1x384xbf16, #tpu.memory_space<vmem>>, vector<1x1x1x384xbf16>
    %5 = vector.shape_cast %4 : vector<1x1x1x384xbf16> to vector<1x384xbf16>
    %c0_9 = arith.constant 0 : index
    %c3 = arith.constant 3 : index
    %c0_10 = arith.constant 0 : index
    %c0_11 = arith.constant 0 : index
    %6 = vector.load %arg1[%c0_9, %c3, %c0_10, %c0_11] : memref<1x4x1x384xbf16, #tpu.memory_space<vmem>>, vector<1x1x1x384xbf16>
    %7 = vector.shape_cast %6 : vector<1x1x1x384xbf16> to vector<1x384xbf16>
    %c0_12 = arith.constant 0 : index
    %c0_13 = arith.constant 0 : index
    %8 = vector.load %arg3[%c0_12, %c0_13] : memref<8x1xf32, #tpu.memory_space<vmem>>, vector<8x1xf32>
    %9 = vector.shape_cast %8 : vector<8x1xf32> to vector<8x1xf32>
    %10 = vector.broadcast %9 : vector<8x1xf32> to vector<8x272xf32>
    %11 = vector.extract_strided_slice %1 {offsets = [0, 0], sizes = [1, 272], strides = [1, 1]} : vector<1x384xbf16> to vector<1x272xbf16>
    %c0_14 = arith.constant 0 : index
    %c0_15 = arith.constant 0 : index
    %c0_16 = arith.constant 0 : index
    %12 = vector.load %arg2[%c0_14, %c0_15, %c0_16] : memref<9x8x1xbf16, #tpu.memory_space<vmem>>, vector<1x8x1xbf16>
    %13 = vector.shape_cast %12 : vector<1x8x1xbf16> to vector<8x1xbf16>
    %14 = arith.extf %13 : vector<8x1xbf16> to vector<8x1xf32>
    %15 = arith.extf %11 : vector<1x272xbf16> to vector<1x272xf32>
    %16 = vector.broadcast %14 : vector<8x1xf32> to vector<8x272xf32>
    %17 = vector.broadcast %15 : vector<1x272xf32> to vector<8x272xf32>
    %18 = arith.mulf %16, %17 : vector<8x272xf32>
    %19 = arith.addf %10, %18 : vector<8x272xf32>
    %20 = vector.extract_strided_slice %3 {offsets = [0, 0], sizes = [1, 272], strides = [1, 1]} : vector<1x384xbf16> to vector<1x272xbf16>
    %c1_17 = arith.constant 1 : index
    %c0_18 = arith.constant 0 : index
    %c0_19 = arith.constant 0 : index
    %21 = vector.load %arg2[%c1_17, %c0_18, %c0_19] : memref<9x8x1xbf16, #tpu.memory_space<vmem>>, vector<1x8x1xbf16>
    %22 = vector.shape_cast %21 : vector<1x8x1xbf16> to vector<8x1xbf16>
    %23 = arith.extf %22 : vector<8x1xbf16> to vector<8x1xf32>
    %24 = arith.extf %20 : vector<1x272xbf16> to vector<1x272xf32>
    %25 = vector.broadcast %23 : vector<8x1xf32> to vector<8x272xf32>
    %26 = vector.broadcast %24 : vector<1x272xf32> to vector<8x272xf32>
    %27 = arith.mulf %25, %26 : vector<8x272xf32>
    %28 = arith.addf %19, %27 : vector<8x272xf32>
    %29 = vector.extract_strided_slice %1 {offsets = [0, 1], sizes = [1, 272], strides = [1, 1]} : vector<1x384xbf16> to vector<1x272xbf16>
    %c2_20 = arith.constant 2 : index
    %c0_21 = arith.constant 0 : index
    %c0_22 = arith.constant 0 : index
    %30 = vector.load %arg2[%c2_20, %c0_21, %c0_22] : memref<9x8x1xbf16, #tpu.memory_space<vmem>>, vector<1x8x1xbf16>
    %31 = vector.shape_cast %30 : vector<1x8x1xbf16> to vector<8x1xbf16>
    %32 = arith.extf %31 : vector<8x1xbf16> to vector<8x1xf32>
    %33 = arith.extf %29 : vector<1x272xbf16> to vector<1x272xf32>
    %34 = vector.broadcast %32 : vector<8x1xf32> to vector<8x272xf32>
    %35 = vector.broadcast %33 : vector<1x272xf32> to vector<8x272xf32>
    %36 = arith.mulf %34, %35 : vector<8x272xf32>
    %37 = arith.addf %28, %36 : vector<8x272xf32>
    %38 = vector.extract_strided_slice %5 {offsets = [0, 0], sizes = [1, 272], strides = [1, 1]} : vector<1x384xbf16> to vector<1x272xbf16>
    %c3_23 = arith.constant 3 : index
    %c0_24 = arith.constant 0 : index
    %c0_25 = arith.constant 0 : index
    %39 = vector.load %arg2[%c3_23, %c0_24, %c0_25] : memref<9x8x1xbf16, #tpu.memory_space<vmem>>, vector<1x8x1xbf16>
    %40 = vector.shape_cast %39 : vector<1x8x1xbf16> to vector<8x1xbf16>
    %41 = arith.extf %40 : vector<8x1xbf16> to vector<8x1xf32>
    %42 = arith.extf %38 : vector<1x272xbf16> to vector<1x272xf32>
    %43 = vector.broadcast %41 : vector<8x1xf32> to vector<8x272xf32>
    %44 = vector.broadcast %42 : vector<1x272xf32> to vector<8x272xf32>
    %45 = arith.mulf %43, %44 : vector<8x272xf32>
    %46 = arith.addf %37, %45 : vector<8x272xf32>
    %47 = vector.extract_strided_slice %7 {offsets = [0, 0], sizes = [1, 272], strides = [1, 1]} : vector<1x384xbf16> to vector<1x272xbf16>
    %c4 = arith.constant 4 : index
    %c0_26 = arith.constant 0 : index
    %c0_27 = arith.constant 0 : index
    %48 = vector.load %arg2[%c4, %c0_26, %c0_27] : memref<9x8x1xbf16, #tpu.memory_space<vmem>>, vector<1x8x1xbf16>
    %49 = vector.shape_cast %48 : vector<1x8x1xbf16> to vector<8x1xbf16>
    %50 = arith.extf %49 : vector<8x1xbf16> to vector<8x1xf32>
    %51 = arith.extf %47 : vector<1x272xbf16> to vector<1x272xf32>
    %52 = vector.broadcast %50 : vector<8x1xf32> to vector<8x272xf32>
    %53 = vector.broadcast %51 : vector<1x272xf32> to vector<8x272xf32>
    %54 = arith.mulf %52, %53 : vector<8x272xf32>
    %55 = arith.addf %46, %54 : vector<8x272xf32>
    %56 = vector.extract_strided_slice %5 {offsets = [0, 1], sizes = [1, 272], strides = [1, 1]} : vector<1x384xbf16> to vector<1x272xbf16>
    %c5 = arith.constant 5 : index
    %c0_28 = arith.constant 0 : index
    %c0_29 = arith.constant 0 : index
    %57 = vector.load %arg2[%c5, %c0_28, %c0_29] : memref<9x8x1xbf16, #tpu.memory_space<vmem>>, vector<1x8x1xbf16>
    %58 = vector.shape_cast %57 : vector<1x8x1xbf16> to vector<8x1xbf16>
    %59 = arith.extf %58 : vector<8x1xbf16> to vector<8x1xf32>
    %60 = arith.extf %56 : vector<1x272xbf16> to vector<1x272xf32>
    %61 = vector.broadcast %59 : vector<8x1xf32> to vector<8x272xf32>
    %62 = vector.broadcast %60 : vector<1x272xf32> to vector<8x272xf32>
    %63 = arith.mulf %61, %62 : vector<8x272xf32>
    %64 = arith.addf %55, %63 : vector<8x272xf32>
    %65 = vector.extract_strided_slice %1 {offsets = [0, 17], sizes = [1, 272], strides = [1, 1]} : vector<1x384xbf16> to vector<1x272xbf16>
    %c6 = arith.constant 6 : index
    %c0_30 = arith.constant 0 : index
    %c0_31 = arith.constant 0 : index
    %66 = vector.load %arg2[%c6, %c0_30, %c0_31] : memref<9x8x1xbf16, #tpu.memory_space<vmem>>, vector<1x8x1xbf16>
    %67 = vector.shape_cast %66 : vector<1x8x1xbf16> to vector<8x1xbf16>
    %68 = arith.extf %67 : vector<8x1xbf16> to vector<8x1xf32>
    %69 = arith.extf %65 : vector<1x272xbf16> to vector<1x272xf32>
    %70 = vector.broadcast %68 : vector<8x1xf32> to vector<8x272xf32>
    %71 = vector.broadcast %69 : vector<1x272xf32> to vector<8x272xf32>
    %72 = arith.mulf %70, %71 : vector<8x272xf32>
    %73 = arith.addf %64, %72 : vector<8x272xf32>
    %74 = vector.extract_strided_slice %3 {offsets = [0, 17], sizes = [1, 272], strides = [1, 1]} : vector<1x384xbf16> to vector<1x272xbf16>
    %c7 = arith.constant 7 : index
    %c0_32 = arith.constant 0 : index
    %c0_33 = arith.constant 0 : index
    %75 = vector.load %arg2[%c7, %c0_32, %c0_33] : memref<9x8x1xbf16, #tpu.memory_space<vmem>>, vector<1x8x1xbf16>
    %76 = vector.shape_cast %75 : vector<1x8x1xbf16> to vector<8x1xbf16>
    %77 = arith.extf %76 : vector<8x1xbf16> to vector<8x1xf32>
    %78 = arith.extf %74 : vector<1x272xbf16> to vector<1x272xf32>
    %79 = vector.broadcast %77 : vector<8x1xf32> to vector<8x272xf32>
    %80 = vector.broadcast %78 : vector<1x272xf32> to vector<8x272xf32>
    %81 = arith.mulf %79, %80 : vector<8x272xf32>
    %82 = arith.addf %73, %81 : vector<8x272xf32>
    %83 = vector.extract_strided_slice %1 {offsets = [0, 18], sizes = [1, 272], strides = [1, 1]} : vector<1x384xbf16> to vector<1x272xbf16>
    %c8 = arith.constant 8 : index
    %c0_34 = arith.constant 0 : index
    %c0_35 = arith.constant 0 : index
    %84 = vector.load %arg2[%c8, %c0_34, %c0_35] : memref<9x8x1xbf16, #tpu.memory_space<vmem>>, vector<1x8x1xbf16>
    %85 = vector.shape_cast %84 : vector<1x8x1xbf16> to vector<8x1xbf16>
    %86 = arith.extf %85 : vector<8x1xbf16> to vector<8x1xf32>
    %87 = arith.extf %83 : vector<1x272xbf16> to vector<1x272xf32>
    %88 = vector.broadcast %86 : vector<8x1xf32> to vector<8x272xf32>
    %89 = vector.broadcast %87 : vector<1x272xf32> to vector<8x272xf32>
    %90 = arith.mulf %88, %89 : vector<8x272xf32>
    %91 = arith.addf %82, %90 : vector<8x272xf32>
    %cst = arith.constant 0.000000e+00 : f32
    %92 = vector.broadcast %cst : f32 to vector<8x272xf32>
    %93 = arith.cmpf ogt, %91, %92 : vector<8x272xf32>
    %cst_36 = arith.constant 2.000000e-01 : f32
    %94 = vector.broadcast %cst_36 : f32 to vector<8x272xf32>
    %95 = arith.mulf %94, %91 : vector<8x272xf32>
    %96 = arith.select %93, %91, %95 : vector<8x272xi1>, vector<8x272xf32>
    %97 = arith.truncf %96 : vector<8x272xf32> to vector<8x272xbf16>
    %c0_37 = arith.constant 0 : index
    %c0_38 = arith.constant 0 : index
    %c0_39 = arith.constant 0 : index
    %98 = vector.load %arg4[%c0_37, %c0_38, %c0_39] : memref<1x8x272xbf16, #tpu.memory_space<vmem>>, vector<1x8x272xbf16>
    %99 = vector.shape_cast %98 : vector<1x8x272xbf16> to vector<8x272xbf16>
    %100 = vector.shape_cast %97 : vector<8x272xbf16> to vector<1x8x272xbf16>
    tpu.vector_store %arg4[%c0_37, %c0_38, %c0_39], %100 {strides = array<i32>} : memref<1x8x272xbf16, #tpu.memory_space<vmem>>, vector<1x8x272xbf16>,
    return
  }
  func.func @transform_0(%arg0: i32) -> (i32, i32, i32, i32) {
    %c0_i32 = arith.constant 0 : i32
    %c0_i32_0 = arith.constant 0 : i32
    %c0_i32_1 = arith.constant 0 : i32
    %c0_i32_2 = arith.constant 0 : i32
    return %arg0, %c0_i32, %c0_i32_0, %c0_i32_1 : i32, i32, i32, i32
  }
  func.func @transform_1(%arg0: i32) -> (i32, i32, i32) {
    %c0_i32 = arith.constant 0 : i32
    %c0_i32_0 = arith.constant 0 : i32
    %c0_i32_1 = arith.constant 0 : i32
    %c0_i32_2 = arith.constant 0 : i32
    return %c0_i32, %c0_i32_0, %c0_i32_1 : i32, i32, i32
  }
  func.func @transform_2(%arg0: i32) -> (i32, i32) {
    %c0_i32 = arith.constant 0 : i32
    %c0_i32_0 = arith.constant 0 : i32
    %c0_i32_1 = arith.constant 0 : i32
    return %c0_i32, %c0_i32_0 : i32, i32
  }
  func.func @transform_3(%arg0: i32) -> (i32, i32, i32) {
    %c0_i32 = arith.constant 0 : i32
    %c0_i32_0 = arith.constant 0 : i32
    %c0_i32_1 = arith.constant 0 : i32
    return %arg0, %c0_i32, %c0_i32_0 : i32, i32, i32
  }
}

module attributes {stable_mosaic.version = 11 : i64} {
  func.func @_conv_s2_kernel(%arg0: i32, %arg1: memref<1x4x8x128xbf16, #tpu.memory_space<vmem>>, %arg2: memref<9x16x8xbf16, #tpu.memory_space<vmem>>, %arg3: memref<16x1xf32, #tpu.memory_space<vmem>>, %arg4: memref<1x16x72xbf16, #tpu.memory_space<vmem>>) attributes {dimension_semantics = [#tpu.dimension_semantics<parallel>], iteration_bounds = array<i64: 2>, scalar_prefetch = 0 : i64, scratch_operands = 0 : i64, tpu.core_type = #tpu.core_type<tc>, window_params = [{transform_indices = @transform_0, window_bounds = array<i64: 1, 4, 8, 128>}, {pipeline_mode = #tpu.pipeline_mode<synchronous>, transform_indices = @transform_1, window_bounds = array<i64: 9, 16, 8>}, {pipeline_mode = #tpu.pipeline_mode<synchronous>, transform_indices = @transform_2, window_bounds = array<i64: 16, 1>}, {transform_indices = @transform_3, window_bounds = array<i64: 1, 16, 72>}]} {
    %c0 = arith.constant 0 : index
    %c0_0 = arith.constant 0 : index
    %c0_1 = arith.constant 0 : index
    %c0_2 = arith.constant 0 : index
    %0 = vector.load %arg1[%c0, %c0_0, %c0_1, %c0_2] : memref<1x4x8x128xbf16, #tpu.memory_space<vmem>>, vector<1x1x8x128xbf16>
    %1 = vector.shape_cast %0 : vector<1x1x8x128xbf16> to vector<8x128xbf16>
    %c0_3 = arith.constant 0 : index
    %c1 = arith.constant 1 : index
    %c0_4 = arith.constant 0 : index
    %c0_5 = arith.constant 0 : index
    %2 = vector.load %arg1[%c0_3, %c1, %c0_4, %c0_5] : memref<1x4x8x128xbf16, #tpu.memory_space<vmem>>, vector<1x1x8x128xbf16>
    %3 = vector.shape_cast %2 : vector<1x1x8x128xbf16> to vector<8x128xbf16>
    %c0_6 = arith.constant 0 : index
    %c2 = arith.constant 2 : index
    %c0_7 = arith.constant 0 : index
    %c0_8 = arith.constant 0 : index
    %4 = vector.load %arg1[%c0_6, %c2, %c0_7, %c0_8] : memref<1x4x8x128xbf16, #tpu.memory_space<vmem>>, vector<1x1x8x128xbf16>
    %5 = vector.shape_cast %4 : vector<1x1x8x128xbf16> to vector<8x128xbf16>
    %c0_9 = arith.constant 0 : index
    %c3 = arith.constant 3 : index
    %c0_10 = arith.constant 0 : index
    %c0_11 = arith.constant 0 : index
    %6 = vector.load %arg1[%c0_9, %c3, %c0_10, %c0_11] : memref<1x4x8x128xbf16, #tpu.memory_space<vmem>>, vector<1x1x8x128xbf16>
    %7 = vector.shape_cast %6 : vector<1x1x8x128xbf16> to vector<8x128xbf16>
    %c0_12 = arith.constant 0 : index
    %c0_13 = arith.constant 0 : index
    %8 = vector.load %arg3[%c0_12, %c0_13] : memref<16x1xf32, #tpu.memory_space<vmem>>, vector<16x1xf32>
    %9 = vector.shape_cast %8 : vector<16x1xf32> to vector<16x1xf32>
    %10 = vector.broadcast %9 : vector<16x1xf32> to vector<16x72xf32>
    %11 = vector.extract_strided_slice %1 {offsets = [0, 0], sizes = [8, 72], strides = [1, 1]} : vector<8x128xbf16> to vector<8x72xbf16>
    %c0_14 = arith.constant 0 : index
    %c0_15 = arith.constant 0 : index
    %c0_16 = arith.constant 0 : index
    %12 = vector.load %arg2[%c0_14, %c0_15, %c0_16] : memref<9x16x8xbf16, #tpu.memory_space<vmem>>, vector<1x16x8xbf16>
    %13 = vector.shape_cast %12 : vector<1x16x8xbf16> to vector<16x8xbf16>
    %cst = arith.constant dense<0.000000e+00> : vector<16x72xf32>
    %14 = tpu.matmul %13, %11, %cst {dimension_numbers = #tpu.dot_dimension_numbers<[1], [0], [0], [1], [0, 0, 1, 1], [], []>} : vector<16x8xbf16>, vector<8x72xbf16>, vector<16x72xf32> -> vector<16x72xf32>
    %15 = arith.addf %10, %14 : vector<16x72xf32>
    %16 = vector.extract_strided_slice %3 {offsets = [0, 0], sizes = [8, 72], strides = [1, 1]} : vector<8x128xbf16> to vector<8x72xbf16>
    %c1_17 = arith.constant 1 : index
    %c0_18 = arith.constant 0 : index
    %c0_19 = arith.constant 0 : index
    %17 = vector.load %arg2[%c1_17, %c0_18, %c0_19] : memref<9x16x8xbf16, #tpu.memory_space<vmem>>, vector<1x16x8xbf16>
    %18 = vector.shape_cast %17 : vector<1x16x8xbf16> to vector<16x8xbf16>
    %cst_20 = arith.constant dense<0.000000e+00> : vector<16x72xf32>
    %19 = tpu.matmul %18, %16, %cst_20 {dimension_numbers = #tpu.dot_dimension_numbers<[1], [0], [0], [1], [0, 0, 1, 1], [], []>} : vector<16x8xbf16>, vector<8x72xbf16>, vector<16x72xf32> -> vector<16x72xf32>
    %20 = arith.addf %15, %19 : vector<16x72xf32>
    %21 = vector.extract_strided_slice %1 {offsets = [0, 1], sizes = [8, 72], strides = [1, 1]} : vector<8x128xbf16> to vector<8x72xbf16>
    %c2_21 = arith.constant 2 : index
    %c0_22 = arith.constant 0 : index
    %c0_23 = arith.constant 0 : index
    %22 = vector.load %arg2[%c2_21, %c0_22, %c0_23] : memref<9x16x8xbf16, #tpu.memory_space<vmem>>, vector<1x16x8xbf16>
    %23 = vector.shape_cast %22 : vector<1x16x8xbf16> to vector<16x8xbf16>
    %cst_24 = arith.constant dense<0.000000e+00> : vector<16x72xf32>
    %24 = tpu.matmul %23, %21, %cst_24 {dimension_numbers = #tpu.dot_dimension_numbers<[1], [0], [0], [1], [0, 0, 1, 1], [], []>} : vector<16x8xbf16>, vector<8x72xbf16>, vector<16x72xf32> -> vector<16x72xf32>
    %25 = arith.addf %20, %24 : vector<16x72xf32>
    %26 = vector.extract_strided_slice %5 {offsets = [0, 0], sizes = [8, 72], strides = [1, 1]} : vector<8x128xbf16> to vector<8x72xbf16>
    %c3_25 = arith.constant 3 : index
    %c0_26 = arith.constant 0 : index
    %c0_27 = arith.constant 0 : index
    %27 = vector.load %arg2[%c3_25, %c0_26, %c0_27] : memref<9x16x8xbf16, #tpu.memory_space<vmem>>, vector<1x16x8xbf16>
    %28 = vector.shape_cast %27 : vector<1x16x8xbf16> to vector<16x8xbf16>
    %cst_28 = arith.constant dense<0.000000e+00> : vector<16x72xf32>
    %29 = tpu.matmul %28, %26, %cst_28 {dimension_numbers = #tpu.dot_dimension_numbers<[1], [0], [0], [1], [0, 0, 1, 1], [], []>} : vector<16x8xbf16>, vector<8x72xbf16>, vector<16x72xf32> -> vector<16x72xf32>
    %30 = arith.addf %25, %29 : vector<16x72xf32>
    %31 = vector.extract_strided_slice %7 {offsets = [0, 0], sizes = [8, 72], strides = [1, 1]} : vector<8x128xbf16> to vector<8x72xbf16>
    %c4 = arith.constant 4 : index
    %c0_29 = arith.constant 0 : index
    %c0_30 = arith.constant 0 : index
    %32 = vector.load %arg2[%c4, %c0_29, %c0_30] : memref<9x16x8xbf16, #tpu.memory_space<vmem>>, vector<1x16x8xbf16>
    %33 = vector.shape_cast %32 : vector<1x16x8xbf16> to vector<16x8xbf16>
    %cst_31 = arith.constant dense<0.000000e+00> : vector<16x72xf32>
    %34 = tpu.matmul %33, %31, %cst_31 {dimension_numbers = #tpu.dot_dimension_numbers<[1], [0], [0], [1], [0, 0, 1, 1], [], []>} : vector<16x8xbf16>, vector<8x72xbf16>, vector<16x72xf32> -> vector<16x72xf32>
    %35 = arith.addf %30, %34 : vector<16x72xf32>
    %36 = vector.extract_strided_slice %5 {offsets = [0, 1], sizes = [8, 72], strides = [1, 1]} : vector<8x128xbf16> to vector<8x72xbf16>
    %c5 = arith.constant 5 : index
    %c0_32 = arith.constant 0 : index
    %c0_33 = arith.constant 0 : index
    %37 = vector.load %arg2[%c5, %c0_32, %c0_33] : memref<9x16x8xbf16, #tpu.memory_space<vmem>>, vector<1x16x8xbf16>
    %38 = vector.shape_cast %37 : vector<1x16x8xbf16> to vector<16x8xbf16>
    %cst_34 = arith.constant dense<0.000000e+00> : vector<16x72xf32>
    %39 = tpu.matmul %38, %36, %cst_34 {dimension_numbers = #tpu.dot_dimension_numbers<[1], [0], [0], [1], [0, 0, 1, 1], [], []>} : vector<16x8xbf16>, vector<8x72xbf16>, vector<16x72xf32> -> vector<16x72xf32>
    %40 = arith.addf %35, %39 : vector<16x72xf32>
    %41 = vector.extract_strided_slice %1 {offsets = [0, 9], sizes = [8, 72], strides = [1, 1]} : vector<8x128xbf16> to vector<8x72xbf16>
    %c6 = arith.constant 6 : index
    %c0_35 = arith.constant 0 : index
    %c0_36 = arith.constant 0 : index
    %42 = vector.load %arg2[%c6, %c0_35, %c0_36] : memref<9x16x8xbf16, #tpu.memory_space<vmem>>, vector<1x16x8xbf16>
    %43 = vector.shape_cast %42 : vector<1x16x8xbf16> to vector<16x8xbf16>
    %cst_37 = arith.constant dense<0.000000e+00> : vector<16x72xf32>
    %44 = tpu.matmul %43, %41, %cst_37 {dimension_numbers = #tpu.dot_dimension_numbers<[1], [0], [0], [1], [0, 0, 1, 1], [], []>} : vector<16x8xbf16>, vector<8x72xbf16>, vector<16x72xf32> -> vector<16x72xf32>
    %45 = arith.addf %40, %44 : vector<16x72xf32>
    %46 = vector.extract_strided_slice %3 {offsets = [0, 9], sizes = [8, 72], strides = [1, 1]} : vector<8x128xbf16> to vector<8x72xbf16>
    %c7 = arith.constant 7 : index
    %c0_38 = arith.constant 0 : index
    %c0_39 = arith.constant 0 : index
    %47 = vector.load %arg2[%c7, %c0_38, %c0_39] : memref<9x16x8xbf16, #tpu.memory_space<vmem>>, vector<1x16x8xbf16>
    %48 = vector.shape_cast %47 : vector<1x16x8xbf16> to vector<16x8xbf16>
    %cst_40 = arith.constant dense<0.000000e+00> : vector<16x72xf32>
    %49 = tpu.matmul %48, %46, %cst_40 {dimension_numbers = #tpu.dot_dimension_numbers<[1], [0], [0], [1], [0, 0, 1, 1], [], []>} : vector<16x8xbf16>, vector<8x72xbf16>, vector<16x72xf32> -> vector<16x72xf32>
    %50 = arith.addf %45, %49 : vector<16x72xf32>
    %51 = vector.extract_strided_slice %1 {offsets = [0, 10], sizes = [8, 72], strides = [1, 1]} : vector<8x128xbf16> to vector<8x72xbf16>
    %c8 = arith.constant 8 : index
    %c0_41 = arith.constant 0 : index
    %c0_42 = arith.constant 0 : index
    %52 = vector.load %arg2[%c8, %c0_41, %c0_42] : memref<9x16x8xbf16, #tpu.memory_space<vmem>>, vector<1x16x8xbf16>
    %53 = vector.shape_cast %52 : vector<1x16x8xbf16> to vector<16x8xbf16>
    %cst_43 = arith.constant dense<0.000000e+00> : vector<16x72xf32>
    %54 = tpu.matmul %53, %51, %cst_43 {dimension_numbers = #tpu.dot_dimension_numbers<[1], [0], [0], [1], [0, 0, 1, 1], [], []>} : vector<16x8xbf16>, vector<8x72xbf16>, vector<16x72xf32> -> vector<16x72xf32>
    %55 = arith.addf %50, %54 : vector<16x72xf32>
    %cst_44 = arith.constant 0.000000e+00 : f32
    %56 = vector.broadcast %cst_44 : f32 to vector<16x72xf32>
    %57 = arith.cmpf ogt, %55, %56 : vector<16x72xf32>
    %cst_45 = arith.constant 2.000000e-01 : f32
    %58 = vector.broadcast %cst_45 : f32 to vector<16x72xf32>
    %59 = arith.mulf %58, %55 : vector<16x72xf32>
    %60 = arith.select %57, %55, %59 : vector<16x72xi1>, vector<16x72xf32>
    %61 = arith.truncf %60 : vector<16x72xf32> to vector<16x72xbf16>
    %c0_46 = arith.constant 0 : index
    %c0_47 = arith.constant 0 : index
    %c0_48 = arith.constant 0 : index
    %62 = vector.load %arg4[%c0_46, %c0_47, %c0_48] : memref<1x16x72xbf16, #tpu.memory_space<vmem>>, vector<1x16x72xbf16>
    %63 = vector.shape_cast %62 : vector<1x16x72xbf16> to vector<16x72xbf16>
    %64 = vector.shape_cast %61 : vector<16x72xbf16> to vector<1x16x72xbf16>
    tpu.vector_store %arg4[%c0_46, %c0_47, %c0_48], %64 {strides = array<i32>} : memref<1x16x72xbf16, #tpu.memory_space<vmem>>, vector<1x16x72xbf16>,
    return
  }
  func.func @transform_0(%arg0: i32) -> (i32, i32, i32, i32) {
    %c0_i32 = arith.constant 0 : i32
    %c0_i32_0 = arith.constant 0 : i32
    %c0_i32_1 = arith.constant 0 : i32
    %c0_i32_2 = arith.constant 0 : i32
    return %arg0, %c0_i32, %c0_i32_0, %c0_i32_1 : i32, i32, i32, i32
  }
  func.func @transform_1(%arg0: i32) -> (i32, i32, i32) {
    %c0_i32 = arith.constant 0 : i32
    %c0_i32_0 = arith.constant 0 : i32
    %c0_i32_1 = arith.constant 0 : i32
    %c0_i32_2 = arith.constant 0 : i32
    return %c0_i32, %c0_i32_0, %c0_i32_1 : i32, i32, i32
  }
  func.func @transform_2(%arg0: i32) -> (i32, i32) {
    %c0_i32 = arith.constant 0 : i32
    %c0_i32_0 = arith.constant 0 : i32
    %c0_i32_1 = arith.constant 0 : i32
    return %c0_i32, %c0_i32_0 : i32, i32
  }
  func.func @transform_3(%arg0: i32) -> (i32, i32, i32) {
    %c0_i32 = arith.constant 0 : i32
    %c0_i32_0 = arith.constant 0 : i32
    %c0_i32_1 = arith.constant 0 : i32
    return %arg0, %c0_i32, %c0_i32_0 : i32, i32, i32
  }
}

module attributes {stable_mosaic.version = 11 : i64} {
  func.func @_conv_s2_kernel(%arg0: i32, %arg1: memref<1x4x16x128xbf16, #tpu.memory_space<vmem>>, %arg2: memref<9x32x16xbf16, #tpu.memory_space<vmem>>, %arg3: memref<32x1xf32, #tpu.memory_space<vmem>>, %arg4: memref<1x32x20xbf16, #tpu.memory_space<vmem>>) attributes {dimension_semantics = [#tpu.dimension_semantics<parallel>], iteration_bounds = array<i64: 2>, scalar_prefetch = 0 : i64, scratch_operands = 0 : i64, tpu.core_type = #tpu.core_type<tc>, window_params = [{transform_indices = @transform_0, window_bounds = array<i64: 1, 4, 16, 128>}, {pipeline_mode = #tpu.pipeline_mode<synchronous>, transform_indices = @transform_1, window_bounds = array<i64: 9, 32, 16>}, {pipeline_mode = #tpu.pipeline_mode<synchronous>, transform_indices = @transform_2, window_bounds = array<i64: 32, 1>}, {transform_indices = @transform_3, window_bounds = array<i64: 1, 32, 20>}]} {
    %c0 = arith.constant 0 : index
    %c0_0 = arith.constant 0 : index
    %c0_1 = arith.constant 0 : index
    %c0_2 = arith.constant 0 : index
    %0 = vector.load %arg1[%c0, %c0_0, %c0_1, %c0_2] : memref<1x4x16x128xbf16, #tpu.memory_space<vmem>>, vector<1x1x16x128xbf16>
    %1 = vector.shape_cast %0 : vector<1x1x16x128xbf16> to vector<16x128xbf16>
    %c0_3 = arith.constant 0 : index
    %c1 = arith.constant 1 : index
    %c0_4 = arith.constant 0 : index
    %c0_5 = arith.constant 0 : index
    %2 = vector.load %arg1[%c0_3, %c1, %c0_4, %c0_5] : memref<1x4x16x128xbf16, #tpu.memory_space<vmem>>, vector<1x1x16x128xbf16>
    %3 = vector.shape_cast %2 : vector<1x1x16x128xbf16> to vector<16x128xbf16>
    %c0_6 = arith.constant 0 : index
    %c2 = arith.constant 2 : index
    %c0_7 = arith.constant 0 : index
    %c0_8 = arith.constant 0 : index
    %4 = vector.load %arg1[%c0_6, %c2, %c0_7, %c0_8] : memref<1x4x16x128xbf16, #tpu.memory_space<vmem>>, vector<1x1x16x128xbf16>
    %5 = vector.shape_cast %4 : vector<1x1x16x128xbf16> to vector<16x128xbf16>
    %c0_9 = arith.constant 0 : index
    %c3 = arith.constant 3 : index
    %c0_10 = arith.constant 0 : index
    %c0_11 = arith.constant 0 : index
    %6 = vector.load %arg1[%c0_9, %c3, %c0_10, %c0_11] : memref<1x4x16x128xbf16, #tpu.memory_space<vmem>>, vector<1x1x16x128xbf16>
    %7 = vector.shape_cast %6 : vector<1x1x16x128xbf16> to vector<16x128xbf16>
    %c0_12 = arith.constant 0 : index
    %c0_13 = arith.constant 0 : index
    %8 = vector.load %arg3[%c0_12, %c0_13] : memref<32x1xf32, #tpu.memory_space<vmem>>, vector<32x1xf32>
    %9 = vector.shape_cast %8 : vector<32x1xf32> to vector<32x1xf32>
    %10 = vector.broadcast %9 : vector<32x1xf32> to vector<32x20xf32>
    %11 = vector.extract_strided_slice %1 {offsets = [0, 0], sizes = [16, 20], strides = [1, 1]} : vector<16x128xbf16> to vector<16x20xbf16>
    %c0_14 = arith.constant 0 : index
    %c0_15 = arith.constant 0 : index
    %c0_16 = arith.constant 0 : index
    %12 = vector.load %arg2[%c0_14, %c0_15, %c0_16] : memref<9x32x16xbf16, #tpu.memory_space<vmem>>, vector<1x32x16xbf16>
    %13 = vector.shape_cast %12 : vector<1x32x16xbf16> to vector<32x16xbf16>
    %cst = arith.constant dense<0.000000e+00> : vector<32x20xf32>
    %14 = tpu.matmul %13, %11, %cst {dimension_numbers = #tpu.dot_dimension_numbers<[1], [0], [0], [1], [0, 0, 1, 1], [], []>} : vector<32x16xbf16>, vector<16x20xbf16>, vector<32x20xf32> -> vector<32x20xf32>
    %15 = arith.addf %10, %14 : vector<32x20xf32>
    %16 = vector.extract_strided_slice %3 {offsets = [0, 0], sizes = [16, 20], strides = [1, 1]} : vector<16x128xbf16> to vector<16x20xbf16>
    %c1_17 = arith.constant 1 : index
    %c0_18 = arith.constant 0 : index
    %c0_19 = arith.constant 0 : index
    %17 = vector.load %arg2[%c1_17, %c0_18, %c0_19] : memref<9x32x16xbf16, #tpu.memory_space<vmem>>, vector<1x32x16xbf16>
    %18 = vector.shape_cast %17 : vector<1x32x16xbf16> to vector<32x16xbf16>
    %cst_20 = arith.constant dense<0.000000e+00> : vector<32x20xf32>
    %19 = tpu.matmul %18, %16, %cst_20 {dimension_numbers = #tpu.dot_dimension_numbers<[1], [0], [0], [1], [0, 0, 1, 1], [], []>} : vector<32x16xbf16>, vector<16x20xbf16>, vector<32x20xf32> -> vector<32x20xf32>
    %20 = arith.addf %15, %19 : vector<32x20xf32>
    %21 = vector.extract_strided_slice %1 {offsets = [0, 1], sizes = [16, 20], strides = [1, 1]} : vector<16x128xbf16> to vector<16x20xbf16>
    %c2_21 = arith.constant 2 : index
    %c0_22 = arith.constant 0 : index
    %c0_23 = arith.constant 0 : index
    %22 = vector.load %arg2[%c2_21, %c0_22, %c0_23] : memref<9x32x16xbf16, #tpu.memory_space<vmem>>, vector<1x32x16xbf16>
    %23 = vector.shape_cast %22 : vector<1x32x16xbf16> to vector<32x16xbf16>
    %cst_24 = arith.constant dense<0.000000e+00> : vector<32x20xf32>
    %24 = tpu.matmul %23, %21, %cst_24 {dimension_numbers = #tpu.dot_dimension_numbers<[1], [0], [0], [1], [0, 0, 1, 1], [], []>} : vector<32x16xbf16>, vector<16x20xbf16>, vector<32x20xf32> -> vector<32x20xf32>
    %25 = arith.addf %20, %24 : vector<32x20xf32>
    %26 = vector.extract_strided_slice %5 {offsets = [0, 0], sizes = [16, 20], strides = [1, 1]} : vector<16x128xbf16> to vector<16x20xbf16>
    %c3_25 = arith.constant 3 : index
    %c0_26 = arith.constant 0 : index
    %c0_27 = arith.constant 0 : index
    %27 = vector.load %arg2[%c3_25, %c0_26, %c0_27] : memref<9x32x16xbf16, #tpu.memory_space<vmem>>, vector<1x32x16xbf16>
    %28 = vector.shape_cast %27 : vector<1x32x16xbf16> to vector<32x16xbf16>
    %cst_28 = arith.constant dense<0.000000e+00> : vector<32x20xf32>
    %29 = tpu.matmul %28, %26, %cst_28 {dimension_numbers = #tpu.dot_dimension_numbers<[1], [0], [0], [1], [0, 0, 1, 1], [], []>} : vector<32x16xbf16>, vector<16x20xbf16>, vector<32x20xf32> -> vector<32x20xf32>
    %30 = arith.addf %25, %29 : vector<32x20xf32>
    %31 = vector.extract_strided_slice %7 {offsets = [0, 0], sizes = [16, 20], strides = [1, 1]} : vector<16x128xbf16> to vector<16x20xbf16>
    %c4 = arith.constant 4 : index
    %c0_29 = arith.constant 0 : index
    %c0_30 = arith.constant 0 : index
    %32 = vector.load %arg2[%c4, %c0_29, %c0_30] : memref<9x32x16xbf16, #tpu.memory_space<vmem>>, vector<1x32x16xbf16>
    %33 = vector.shape_cast %32 : vector<1x32x16xbf16> to vector<32x16xbf16>
    %cst_31 = arith.constant dense<0.000000e+00> : vector<32x20xf32>
    %34 = tpu.matmul %33, %31, %cst_31 {dimension_numbers = #tpu.dot_dimension_numbers<[1], [0], [0], [1], [0, 0, 1, 1], [], []>} : vector<32x16xbf16>, vector<16x20xbf16>, vector<32x20xf32> -> vector<32x20xf32>
    %35 = arith.addf %30, %34 : vector<32x20xf32>
    %36 = vector.extract_strided_slice %5 {offsets = [0, 1], sizes = [16, 20], strides = [1, 1]} : vector<16x128xbf16> to vector<16x20xbf16>
    %c5 = arith.constant 5 : index
    %c0_32 = arith.constant 0 : index
    %c0_33 = arith.constant 0 : index
    %37 = vector.load %arg2[%c5, %c0_32, %c0_33] : memref<9x32x16xbf16, #tpu.memory_space<vmem>>, vector<1x32x16xbf16>
    %38 = vector.shape_cast %37 : vector<1x32x16xbf16> to vector<32x16xbf16>
    %cst_34 = arith.constant dense<0.000000e+00> : vector<32x20xf32>
    %39 = tpu.matmul %38, %36, %cst_34 {dimension_numbers = #tpu.dot_dimension_numbers<[1], [0], [0], [1], [0, 0, 1, 1], [], []>} : vector<32x16xbf16>, vector<16x20xbf16>, vector<32x20xf32> -> vector<32x20xf32>
    %40 = arith.addf %35, %39 : vector<32x20xf32>
    %41 = vector.extract_strided_slice %1 {offsets = [0, 5], sizes = [16, 20], strides = [1, 1]} : vector<16x128xbf16> to vector<16x20xbf16>
    %c6 = arith.constant 6 : index
    %c0_35 = arith.constant 0 : index
    %c0_36 = arith.constant 0 : index
    %42 = vector.load %arg2[%c6, %c0_35, %c0_36] : memref<9x32x16xbf16, #tpu.memory_space<vmem>>, vector<1x32x16xbf16>
    %43 = vector.shape_cast %42 : vector<1x32x16xbf16> to vector<32x16xbf16>
    %cst_37 = arith.constant dense<0.000000e+00> : vector<32x20xf32>
    %44 = tpu.matmul %43, %41, %cst_37 {dimension_numbers = #tpu.dot_dimension_numbers<[1], [0], [0], [1], [0, 0, 1, 1], [], []>} : vector<32x16xbf16>, vector<16x20xbf16>, vector<32x20xf32> -> vector<32x20xf32>
    %45 = arith.addf %40, %44 : vector<32x20xf32>
    %46 = vector.extract_strided_slice %3 {offsets = [0, 5], sizes = [16, 20], strides = [1, 1]} : vector<16x128xbf16> to vector<16x20xbf16>
    %c7 = arith.constant 7 : index
    %c0_38 = arith.constant 0 : index
    %c0_39 = arith.constant 0 : index
    %47 = vector.load %arg2[%c7, %c0_38, %c0_39] : memref<9x32x16xbf16, #tpu.memory_space<vmem>>, vector<1x32x16xbf16>
    %48 = vector.shape_cast %47 : vector<1x32x16xbf16> to vector<32x16xbf16>
    %cst_40 = arith.constant dense<0.000000e+00> : vector<32x20xf32>
    %49 = tpu.matmul %48, %46, %cst_40 {dimension_numbers = #tpu.dot_dimension_numbers<[1], [0], [0], [1], [0, 0, 1, 1], [], []>} : vector<32x16xbf16>, vector<16x20xbf16>, vector<32x20xf32> -> vector<32x20xf32>
    %50 = arith.addf %45, %49 : vector<32x20xf32>
    %51 = vector.extract_strided_slice %1 {offsets = [0, 6], sizes = [16, 20], strides = [1, 1]} : vector<16x128xbf16> to vector<16x20xbf16>
    %c8 = arith.constant 8 : index
    %c0_41 = arith.constant 0 : index
    %c0_42 = arith.constant 0 : index
    %52 = vector.load %arg2[%c8, %c0_41, %c0_42] : memref<9x32x16xbf16, #tpu.memory_space<vmem>>, vector<1x32x16xbf16>
    %53 = vector.shape_cast %52 : vector<1x32x16xbf16> to vector<32x16xbf16>
    %cst_43 = arith.constant dense<0.000000e+00> : vector<32x20xf32>
    %54 = tpu.matmul %53, %51, %cst_43 {dimension_numbers = #tpu.dot_dimension_numbers<[1], [0], [0], [1], [0, 0, 1, 1], [], []>} : vector<32x16xbf16>, vector<16x20xbf16>, vector<32x20xf32> -> vector<32x20xf32>
    %55 = arith.addf %50, %54 : vector<32x20xf32>
    %cst_44 = arith.constant 0.000000e+00 : f32
    %56 = vector.broadcast %cst_44 : f32 to vector<32x20xf32>
    %57 = arith.cmpf ogt, %55, %56 : vector<32x20xf32>
    %cst_45 = arith.constant 2.000000e-01 : f32
    %58 = vector.broadcast %cst_45 : f32 to vector<32x20xf32>
    %59 = arith.mulf %58, %55 : vector<32x20xf32>
    %60 = arith.select %57, %55, %59 : vector<32x20xi1>, vector<32x20xf32>
    %61 = arith.truncf %60 : vector<32x20xf32> to vector<32x20xbf16>
    %c0_46 = arith.constant 0 : index
    %c0_47 = arith.constant 0 : index
    %c0_48 = arith.constant 0 : index
    %62 = vector.load %arg4[%c0_46, %c0_47, %c0_48] : memref<1x32x20xbf16, #tpu.memory_space<vmem>>, vector<1x32x20xbf16>
    %63 = vector.shape_cast %62 : vector<1x32x20xbf16> to vector<32x20xbf16>
    %64 = vector.shape_cast %61 : vector<32x20xbf16> to vector<1x32x20xbf16>
    tpu.vector_store %arg4[%c0_46, %c0_47, %c0_48], %64 {strides = array<i32>} : memref<1x32x20xbf16, #tpu.memory_space<vmem>>, vector<1x32x20xbf16>,
    return
  }
  func.func @transform_0(%arg0: i32) -> (i32, i32, i32, i32) {
    %c0_i32 = arith.constant 0 : i32
    %c0_i32_0 = arith.constant 0 : i32
    %c0_i32_1 = arith.constant 0 : i32
    %c0_i32_2 = arith.constant 0 : i32
    return %arg0, %c0_i32, %c0_i32_0, %c0_i32_1 : i32, i32, i32, i32
  }
  func.func @transform_1(%arg0: i32) -> (i32, i32, i32) {
    %c0_i32 = arith.constant 0 : i32
    %c0_i32_0 = arith.constant 0 : i32
    %c0_i32_1 = arith.constant 0 : i32
    %c0_i32_2 = arith.constant 0 : i32
    return %c0_i32, %c0_i32_0, %c0_i32_1 : i32, i32, i32
  }
  func.func @transform_2(%arg0: i32) -> (i32, i32) {
    %c0_i32 = arith.constant 0 : i32
    %c0_i32_0 = arith.constant 0 : i32
    %c0_i32_1 = arith.constant 0 : i32
    return %c0_i32, %c0_i32_0 : i32, i32
  }
  func.func @transform_3(%arg0: i32) -> (i32, i32, i32) {
    %c0_i32 = arith.constant 0 : i32
    %c0_i32_0 = arith.constant 0 : i32
    %c0_i32_1 = arith.constant 0 : i32
    return %arg0, %c0_i32, %c0_i32_0 : i32, i32, i32
  }
}

module attributes {stable_mosaic.version = 11 : i64} {
  func.func @_latent_kernel(%arg0: memref<2x512xbf16, #tpu.memory_space<vmem>>, %arg1: memref<512x16xbf16, #tpu.memory_space<vmem>>, %arg2: memref<1x16xf32, #tpu.memory_space<vmem>>, %arg3: memref<16x16xbf16, #tpu.memory_space<vmem>>, %arg4: memref<1x16xf32, #tpu.memory_space<vmem>>, %arg5: memref<16x16xbf16, #tpu.memory_space<vmem>>, %arg6: memref<1x16xf32, #tpu.memory_space<vmem>>, %arg7: memref<2x16xf32, #tpu.memory_space<vmem>>, %arg8: memref<16x512xbf16, #tpu.memory_space<vmem>>, %arg9: memref<1x512xf32, #tpu.memory_space<vmem>>, %arg10: memref<2x512xbf16, #tpu.memory_space<vmem>>, %arg11: memref<2x16xf32, #tpu.memory_space<vmem>>, %arg12: memref<2x16xf32, #tpu.memory_space<vmem>>) attributes {dimension_semantics = [], scalar_prefetch = 0 : i64, scratch_operands = 0 : i64, tpu.core_type = #tpu.core_type<tc>} {
    %c0 = arith.constant 0 : index
    %c0_0 = arith.constant 0 : index
    %0 = vector.load %arg0[%c0, %c0_0] : memref<2x512xbf16, #tpu.memory_space<vmem>>, vector<2x512xbf16>
    %c0_1 = arith.constant 0 : index
    %c0_2 = arith.constant 0 : index
    %1 = vector.load %arg1[%c0_1, %c0_2] : memref<512x16xbf16, #tpu.memory_space<vmem>>, vector<512x16xbf16>
    %cst = arith.constant dense<0.000000e+00> : vector<2x16xf32>
    %2 = tpu.matmul %0, %1, %cst {dimension_numbers = #tpu.dot_dimension_numbers<[1], [0], [0], [1], [0, 0, 1, 1], [], []>} : vector<2x512xbf16>, vector<512x16xbf16>, vector<2x16xf32> -> vector<2x16xf32>
    %c0_3 = arith.constant 0 : index
    %c0_4 = arith.constant 0 : index
    %3 = vector.load %arg2[%c0_3, %c0_4] : memref<1x16xf32, #tpu.memory_space<vmem>>, vector<1x16xf32>
    %4 = vector.broadcast %3 : vector<1x16xf32> to vector<2x16xf32>
    %5 = arith.addf %2, %4 : vector<2x16xf32>
    %6 = arith.truncf %5 : vector<2x16xf32> to vector<2x16xbf16>
    %c0_5 = arith.constant 0 : index
    %c0_6 = arith.constant 0 : index
    %7 = vector.load %arg3[%c0_5, %c0_6] : memref<16x16xbf16, #tpu.memory_space<vmem>>, vector<16x16xbf16>
    %cst_7 = arith.constant dense<0.000000e+00> : vector<2x16xf32>
    %8 = tpu.matmul %6, %7, %cst_7 {dimension_numbers = #tpu.dot_dimension_numbers<[1], [0], [0], [1], [0, 0, 1, 1], [], []>} : vector<2x16xbf16>, vector<16x16xbf16>, vector<2x16xf32> -> vector<2x16xf32>
    %c0_8 = arith.constant 0 : index
    %c0_9 = arith.constant 0 : index
    %9 = vector.load %arg4[%c0_8, %c0_9] : memref<1x16xf32, #tpu.memory_space<vmem>>, vector<1x16xf32>
    %10 = vector.broadcast %9 : vector<1x16xf32> to vector<2x16xf32>
    %11 = arith.addf %8, %10 : vector<2x16xf32>
    %c0_10 = arith.constant 0 : index
    %c0_11 = arith.constant 0 : index
    %12 = vector.load %arg5[%c0_10, %c0_11] : memref<16x16xbf16, #tpu.memory_space<vmem>>, vector<16x16xbf16>
    %cst_12 = arith.constant dense<0.000000e+00> : vector<2x16xf32>
    %13 = tpu.matmul %6, %12, %cst_12 {dimension_numbers = #tpu.dot_dimension_numbers<[1], [0], [0], [1], [0, 0, 1, 1], [], []>} : vector<2x16xbf16>, vector<16x16xbf16>, vector<2x16xf32> -> vector<2x16xf32>
    %c0_13 = arith.constant 0 : index
    %c0_14 = arith.constant 0 : index
    %14 = vector.load %arg6[%c0_13, %c0_14] : memref<1x16xf32, #tpu.memory_space<vmem>>, vector<1x16xf32>
    %15 = vector.broadcast %14 : vector<1x16xf32> to vector<2x16xf32>
    %16 = arith.addf %13, %15 : vector<2x16xf32>
    %cst_15 = arith.constant 5.000000e-01 : f32
    %17 = vector.broadcast %cst_15 : f32 to vector<2x16xf32>
    %18 = arith.mulf %17, %16 : vector<2x16xf32>
    %19 = math.exp %18 : vector<2x16xf32>
    %c0_16 = arith.constant 0 : index
    %c0_17 = arith.constant 0 : index
    %20 = vector.load %arg7[%c0_16, %c0_17] : memref<2x16xf32, #tpu.memory_space<vmem>>, vector<2x16xf32>
    %21 = arith.mulf %19, %20 : vector<2x16xf32>
    %22 = arith.addf %11, %21 : vector<2x16xf32>
    %23 = arith.truncf %22 : vector<2x16xf32> to vector<2x16xbf16>
    %c0_18 = arith.constant 0 : index
    %c0_19 = arith.constant 0 : index
    %24 = vector.load %arg8[%c0_18, %c0_19] : memref<16x512xbf16, #tpu.memory_space<vmem>>, vector<16x512xbf16>
    %cst_20 = arith.constant dense<0.000000e+00> : vector<2x512xf32>
    %25 = tpu.matmul %23, %24, %cst_20 {dimension_numbers = #tpu.dot_dimension_numbers<[1], [0], [0], [1], [0, 0, 1, 1], [], []>} : vector<2x16xbf16>, vector<16x512xbf16>, vector<2x512xf32> -> vector<2x512xf32>
    %c0_21 = arith.constant 0 : index
    %c0_22 = arith.constant 0 : index
    %26 = vector.load %arg9[%c0_21, %c0_22] : memref<1x512xf32, #tpu.memory_space<vmem>>, vector<1x512xf32>
    %27 = vector.broadcast %26 : vector<1x512xf32> to vector<2x512xf32>
    %28 = arith.addf %25, %27 : vector<2x512xf32>
    %29 = arith.truncf %28 : vector<2x512xf32> to vector<2x512xbf16>
    %c0_23 = arith.constant 0 : index
    %c0_24 = arith.constant 0 : index
    %30 = vector.load %arg10[%c0_23, %c0_24] : memref<2x512xbf16, #tpu.memory_space<vmem>>, vector<2x512xbf16>
    tpu.vector_store %arg10[%c0_23, %c0_24], %29 {strides = array<i32>} : memref<2x512xbf16, #tpu.memory_space<vmem>>, vector<2x512xbf16>,
    %c0_25 = arith.constant 0 : index
    %c0_26 = arith.constant 0 : index
    %31 = vector.load %arg11[%c0_25, %c0_26] : memref<2x16xf32, #tpu.memory_space<vmem>>, vector<2x16xf32>
    tpu.vector_store %arg11[%c0_25, %c0_26], %11 {strides = array<i32>} : memref<2x16xf32, #tpu.memory_space<vmem>>, vector<2x16xf32>,
    %c0_27 = arith.constant 0 : index
    %c0_28 = arith.constant 0 : index
    %32 = vector.load %arg12[%c0_27, %c0_28] : memref<2x16xf32, #tpu.memory_space<vmem>>, vector<2x16xf32>
    tpu.vector_store %arg12[%c0_27, %c0_28], %16 {strides = array<i32>} : memref<2x16xf32, #tpu.memory_space<vmem>>, vector<2x16xf32>,
    return
  }
}

module attributes {stable_mosaic.version = 11 : i64} {
  func.func @_tconv_s2_kernel(%arg0: i32, %arg1: memref<1x32x128xbf16, #tpu.memory_space<vmem>>, %arg2: memref<9x16x32xbf16, #tpu.memory_space<vmem>>, %arg3: memref<16x1xf32, #tpu.memory_space<vmem>>, %arg4: memref<1x4x16x20xbf16, #tpu.memory_space<vmem>>) attributes {dimension_semantics = [#tpu.dimension_semantics<parallel>], iteration_bounds = array<i64: 2>, scalar_prefetch = 0 : i64, scratch_operands = 0 : i64, tpu.core_type = #tpu.core_type<tc>, window_params = [{transform_indices = @transform_0, window_bounds = array<i64: 1, 32, 128>}, {pipeline_mode = #tpu.pipeline_mode<synchronous>, transform_indices = @transform_1, window_bounds = array<i64: 9, 16, 32>}, {pipeline_mode = #tpu.pipeline_mode<synchronous>, transform_indices = @transform_2, window_bounds = array<i64: 16, 1>}, {transform_indices = @transform_3, window_bounds = array<i64: 1, 4, 16, 20>}]} {
    %c0 = arith.constant 0 : index
    %c0_0 = arith.constant 0 : index
    %c0_1 = arith.constant 0 : index
    %0 = vector.load %arg1[%c0, %c0_0, %c0_1] : memref<1x32x128xbf16, #tpu.memory_space<vmem>>, vector<1x32x128xbf16>
    %1 = vector.shape_cast %0 : vector<1x32x128xbf16> to vector<32x128xbf16>
    %c0_2 = arith.constant 0 : index
    %c0_3 = arith.constant 0 : index
    %2 = vector.load %arg3[%c0_2, %c0_3] : memref<16x1xf32, #tpu.memory_space<vmem>>, vector<16x1xf32>
    %3 = vector.shape_cast %2 : vector<16x1xf32> to vector<16x1xf32>
    %4 = vector.broadcast %3 : vector<16x1xf32> to vector<16x20xf32>
    %5 = vector.extract_strided_slice %1 {offsets = [0, 0], sizes = [32, 20], strides = [1, 1]} : vector<32x128xbf16> to vector<32x20xbf16>
    %c4 = arith.constant 4 : index
    %c0_4 = arith.constant 0 : index
    %c0_5 = arith.constant 0 : index
    %6 = vector.load %arg2[%c4, %c0_4, %c0_5] : memref<9x16x32xbf16, #tpu.memory_space<vmem>>, vector<1x16x32xbf16>
    %7 = vector.shape_cast %6 : vector<1x16x32xbf16> to vector<16x32xbf16>
    %cst = arith.constant dense<0.000000e+00> : vector<16x20xf32>
    %8 = tpu.matmul %7, %5, %cst {dimension_numbers = #tpu.dot_dimension_numbers<[1], [0], [0], [1], [0, 0, 1, 1], [], []>} : vector<16x32xbf16>, vector<32x20xbf16>, vector<16x20xf32> -> vector<16x20xf32>
    %9 = arith.addf %4, %8 : vector<16x20xf32>
    %cst_6 = arith.constant 0.000000e+00 : f32
    %10 = vector.broadcast %cst_6 : f32 to vector<16x20xf32>
    %11 = arith.cmpf ogt, %9, %10 : vector<16x20xf32>
    %cst_7 = arith.constant 2.000000e-01 : f32
    %12 = vector.broadcast %cst_7 : f32 to vector<16x20xf32>
    %13 = arith.mulf %12, %9 : vector<16x20xf32>
    %14 = arith.select %11, %9, %13 : vector<16x20xi1>, vector<16x20xf32>
    %15 = arith.truncf %14 : vector<16x20xf32> to vector<16x20xbf16>
    %c0_8 = arith.constant 0 : index
    %c0_9 = arith.constant 0 : index
    %c0_10 = arith.constant 0 : index
    %c0_11 = arith.constant 0 : index
    %16 = vector.load %arg4[%c0_8, %c0_9, %c0_10, %c0_11] : memref<1x4x16x20xbf16, #tpu.memory_space<vmem>>, vector<1x1x16x20xbf16>
    %17 = vector.shape_cast %16 : vector<1x1x16x20xbf16> to vector<16x20xbf16>
    %18 = vector.shape_cast %15 : vector<16x20xbf16> to vector<1x1x16x20xbf16>
    tpu.vector_store %arg4[%c0_8, %c0_9, %c0_10, %c0_11], %18 {strides = array<i32>} : memref<1x4x16x20xbf16, #tpu.memory_space<vmem>>, vector<1x1x16x20xbf16>,
    %c0_12 = arith.constant 0 : index
    %c0_13 = arith.constant 0 : index
    %19 = vector.load %arg3[%c0_12, %c0_13] : memref<16x1xf32, #tpu.memory_space<vmem>>, vector<16x1xf32>
    %20 = vector.shape_cast %19 : vector<16x1xf32> to vector<16x1xf32>
    %21 = vector.broadcast %20 : vector<16x1xf32> to vector<16x20xf32>
    %22 = vector.extract_strided_slice %1 {offsets = [0, 1], sizes = [32, 20], strides = [1, 1]} : vector<32x128xbf16> to vector<32x20xbf16>
    %c3 = arith.constant 3 : index
    %c0_14 = arith.constant 0 : index
    %c0_15 = arith.constant 0 : index
    %23 = vector.load %arg2[%c3, %c0_14, %c0_15] : memref<9x16x32xbf16, #tpu.memory_space<vmem>>, vector<1x16x32xbf16>
    %24 = vector.shape_cast %23 : vector<1x16x32xbf16> to vector<16x32xbf16>
    %cst_16 = arith.constant dense<0.000000e+00> : vector<16x20xf32>
    %25 = tpu.matmul %24, %22, %cst_16 {dimension_numbers = #tpu.dot_dimension_numbers<[1], [0], [0], [1], [0, 0, 1, 1], [], []>} : vector<16x32xbf16>, vector<32x20xbf16>, vector<16x20xf32> -> vector<16x20xf32>
    %26 = arith.addf %21, %25 : vector<16x20xf32>
    %27 = vector.extract_strided_slice %1 {offsets = [0, 0], sizes = [32, 20], strides = [1, 1]} : vector<32x128xbf16> to vector<32x20xbf16>
    %c5 = arith.constant 5 : index
    %c0_17 = arith.constant 0 : index
    %c0_18 = arith.constant 0 : index
    %28 = vector.load %arg2[%c5, %c0_17, %c0_18] : memref<9x16x32xbf16, #tpu.memory_space<vmem>>, vector<1x16x32xbf16>
    %29 = vector.shape_cast %28 : vector<1x16x32xbf16> to vector<16x32xbf16>
    %cst_19 = arith.constant dense<0.000000e+00> : vector<16x20xf32>
    %30 = tpu.matmul %29, %27, %cst_19 {dimension_numbers = #tpu.dot_dimension_numbers<[1], [0], [0], [1], [0, 0, 1, 1], [], []>} : vector<16x32xbf16>, vector<32x20xbf16>, vector<16x20xf32> -> vector<16x20xf32>
    %31 = arith.addf %26, %30 : vector<16x20xf32>
    %cst_20 = arith.constant 0.000000e+00 : f32
    %32 = vector.broadcast %cst_20 : f32 to vector<16x20xf32>
    %33 = arith.cmpf ogt, %31, %32 : vector<16x20xf32>
    %cst_21 = arith.constant 2.000000e-01 : f32
    %34 = vector.broadcast %cst_21 : f32 to vector<16x20xf32>
    %35 = arith.mulf %34, %31 : vector<16x20xf32>
    %36 = arith.select %33, %31, %35 : vector<16x20xi1>, vector<16x20xf32>
    %37 = arith.truncf %36 : vector<16x20xf32> to vector<16x20xbf16>
    %c0_22 = arith.constant 0 : index
    %c1 = arith.constant 1 : index
    %c0_23 = arith.constant 0 : index
    %c0_24 = arith.constant 0 : index
    %38 = vector.load %arg4[%c0_22, %c1, %c0_23, %c0_24] : memref<1x4x16x20xbf16, #tpu.memory_space<vmem>>, vector<1x1x16x20xbf16>
    %39 = vector.shape_cast %38 : vector<1x1x16x20xbf16> to vector<16x20xbf16>
    %40 = vector.shape_cast %37 : vector<16x20xbf16> to vector<1x1x16x20xbf16>
    tpu.vector_store %arg4[%c0_22, %c1, %c0_23, %c0_24], %40 {strides = array<i32>} : memref<1x4x16x20xbf16, #tpu.memory_space<vmem>>, vector<1x1x16x20xbf16>,
    %c0_25 = arith.constant 0 : index
    %c0_26 = arith.constant 0 : index
    %41 = vector.load %arg3[%c0_25, %c0_26] : memref<16x1xf32, #tpu.memory_space<vmem>>, vector<16x1xf32>
    %42 = vector.shape_cast %41 : vector<16x1xf32> to vector<16x1xf32>
    %43 = vector.broadcast %42 : vector<16x1xf32> to vector<16x20xf32>
    %44 = vector.extract_strided_slice %1 {offsets = [0, 5], sizes = [32, 20], strides = [1, 1]} : vector<32x128xbf16> to vector<32x20xbf16>
    %c1_27 = arith.constant 1 : index
    %c0_28 = arith.constant 0 : index
    %c0_29 = arith.constant 0 : index
    %45 = vector.load %arg2[%c1_27, %c0_28, %c0_29] : memref<9x16x32xbf16, #tpu.memory_space<vmem>>, vector<1x16x32xbf16>
    %46 = vector.shape_cast %45 : vector<1x16x32xbf16> to vector<16x32xbf16>
    %cst_30 = arith.constant dense<0.000000e+00> : vector<16x20xf32>
    %47 = tpu.matmul %46, %44, %cst_30 {dimension_numbers = #tpu.dot_dimension_numbers<[1], [0], [0], [1], [0, 0, 1, 1], [], []>} : vector<16x32xbf16>, vector<32x20xbf16>, vector<16x20xf32> -> vector<16x20xf32>
    %48 = arith.addf %43, %47 : vector<16x20xf32>
    %49 = vector.extract_strided_slice %1 {offsets = [0, 0], sizes = [32, 20], strides = [1, 1]} : vector<32x128xbf16> to vector<32x20xbf16>
    %c7 = arith.constant 7 : index
    %c0_31 = arith.constant 0 : index
    %c0_32 = arith.constant 0 : index
    %50 = vector.load %arg2[%c7, %c0_31, %c0_32] : memref<9x16x32xbf16, #tpu.memory_space<vmem>>, vector<1x16x32xbf16>
    %51 = vector.shape_cast %50 : vector<1x16x32xbf16> to vector<16x32xbf16>
    %cst_33 = arith.constant dense<0.000000e+00> : vector<16x20xf32>
    %52 = tpu.matmul %51, %49, %cst_33 {dimension_numbers = #tpu.dot_dimension_numbers<[1], [0], [0], [1], [0, 0, 1, 1], [], []>} : vector<16x32xbf16>, vector<32x20xbf16>, vector<16x20xf32> -> vector<16x20xf32>
    %53 = arith.addf %48, %52 : vector<16x20xf32>
    %cst_34 = arith.constant 0.000000e+00 : f32
    %54 = vector.broadcast %cst_34 : f32 to vector<16x20xf32>
    %55 = arith.cmpf ogt, %53, %54 : vector<16x20xf32>
    %cst_35 = arith.constant 2.000000e-01 : f32
    %56 = vector.broadcast %cst_35 : f32 to vector<16x20xf32>
    %57 = arith.mulf %56, %53 : vector<16x20xf32>
    %58 = arith.select %55, %53, %57 : vector<16x20xi1>, vector<16x20xf32>
    %59 = arith.truncf %58 : vector<16x20xf32> to vector<16x20xbf16>
    %c0_36 = arith.constant 0 : index
    %c2 = arith.constant 2 : index
    %c0_37 = arith.constant 0 : index
    %c0_38 = arith.constant 0 : index
    %60 = vector.load %arg4[%c0_36, %c2, %c0_37, %c0_38] : memref<1x4x16x20xbf16, #tpu.memory_space<vmem>>, vector<1x1x16x20xbf16>
    %61 = vector.shape_cast %60 : vector<1x1x16x20xbf16> to vector<16x20xbf16>
    %62 = vector.shape_cast %59 : vector<16x20xbf16> to vector<1x1x16x20xbf16>
    tpu.vector_store %arg4[%c0_36, %c2, %c0_37, %c0_38], %62 {strides = array<i32>} : memref<1x4x16x20xbf16, #tpu.memory_space<vmem>>, vector<1x1x16x20xbf16>,
    %c0_39 = arith.constant 0 : index
    %c0_40 = arith.constant 0 : index
    %63 = vector.load %arg3[%c0_39, %c0_40] : memref<16x1xf32, #tpu.memory_space<vmem>>, vector<16x1xf32>
    %64 = vector.shape_cast %63 : vector<16x1xf32> to vector<16x1xf32>
    %65 = vector.broadcast %64 : vector<16x1xf32> to vector<16x20xf32>
    %66 = vector.extract_strided_slice %1 {offsets = [0, 6], sizes = [32, 20], strides = [1, 1]} : vector<32x128xbf16> to vector<32x20xbf16>
    %c0_41 = arith.constant 0 : index
    %c0_42 = arith.constant 0 : index
    %c0_43 = arith.constant 0 : index
    %67 = vector.load %arg2[%c0_41, %c0_42, %c0_43] : memref<9x16x32xbf16, #tpu.memory_space<vmem>>, vector<1x16x32xbf16>
    %68 = vector.shape_cast %67 : vector<1x16x32xbf16> to vector<16x32xbf16>
    %cst_44 = arith.constant dense<0.000000e+00> : vector<16x20xf32>
    %69 = tpu.matmul %68, %66, %cst_44 {dimension_numbers = #tpu.dot_dimension_numbers<[1], [0], [0], [1], [0, 0, 1, 1], [], []>} : vector<16x32xbf16>, vector<32x20xbf16>, vector<16x20xf32> -> vector<16x20xf32>
    %70 = arith.addf %65, %69 : vector<16x20xf32>
    %71 = vector.extract_strided_slice %1 {offsets = [0, 5], sizes = [32, 20], strides = [1, 1]} : vector<32x128xbf16> to vector<32x20xbf16>
    %c2_45 = arith.constant 2 : index
    %c0_46 = arith.constant 0 : index
    %c0_47 = arith.constant 0 : index
    %72 = vector.load %arg2[%c2_45, %c0_46, %c0_47] : memref<9x16x32xbf16, #tpu.memory_space<vmem>>, vector<1x16x32xbf16>
    %73 = vector.shape_cast %72 : vector<1x16x32xbf16> to vector<16x32xbf16>
    %cst_48 = arith.constant dense<0.000000e+00> : vector<16x20xf32>
    %74 = tpu.matmul %73, %71, %cst_48 {dimension_numbers = #tpu.dot_dimension_numbers<[1], [0], [0], [1], [0, 0, 1, 1], [], []>} : vector<16x32xbf16>, vector<32x20xbf16>, vector<16x20xf32> -> vector<16x20xf32>
    %75 = arith.addf %70, %74 : vector<16x20xf32>
    %76 = vector.extract_strided_slice %1 {offsets = [0, 1], sizes = [32, 20], strides = [1, 1]} : vector<32x128xbf16> to vector<32x20xbf16>
    %c6 = arith.constant 6 : index
    %c0_49 = arith.constant 0 : index
    %c0_50 = arith.constant 0 : index
    %77 = vector.load %arg2[%c6, %c0_49, %c0_50] : memref<9x16x32xbf16, #tpu.memory_space<vmem>>, vector<1x16x32xbf16>
    %78 = vector.shape_cast %77 : vector<1x16x32xbf16> to vector<16x32xbf16>
    %cst_51 = arith.constant dense<0.000000e+00> : vector<16x20xf32>
    %79 = tpu.matmul %78, %76, %cst_51 {dimension_numbers = #tpu.dot_dimension_numbers<[1], [0], [0], [1], [0, 0, 1, 1], [], []>} : vector<16x32xbf16>, vector<32x20xbf16>, vector<16x20xf32> -> vector<16x20xf32>
    %80 = arith.addf %75, %79 : vector<16x20xf32>
    %81 = vector.extract_strided_slice %1 {offsets = [0, 0], sizes = [32, 20], strides = [1, 1]} : vector<32x128xbf16> to vector<32x20xbf16>
    %c8 = arith.constant 8 : index
    %c0_52 = arith.constant 0 : index
    %c0_53 = arith.constant 0 : index
    %82 = vector.load %arg2[%c8, %c0_52, %c0_53] : memref<9x16x32xbf16, #tpu.memory_space<vmem>>, vector<1x16x32xbf16>
    %83 = vector.shape_cast %82 : vector<1x16x32xbf16> to vector<16x32xbf16>
    %cst_54 = arith.constant dense<0.000000e+00> : vector<16x20xf32>
    %84 = tpu.matmul %83, %81, %cst_54 {dimension_numbers = #tpu.dot_dimension_numbers<[1], [0], [0], [1], [0, 0, 1, 1], [], []>} : vector<16x32xbf16>, vector<32x20xbf16>, vector<16x20xf32> -> vector<16x20xf32>
    %85 = arith.addf %80, %84 : vector<16x20xf32>
    %cst_55 = arith.constant 0.000000e+00 : f32
    %86 = vector.broadcast %cst_55 : f32 to vector<16x20xf32>
    %87 = arith.cmpf ogt, %85, %86 : vector<16x20xf32>
    %cst_56 = arith.constant 2.000000e-01 : f32
    %88 = vector.broadcast %cst_56 : f32 to vector<16x20xf32>
    %89 = arith.mulf %88, %85 : vector<16x20xf32>
    %90 = arith.select %87, %85, %89 : vector<16x20xi1>, vector<16x20xf32>
    %91 = arith.truncf %90 : vector<16x20xf32> to vector<16x20xbf16>
    %c0_57 = arith.constant 0 : index
    %c3_58 = arith.constant 3 : index
    %c0_59 = arith.constant 0 : index
    %c0_60 = arith.constant 0 : index
    %92 = vector.load %arg4[%c0_57, %c3_58, %c0_59, %c0_60] : memref<1x4x16x20xbf16, #tpu.memory_space<vmem>>, vector<1x1x16x20xbf16>
    %93 = vector.shape_cast %92 : vector<1x1x16x20xbf16> to vector<16x20xbf16>
    %94 = vector.shape_cast %91 : vector<16x20xbf16> to vector<1x1x16x20xbf16>
    tpu.vector_store %arg4[%c0_57, %c3_58, %c0_59, %c0_60], %94 {strides = array<i32>} : memref<1x4x16x20xbf16, #tpu.memory_space<vmem>>, vector<1x1x16x20xbf16>,
    return
  }
  func.func @transform_0(%arg0: i32) -> (i32, i32, i32) {
    %c0_i32 = arith.constant 0 : i32
    %c0_i32_0 = arith.constant 0 : i32
    %c0_i32_1 = arith.constant 0 : i32
    return %arg0, %c0_i32, %c0_i32_0 : i32, i32, i32
  }
  func.func @transform_1(%arg0: i32) -> (i32, i32, i32) {
    %c0_i32 = arith.constant 0 : i32
    %c0_i32_0 = arith.constant 0 : i32
    %c0_i32_1 = arith.constant 0 : i32
    %c0_i32_2 = arith.constant 0 : i32
    return %c0_i32, %c0_i32_0, %c0_i32_1 : i32, i32, i32
  }
  func.func @transform_2(%arg0: i32) -> (i32, i32) {
    %c0_i32 = arith.constant 0 : i32
    %c0_i32_0 = arith.constant 0 : i32
    %c0_i32_1 = arith.constant 0 : i32
    return %c0_i32, %c0_i32_0 : i32, i32
  }
  func.func @transform_3(%arg0: i32) -> (i32, i32, i32, i32) {
    %c0_i32 = arith.constant 0 : i32
    %c0_i32_0 = arith.constant 0 : i32
    %c0_i32_1 = arith.constant 0 : i32
    %c0_i32_2 = arith.constant 0 : i32
    return %arg0, %c0_i32, %c0_i32_0, %c0_i32_1 : i32, i32, i32, i32
  }
}

module attributes {stable_mosaic.version = 11 : i64} {
  func.func @_tconv_s2_kernel(%arg0: i32, %arg1: memref<1x16x128xbf16, #tpu.memory_space<vmem>>, %arg2: memref<9x8x16xbf16, #tpu.memory_space<vmem>>, %arg3: memref<8x1xf32, #tpu.memory_space<vmem>>, %arg4: memref<1x4x8x72xbf16, #tpu.memory_space<vmem>>) attributes {dimension_semantics = [#tpu.dimension_semantics<parallel>], iteration_bounds = array<i64: 2>, scalar_prefetch = 0 : i64, scratch_operands = 0 : i64, tpu.core_type = #tpu.core_type<tc>, window_params = [{transform_indices = @transform_0, window_bounds = array<i64: 1, 16, 128>}, {pipeline_mode = #tpu.pipeline_mode<synchronous>, transform_indices = @transform_1, window_bounds = array<i64: 9, 8, 16>}, {pipeline_mode = #tpu.pipeline_mode<synchronous>, transform_indices = @transform_2, window_bounds = array<i64: 8, 1>}, {transform_indices = @transform_3, window_bounds = array<i64: 1, 4, 8, 72>}]} {
    %c0 = arith.constant 0 : index
    %c0_0 = arith.constant 0 : index
    %c0_1 = arith.constant 0 : index
    %0 = vector.load %arg1[%c0, %c0_0, %c0_1] : memref<1x16x128xbf16, #tpu.memory_space<vmem>>, vector<1x16x128xbf16>
    %1 = vector.shape_cast %0 : vector<1x16x128xbf16> to vector<16x128xbf16>
    %c0_2 = arith.constant 0 : index
    %c0_3 = arith.constant 0 : index
    %2 = vector.load %arg3[%c0_2, %c0_3] : memref<8x1xf32, #tpu.memory_space<vmem>>, vector<8x1xf32>
    %3 = vector.shape_cast %2 : vector<8x1xf32> to vector<8x1xf32>
    %4 = vector.broadcast %3 : vector<8x1xf32> to vector<8x72xf32>
    %5 = vector.extract_strided_slice %1 {offsets = [0, 0], sizes = [16, 72], strides = [1, 1]} : vector<16x128xbf16> to vector<16x72xbf16>
    %c4 = arith.constant 4 : index
    %c0_4 = arith.constant 0 : index
    %c0_5 = arith.constant 0 : index
    %6 = vector.load %arg2[%c4, %c0_4, %c0_5] : memref<9x8x16xbf16, #tpu.memory_space<vmem>>, vector<1x8x16xbf16>
    %7 = vector.shape_cast %6 : vector<1x8x16xbf16> to vector<8x16xbf16>
    %cst = arith.constant dense<0.000000e+00> : vector<8x72xf32>
    %8 = tpu.matmul %7, %5, %cst {dimension_numbers = #tpu.dot_dimension_numbers<[1], [0], [0], [1], [0, 0, 1, 1], [], []>} : vector<8x16xbf16>, vector<16x72xbf16>, vector<8x72xf32> -> vector<8x72xf32>
    %9 = arith.addf %4, %8 : vector<8x72xf32>
    %cst_6 = arith.constant 0.000000e+00 : f32
    %10 = vector.broadcast %cst_6 : f32 to vector<8x72xf32>
    %11 = arith.cmpf ogt, %9, %10 : vector<8x72xf32>
    %cst_7 = arith.constant 2.000000e-01 : f32
    %12 = vector.broadcast %cst_7 : f32 to vector<8x72xf32>
    %13 = arith.mulf %12, %9 : vector<8x72xf32>
    %14 = arith.select %11, %9, %13 : vector<8x72xi1>, vector<8x72xf32>
    %15 = arith.truncf %14 : vector<8x72xf32> to vector<8x72xbf16>
    %c0_8 = arith.constant 0 : index
    %c0_9 = arith.constant 0 : index
    %c0_10 = arith.constant 0 : index
    %c0_11 = arith.constant 0 : index
    %16 = vector.load %arg4[%c0_8, %c0_9, %c0_10, %c0_11] : memref<1x4x8x72xbf16, #tpu.memory_space<vmem>>, vector<1x1x8x72xbf16>
    %17 = vector.shape_cast %16 : vector<1x1x8x72xbf16> to vector<8x72xbf16>
    %18 = vector.shape_cast %15 : vector<8x72xbf16> to vector<1x1x8x72xbf16>
    tpu.vector_store %arg4[%c0_8, %c0_9, %c0_10, %c0_11], %18 {strides = array<i32>} : memref<1x4x8x72xbf16, #tpu.memory_space<vmem>>, vector<1x1x8x72xbf16>,
    %c0_12 = arith.constant 0 : index
    %c0_13 = arith.constant 0 : index
    %19 = vector.load %arg3[%c0_12, %c0_13] : memref<8x1xf32, #tpu.memory_space<vmem>>, vector<8x1xf32>
    %20 = vector.shape_cast %19 : vector<8x1xf32> to vector<8x1xf32>
    %21 = vector.broadcast %20 : vector<8x1xf32> to vector<8x72xf32>
    %22 = vector.extract_strided_slice %1 {offsets = [0, 1], sizes = [16, 72], strides = [1, 1]} : vector<16x128xbf16> to vector<16x72xbf16>
    %c3 = arith.constant 3 : index
    %c0_14 = arith.constant 0 : index
    %c0_15 = arith.constant 0 : index
    %23 = vector.load %arg2[%c3, %c0_14, %c0_15] : memref<9x8x16xbf16, #tpu.memory_space<vmem>>, vector<1x8x16xbf16>
    %24 = vector.shape_cast %23 : vector<1x8x16xbf16> to vector<8x16xbf16>
    %cst_16 = arith.constant dense<0.000000e+00> : vector<8x72xf32>
    %25 = tpu.matmul %24, %22, %cst_16 {dimension_numbers = #tpu.dot_dimension_numbers<[1], [0], [0], [1], [0, 0, 1, 1], [], []>} : vector<8x16xbf16>, vector<16x72xbf16>, vector<8x72xf32> -> vector<8x72xf32>
    %26 = arith.addf %21, %25 : vector<8x72xf32>
    %27 = vector.extract_strided_slice %1 {offsets = [0, 0], sizes = [16, 72], strides = [1, 1]} : vector<16x128xbf16> to vector<16x72xbf16>
    %c5 = arith.constant 5 : index
    %c0_17 = arith.constant 0 : index
    %c0_18 = arith.constant 0 : index
    %28 = vector.load %arg2[%c5, %c0_17, %c0_18] : memref<9x8x16xbf16, #tpu.memory_space<vmem>>, vector<1x8x16xbf16>
    %29 = vector.shape_cast %28 : vector<1x8x16xbf16> to vector<8x16xbf16>
    %cst_19 = arith.constant dense<0.000000e+00> : vector<8x72xf32>
    %30 = tpu.matmul %29, %27, %cst_19 {dimension_numbers = #tpu.dot_dimension_numbers<[1], [0], [0], [1], [0, 0, 1, 1], [], []>} : vector<8x16xbf16>, vector<16x72xbf16>, vector<8x72xf32> -> vector<8x72xf32>
    %31 = arith.addf %26, %30 : vector<8x72xf32>
    %cst_20 = arith.constant 0.000000e+00 : f32
    %32 = vector.broadcast %cst_20 : f32 to vector<8x72xf32>
    %33 = arith.cmpf ogt, %31, %32 : vector<8x72xf32>
    %cst_21 = arith.constant 2.000000e-01 : f32
    %34 = vector.broadcast %cst_21 : f32 to vector<8x72xf32>
    %35 = arith.mulf %34, %31 : vector<8x72xf32>
    %36 = arith.select %33, %31, %35 : vector<8x72xi1>, vector<8x72xf32>
    %37 = arith.truncf %36 : vector<8x72xf32> to vector<8x72xbf16>
    %c0_22 = arith.constant 0 : index
    %c1 = arith.constant 1 : index
    %c0_23 = arith.constant 0 : index
    %c0_24 = arith.constant 0 : index
    %38 = vector.load %arg4[%c0_22, %c1, %c0_23, %c0_24] : memref<1x4x8x72xbf16, #tpu.memory_space<vmem>>, vector<1x1x8x72xbf16>
    %39 = vector.shape_cast %38 : vector<1x1x8x72xbf16> to vector<8x72xbf16>
    %40 = vector.shape_cast %37 : vector<8x72xbf16> to vector<1x1x8x72xbf16>
    tpu.vector_store %arg4[%c0_22, %c1, %c0_23, %c0_24], %40 {strides = array<i32>} : memref<1x4x8x72xbf16, #tpu.memory_space<vmem>>, vector<1x1x8x72xbf16>,
    %c0_25 = arith.constant 0 : index
    %c0_26 = arith.constant 0 : index
    %41 = vector.load %arg3[%c0_25, %c0_26] : memref<8x1xf32, #tpu.memory_space<vmem>>, vector<8x1xf32>
    %42 = vector.shape_cast %41 : vector<8x1xf32> to vector<8x1xf32>
    %43 = vector.broadcast %42 : vector<8x1xf32> to vector<8x72xf32>
    %44 = vector.extract_strided_slice %1 {offsets = [0, 9], sizes = [16, 72], strides = [1, 1]} : vector<16x128xbf16> to vector<16x72xbf16>
    %c1_27 = arith.constant 1 : index
    %c0_28 = arith.constant 0 : index
    %c0_29 = arith.constant 0 : index
    %45 = vector.load %arg2[%c1_27, %c0_28, %c0_29] : memref<9x8x16xbf16, #tpu.memory_space<vmem>>, vector<1x8x16xbf16>
    %46 = vector.shape_cast %45 : vector<1x8x16xbf16> to vector<8x16xbf16>
    %cst_30 = arith.constant dense<0.000000e+00> : vector<8x72xf32>
    %47 = tpu.matmul %46, %44, %cst_30 {dimension_numbers = #tpu.dot_dimension_numbers<[1], [0], [0], [1], [0, 0, 1, 1], [], []>} : vector<8x16xbf16>, vector<16x72xbf16>, vector<8x72xf32> -> vector<8x72xf32>
    %48 = arith.addf %43, %47 : vector<8x72xf32>
    %49 = vector.extract_strided_slice %1 {offsets = [0, 0], sizes = [16, 72], strides = [1, 1]} : vector<16x128xbf16> to vector<16x72xbf16>
    %c7 = arith.constant 7 : index
    %c0_31 = arith.constant 0 : index
    %c0_32 = arith.constant 0 : index
    %50 = vector.load %arg2[%c7, %c0_31, %c0_32] : memref<9x8x16xbf16, #tpu.memory_space<vmem>>, vector<1x8x16xbf16>
    %51 = vector.shape_cast %50 : vector<1x8x16xbf16> to vector<8x16xbf16>
    %cst_33 = arith.constant dense<0.000000e+00> : vector<8x72xf32>
    %52 = tpu.matmul %51, %49, %cst_33 {dimension_numbers = #tpu.dot_dimension_numbers<[1], [0], [0], [1], [0, 0, 1, 1], [], []>} : vector<8x16xbf16>, vector<16x72xbf16>, vector<8x72xf32> -> vector<8x72xf32>
    %53 = arith.addf %48, %52 : vector<8x72xf32>
    %cst_34 = arith.constant 0.000000e+00 : f32
    %54 = vector.broadcast %cst_34 : f32 to vector<8x72xf32>
    %55 = arith.cmpf ogt, %53, %54 : vector<8x72xf32>
    %cst_35 = arith.constant 2.000000e-01 : f32
    %56 = vector.broadcast %cst_35 : f32 to vector<8x72xf32>
    %57 = arith.mulf %56, %53 : vector<8x72xf32>
    %58 = arith.select %55, %53, %57 : vector<8x72xi1>, vector<8x72xf32>
    %59 = arith.truncf %58 : vector<8x72xf32> to vector<8x72xbf16>
    %c0_36 = arith.constant 0 : index
    %c2 = arith.constant 2 : index
    %c0_37 = arith.constant 0 : index
    %c0_38 = arith.constant 0 : index
    %60 = vector.load %arg4[%c0_36, %c2, %c0_37, %c0_38] : memref<1x4x8x72xbf16, #tpu.memory_space<vmem>>, vector<1x1x8x72xbf16>
    %61 = vector.shape_cast %60 : vector<1x1x8x72xbf16> to vector<8x72xbf16>
    %62 = vector.shape_cast %59 : vector<8x72xbf16> to vector<1x1x8x72xbf16>
    tpu.vector_store %arg4[%c0_36, %c2, %c0_37, %c0_38], %62 {strides = array<i32>} : memref<1x4x8x72xbf16, #tpu.memory_space<vmem>>, vector<1x1x8x72xbf16>,
    %c0_39 = arith.constant 0 : index
    %c0_40 = arith.constant 0 : index
    %63 = vector.load %arg3[%c0_39, %c0_40] : memref<8x1xf32, #tpu.memory_space<vmem>>, vector<8x1xf32>
    %64 = vector.shape_cast %63 : vector<8x1xf32> to vector<8x1xf32>
    %65 = vector.broadcast %64 : vector<8x1xf32> to vector<8x72xf32>
    %66 = vector.extract_strided_slice %1 {offsets = [0, 10], sizes = [16, 72], strides = [1, 1]} : vector<16x128xbf16> to vector<16x72xbf16>
    %c0_41 = arith.constant 0 : index
    %c0_42 = arith.constant 0 : index
    %c0_43 = arith.constant 0 : index
    %67 = vector.load %arg2[%c0_41, %c0_42, %c0_43] : memref<9x8x16xbf16, #tpu.memory_space<vmem>>, vector<1x8x16xbf16>
    %68 = vector.shape_cast %67 : vector<1x8x16xbf16> to vector<8x16xbf16>
    %cst_44 = arith.constant dense<0.000000e+00> : vector<8x72xf32>
    %69 = tpu.matmul %68, %66, %cst_44 {dimension_numbers = #tpu.dot_dimension_numbers<[1], [0], [0], [1], [0, 0, 1, 1], [], []>} : vector<8x16xbf16>, vector<16x72xbf16>, vector<8x72xf32> -> vector<8x72xf32>
    %70 = arith.addf %65, %69 : vector<8x72xf32>
    %71 = vector.extract_strided_slice %1 {offsets = [0, 9], sizes = [16, 72], strides = [1, 1]} : vector<16x128xbf16> to vector<16x72xbf16>
    %c2_45 = arith.constant 2 : index
    %c0_46 = arith.constant 0 : index
    %c0_47 = arith.constant 0 : index
    %72 = vector.load %arg2[%c2_45, %c0_46, %c0_47] : memref<9x8x16xbf16, #tpu.memory_space<vmem>>, vector<1x8x16xbf16>
    %73 = vector.shape_cast %72 : vector<1x8x16xbf16> to vector<8x16xbf16>
    %cst_48 = arith.constant dense<0.000000e+00> : vector<8x72xf32>
    %74 = tpu.matmul %73, %71, %cst_48 {dimension_numbers = #tpu.dot_dimension_numbers<[1], [0], [0], [1], [0, 0, 1, 1], [], []>} : vector<8x16xbf16>, vector<16x72xbf16>, vector<8x72xf32> -> vector<8x72xf32>
    %75 = arith.addf %70, %74 : vector<8x72xf32>
    %76 = vector.extract_strided_slice %1 {offsets = [0, 1], sizes = [16, 72], strides = [1, 1]} : vector<16x128xbf16> to vector<16x72xbf16>
    %c6 = arith.constant 6 : index
    %c0_49 = arith.constant 0 : index
    %c0_50 = arith.constant 0 : index
    %77 = vector.load %arg2[%c6, %c0_49, %c0_50] : memref<9x8x16xbf16, #tpu.memory_space<vmem>>, vector<1x8x16xbf16>
    %78 = vector.shape_cast %77 : vector<1x8x16xbf16> to vector<8x16xbf16>
    %cst_51 = arith.constant dense<0.000000e+00> : vector<8x72xf32>
    %79 = tpu.matmul %78, %76, %cst_51 {dimension_numbers = #tpu.dot_dimension_numbers<[1], [0], [0], [1], [0, 0, 1, 1], [], []>} : vector<8x16xbf16>, vector<16x72xbf16>, vector<8x72xf32> -> vector<8x72xf32>
    %80 = arith.addf %75, %79 : vector<8x72xf32>
    %81 = vector.extract_strided_slice %1 {offsets = [0, 0], sizes = [16, 72], strides = [1, 1]} : vector<16x128xbf16> to vector<16x72xbf16>
    %c8 = arith.constant 8 : index
    %c0_52 = arith.constant 0 : index
    %c0_53 = arith.constant 0 : index
    %82 = vector.load %arg2[%c8, %c0_52, %c0_53] : memref<9x8x16xbf16, #tpu.memory_space<vmem>>, vector<1x8x16xbf16>
    %83 = vector.shape_cast %82 : vector<1x8x16xbf16> to vector<8x16xbf16>
    %cst_54 = arith.constant dense<0.000000e+00> : vector<8x72xf32>
    %84 = tpu.matmul %83, %81, %cst_54 {dimension_numbers = #tpu.dot_dimension_numbers<[1], [0], [0], [1], [0, 0, 1, 1], [], []>} : vector<8x16xbf16>, vector<16x72xbf16>, vector<8x72xf32> -> vector<8x72xf32>
    %85 = arith.addf %80, %84 : vector<8x72xf32>
    %cst_55 = arith.constant 0.000000e+00 : f32
    %86 = vector.broadcast %cst_55 : f32 to vector<8x72xf32>
    %87 = arith.cmpf ogt, %85, %86 : vector<8x72xf32>
    %cst_56 = arith.constant 2.000000e-01 : f32
    %88 = vector.broadcast %cst_56 : f32 to vector<8x72xf32>
    %89 = arith.mulf %88, %85 : vector<8x72xf32>
    %90 = arith.select %87, %85, %89 : vector<8x72xi1>, vector<8x72xf32>
    %91 = arith.truncf %90 : vector<8x72xf32> to vector<8x72xbf16>
    %c0_57 = arith.constant 0 : index
    %c3_58 = arith.constant 3 : index
    %c0_59 = arith.constant 0 : index
    %c0_60 = arith.constant 0 : index
    %92 = vector.load %arg4[%c0_57, %c3_58, %c0_59, %c0_60] : memref<1x4x8x72xbf16, #tpu.memory_space<vmem>>, vector<1x1x8x72xbf16>
    %93 = vector.shape_cast %92 : vector<1x1x8x72xbf16> to vector<8x72xbf16>
    %94 = vector.shape_cast %91 : vector<8x72xbf16> to vector<1x1x8x72xbf16>
    tpu.vector_store %arg4[%c0_57, %c3_58, %c0_59, %c0_60], %94 {strides = array<i32>} : memref<1x4x8x72xbf16, #tpu.memory_space<vmem>>, vector<1x1x8x72xbf16>,
    return
  }
  func.func @transform_0(%arg0: i32) -> (i32, i32, i32) {
    %c0_i32 = arith.constant 0 : i32
    %c0_i32_0 = arith.constant 0 : i32
    %c0_i32_1 = arith.constant 0 : i32
    return %arg0, %c0_i32, %c0_i32_0 : i32, i32, i32
  }
  func.func @transform_1(%arg0: i32) -> (i32, i32, i32) {
    %c0_i32 = arith.constant 0 : i32
    %c0_i32_0 = arith.constant 0 : i32
    %c0_i32_1 = arith.constant 0 : i32
    %c0_i32_2 = arith.constant 0 : i32
    return %c0_i32, %c0_i32_0, %c0_i32_1 : i32, i32, i32
  }
  func.func @transform_2(%arg0: i32) -> (i32, i32) {
    %c0_i32 = arith.constant 0 : i32
    %c0_i32_0 = arith.constant 0 : i32
    %c0_i32_1 = arith.constant 0 : i32
    return %c0_i32, %c0_i32_0 : i32, i32
  }
  func.func @transform_3(%arg0: i32) -> (i32, i32, i32, i32) {
    %c0_i32 = arith.constant 0 : i32
    %c0_i32_0 = arith.constant 0 : i32
    %c0_i32_1 = arith.constant 0 : i32
    %c0_i32_2 = arith.constant 0 : i32
    return %arg0, %c0_i32, %c0_i32_0, %c0_i32_1 : i32, i32, i32, i32
  }
}

module attributes {stable_mosaic.version = 11 : i64} {
  func.func @_tconv_s2_kernel(%arg0: i32, %arg1: memref<1x8x384xbf16, #tpu.memory_space<vmem>>, %arg2: memref<9x1x8xbf16, #tpu.memory_space<vmem>>, %arg3: memref<1x1xf32, #tpu.memory_space<vmem>>, %arg4: memref<1x4x1x272xf32, #tpu.memory_space<vmem>>) attributes {dimension_semantics = [#tpu.dimension_semantics<parallel>], iteration_bounds = array<i64: 2>, scalar_prefetch = 0 : i64, scratch_operands = 0 : i64, tpu.core_type = #tpu.core_type<tc>, window_params = [{transform_indices = @transform_0, window_bounds = array<i64: 1, 8, 384>}, {pipeline_mode = #tpu.pipeline_mode<synchronous>, transform_indices = @transform_1, window_bounds = array<i64: 9, 1, 8>}, {pipeline_mode = #tpu.pipeline_mode<synchronous>, transform_indices = @transform_2, window_bounds = array<i64: 1, 1>}, {transform_indices = @transform_3, window_bounds = array<i64: 1, 4, 1, 272>}]} {
    %c0 = arith.constant 0 : index
    %c0_0 = arith.constant 0 : index
    %c0_1 = arith.constant 0 : index
    %0 = vector.load %arg1[%c0, %c0_0, %c0_1] : memref<1x8x384xbf16, #tpu.memory_space<vmem>>, vector<1x8x384xbf16>
    %1 = vector.shape_cast %0 : vector<1x8x384xbf16> to vector<8x384xbf16>
    %c0_2 = arith.constant 0 : index
    %c0_3 = arith.constant 0 : index
    %2 = vector.load %arg3[%c0_2, %c0_3] : memref<1x1xf32, #tpu.memory_space<vmem>>, vector<1x1xf32>
    %3 = vector.shape_cast %2 : vector<1x1xf32> to vector<1x1xf32>
    %4 = vector.broadcast %3 : vector<1x1xf32> to vector<1x272xf32>
    %5 = vector.extract_strided_slice %1 {offsets = [0, 0], sizes = [8, 272], strides = [1, 1]} : vector<8x384xbf16> to vector<8x272xbf16>
    %c4 = arith.constant 4 : index
    %c0_4 = arith.constant 0 : index
    %c0_5 = arith.constant 0 : index
    %6 = vector.load %arg2[%c4, %c0_4, %c0_5] : memref<9x1x8xbf16, #tpu.memory_space<vmem>>, vector<1x1x8xbf16>
    %7 = vector.shape_cast %6 : vector<1x1x8xbf16> to vector<1x8xbf16>
    %cst = arith.constant dense<0.000000e+00> : vector<1x272xf32>
    %8 = tpu.matmul %7, %5, %cst {dimension_numbers = #tpu.dot_dimension_numbers<[1], [0], [0], [1], [0, 0, 1, 1], [], []>} : vector<1x8xbf16>, vector<8x272xbf16>, vector<1x272xf32> -> vector<1x272xf32>
    %9 = arith.addf %4, %8 : vector<1x272xf32>
    %10 = arith.negf %9 : vector<1x272xf32>
    %11 = math.exp %10 : vector<1x272xf32>
    %cst_6 = arith.constant 1.000000e+00 : f32
    %12 = vector.broadcast %cst_6 : f32 to vector<1x272xf32>
    %13 = arith.addf %12, %11 : vector<1x272xf32>
    %14 = arith.divf %12, %13 : vector<1x272xf32>
    %c0_7 = arith.constant 0 : index
    %c0_8 = arith.constant 0 : index
    %c0_9 = arith.constant 0 : index
    %c0_10 = arith.constant 0 : index
    %15 = vector.load %arg4[%c0_7, %c0_8, %c0_9, %c0_10] : memref<1x4x1x272xf32, #tpu.memory_space<vmem>>, vector<1x1x1x272xf32>
    %16 = vector.shape_cast %15 : vector<1x1x1x272xf32> to vector<1x272xf32>
    %17 = vector.shape_cast %14 : vector<1x272xf32> to vector<1x1x1x272xf32>
    tpu.vector_store %arg4[%c0_7, %c0_8, %c0_9, %c0_10], %17 {strides = array<i32>} : memref<1x4x1x272xf32, #tpu.memory_space<vmem>>, vector<1x1x1x272xf32>,
    %c0_11 = arith.constant 0 : index
    %c0_12 = arith.constant 0 : index
    %18 = vector.load %arg3[%c0_11, %c0_12] : memref<1x1xf32, #tpu.memory_space<vmem>>, vector<1x1xf32>
    %19 = vector.shape_cast %18 : vector<1x1xf32> to vector<1x1xf32>
    %20 = vector.broadcast %19 : vector<1x1xf32> to vector<1x272xf32>
    %21 = vector.extract_strided_slice %1 {offsets = [0, 1], sizes = [8, 272], strides = [1, 1]} : vector<8x384xbf16> to vector<8x272xbf16>
    %c3 = arith.constant 3 : index
    %c0_13 = arith.constant 0 : index
    %c0_14 = arith.constant 0 : index
    %22 = vector.load %arg2[%c3, %c0_13, %c0_14] : memref<9x1x8xbf16, #tpu.memory_space<vmem>>, vector<1x1x8xbf16>
    %23 = vector.shape_cast %22 : vector<1x1x8xbf16> to vector<1x8xbf16>
    %cst_15 = arith.constant dense<0.000000e+00> : vector<1x272xf32>
    %24 = tpu.matmul %23, %21, %cst_15 {dimension_numbers = #tpu.dot_dimension_numbers<[1], [0], [0], [1], [0, 0, 1, 1], [], []>} : vector<1x8xbf16>, vector<8x272xbf16>, vector<1x272xf32> -> vector<1x272xf32>
    %25 = arith.addf %20, %24 : vector<1x272xf32>
    %26 = vector.extract_strided_slice %1 {offsets = [0, 0], sizes = [8, 272], strides = [1, 1]} : vector<8x384xbf16> to vector<8x272xbf16>
    %c5 = arith.constant 5 : index
    %c0_16 = arith.constant 0 : index
    %c0_17 = arith.constant 0 : index
    %27 = vector.load %arg2[%c5, %c0_16, %c0_17] : memref<9x1x8xbf16, #tpu.memory_space<vmem>>, vector<1x1x8xbf16>
    %28 = vector.shape_cast %27 : vector<1x1x8xbf16> to vector<1x8xbf16>
    %cst_18 = arith.constant dense<0.000000e+00> : vector<1x272xf32>
    %29 = tpu.matmul %28, %26, %cst_18 {dimension_numbers = #tpu.dot_dimension_numbers<[1], [0], [0], [1], [0, 0, 1, 1], [], []>} : vector<1x8xbf16>, vector<8x272xbf16>, vector<1x272xf32> -> vector<1x272xf32>
    %30 = arith.addf %25, %29 : vector<1x272xf32>
    %31 = arith.negf %30 : vector<1x272xf32>
    %32 = math.exp %31 : vector<1x272xf32>
    %cst_19 = arith.constant 1.000000e+00 : f32
    %33 = vector.broadcast %cst_19 : f32 to vector<1x272xf32>
    %34 = arith.addf %33, %32 : vector<1x272xf32>
    %35 = arith.divf %33, %34 : vector<1x272xf32>
    %c0_20 = arith.constant 0 : index
    %c1 = arith.constant 1 : index
    %c0_21 = arith.constant 0 : index
    %c0_22 = arith.constant 0 : index
    %36 = vector.load %arg4[%c0_20, %c1, %c0_21, %c0_22] : memref<1x4x1x272xf32, #tpu.memory_space<vmem>>, vector<1x1x1x272xf32>
    %37 = vector.shape_cast %36 : vector<1x1x1x272xf32> to vector<1x272xf32>
    %38 = vector.shape_cast %35 : vector<1x272xf32> to vector<1x1x1x272xf32>
    tpu.vector_store %arg4[%c0_20, %c1, %c0_21, %c0_22], %38 {strides = array<i32>} : memref<1x4x1x272xf32, #tpu.memory_space<vmem>>, vector<1x1x1x272xf32>,
    %c0_23 = arith.constant 0 : index
    %c0_24 = arith.constant 0 : index
    %39 = vector.load %arg3[%c0_23, %c0_24] : memref<1x1xf32, #tpu.memory_space<vmem>>, vector<1x1xf32>
    %40 = vector.shape_cast %39 : vector<1x1xf32> to vector<1x1xf32>
    %41 = vector.broadcast %40 : vector<1x1xf32> to vector<1x272xf32>
    %42 = vector.extract_strided_slice %1 {offsets = [0, 17], sizes = [8, 272], strides = [1, 1]} : vector<8x384xbf16> to vector<8x272xbf16>
    %c1_25 = arith.constant 1 : index
    %c0_26 = arith.constant 0 : index
    %c0_27 = arith.constant 0 : index
    %43 = vector.load %arg2[%c1_25, %c0_26, %c0_27] : memref<9x1x8xbf16, #tpu.memory_space<vmem>>, vector<1x1x8xbf16>
    %44 = vector.shape_cast %43 : vector<1x1x8xbf16> to vector<1x8xbf16>
    %cst_28 = arith.constant dense<0.000000e+00> : vector<1x272xf32>
    %45 = tpu.matmul %44, %42, %cst_28 {dimension_numbers = #tpu.dot_dimension_numbers<[1], [0], [0], [1], [0, 0, 1, 1], [], []>} : vector<1x8xbf16>, vector<8x272xbf16>, vector<1x272xf32> -> vector<1x272xf32>
    %46 = arith.addf %41, %45 : vector<1x272xf32>
    %47 = vector.extract_strided_slice %1 {offsets = [0, 0], sizes = [8, 272], strides = [1, 1]} : vector<8x384xbf16> to vector<8x272xbf16>
    %c7 = arith.constant 7 : index
    %c0_29 = arith.constant 0 : index
    %c0_30 = arith.constant 0 : index
    %48 = vector.load %arg2[%c7, %c0_29, %c0_30] : memref<9x1x8xbf16, #tpu.memory_space<vmem>>, vector<1x1x8xbf16>
    %49 = vector.shape_cast %48 : vector<1x1x8xbf16> to vector<1x8xbf16>
    %cst_31 = arith.constant dense<0.000000e+00> : vector<1x272xf32>
    %50 = tpu.matmul %49, %47, %cst_31 {dimension_numbers = #tpu.dot_dimension_numbers<[1], [0], [0], [1], [0, 0, 1, 1], [], []>} : vector<1x8xbf16>, vector<8x272xbf16>, vector<1x272xf32> -> vector<1x272xf32>
    %51 = arith.addf %46, %50 : vector<1x272xf32>
    %52 = arith.negf %51 : vector<1x272xf32>
    %53 = math.exp %52 : vector<1x272xf32>
    %cst_32 = arith.constant 1.000000e+00 : f32
    %54 = vector.broadcast %cst_32 : f32 to vector<1x272xf32>
    %55 = arith.addf %54, %53 : vector<1x272xf32>
    %56 = arith.divf %54, %55 : vector<1x272xf32>
    %c0_33 = arith.constant 0 : index
    %c2 = arith.constant 2 : index
    %c0_34 = arith.constant 0 : index
    %c0_35 = arith.constant 0 : index
    %57 = vector.load %arg4[%c0_33, %c2, %c0_34, %c0_35] : memref<1x4x1x272xf32, #tpu.memory_space<vmem>>, vector<1x1x1x272xf32>
    %58 = vector.shape_cast %57 : vector<1x1x1x272xf32> to vector<1x272xf32>
    %59 = vector.shape_cast %56 : vector<1x272xf32> to vector<1x1x1x272xf32>
    tpu.vector_store %arg4[%c0_33, %c2, %c0_34, %c0_35], %59 {strides = array<i32>} : memref<1x4x1x272xf32, #tpu.memory_space<vmem>>, vector<1x1x1x272xf32>,
    %c0_36 = arith.constant 0 : index
    %c0_37 = arith.constant 0 : index
    %60 = vector.load %arg3[%c0_36, %c0_37] : memref<1x1xf32, #tpu.memory_space<vmem>>, vector<1x1xf32>
    %61 = vector.shape_cast %60 : vector<1x1xf32> to vector<1x1xf32>
    %62 = vector.broadcast %61 : vector<1x1xf32> to vector<1x272xf32>
    %63 = vector.extract_strided_slice %1 {offsets = [0, 18], sizes = [8, 272], strides = [1, 1]} : vector<8x384xbf16> to vector<8x272xbf16>
    %c0_38 = arith.constant 0 : index
    %c0_39 = arith.constant 0 : index
    %c0_40 = arith.constant 0 : index
    %64 = vector.load %arg2[%c0_38, %c0_39, %c0_40] : memref<9x1x8xbf16, #tpu.memory_space<vmem>>, vector<1x1x8xbf16>
    %65 = vector.shape_cast %64 : vector<1x1x8xbf16> to vector<1x8xbf16>
    %cst_41 = arith.constant dense<0.000000e+00> : vector<1x272xf32>
    %66 = tpu.matmul %65, %63, %cst_41 {dimension_numbers = #tpu.dot_dimension_numbers<[1], [0], [0], [1], [0, 0, 1, 1], [], []>} : vector<1x8xbf16>, vector<8x272xbf16>, vector<1x272xf32> -> vector<1x272xf32>
    %67 = arith.addf %62, %66 : vector<1x272xf32>
    %68 = vector.extract_strided_slice %1 {offsets = [0, 17], sizes = [8, 272], strides = [1, 1]} : vector<8x384xbf16> to vector<8x272xbf16>
    %c2_42 = arith.constant 2 : index
    %c0_43 = arith.constant 0 : index
    %c0_44 = arith.constant 0 : index
    %69 = vector.load %arg2[%c2_42, %c0_43, %c0_44] : memref<9x1x8xbf16, #tpu.memory_space<vmem>>, vector<1x1x8xbf16>
    %70 = vector.shape_cast %69 : vector<1x1x8xbf16> to vector<1x8xbf16>
    %cst_45 = arith.constant dense<0.000000e+00> : vector<1x272xf32>
    %71 = tpu.matmul %70, %68, %cst_45 {dimension_numbers = #tpu.dot_dimension_numbers<[1], [0], [0], [1], [0, 0, 1, 1], [], []>} : vector<1x8xbf16>, vector<8x272xbf16>, vector<1x272xf32> -> vector<1x272xf32>
    %72 = arith.addf %67, %71 : vector<1x272xf32>
    %73 = vector.extract_strided_slice %1 {offsets = [0, 1], sizes = [8, 272], strides = [1, 1]} : vector<8x384xbf16> to vector<8x272xbf16>
    %c6 = arith.constant 6 : index
    %c0_46 = arith.constant 0 : index
    %c0_47 = arith.constant 0 : index
    %74 = vector.load %arg2[%c6, %c0_46, %c0_47] : memref<9x1x8xbf16, #tpu.memory_space<vmem>>, vector<1x1x8xbf16>
    %75 = vector.shape_cast %74 : vector<1x1x8xbf16> to vector<1x8xbf16>
    %cst_48 = arith.constant dense<0.000000e+00> : vector<1x272xf32>
    %76 = tpu.matmul %75, %73, %cst_48 {dimension_numbers = #tpu.dot_dimension_numbers<[1], [0], [0], [1], [0, 0, 1, 1], [], []>} : vector<1x8xbf16>, vector<8x272xbf16>, vector<1x272xf32> -> vector<1x272xf32>
    %77 = arith.addf %72, %76 : vector<1x272xf32>
    %78 = vector.extract_strided_slice %1 {offsets = [0, 0], sizes = [8, 272], strides = [1, 1]} : vector<8x384xbf16> to vector<8x272xbf16>
    %c8 = arith.constant 8 : index
    %c0_49 = arith.constant 0 : index
    %c0_50 = arith.constant 0 : index
    %79 = vector.load %arg2[%c8, %c0_49, %c0_50] : memref<9x1x8xbf16, #tpu.memory_space<vmem>>, vector<1x1x8xbf16>
    %80 = vector.shape_cast %79 : vector<1x1x8xbf16> to vector<1x8xbf16>
    %cst_51 = arith.constant dense<0.000000e+00> : vector<1x272xf32>
    %81 = tpu.matmul %80, %78, %cst_51 {dimension_numbers = #tpu.dot_dimension_numbers<[1], [0], [0], [1], [0, 0, 1, 1], [], []>} : vector<1x8xbf16>, vector<8x272xbf16>, vector<1x272xf32> -> vector<1x272xf32>
    %82 = arith.addf %77, %81 : vector<1x272xf32>
    %83 = arith.negf %82 : vector<1x272xf32>
    %84 = math.exp %83 : vector<1x272xf32>
    %cst_52 = arith.constant 1.000000e+00 : f32
    %85 = vector.broadcast %cst_52 : f32 to vector<1x272xf32>
    %86 = arith.addf %85, %84 : vector<1x272xf32>
    %87 = arith.divf %85, %86 : vector<1x272xf32>
    %c0_53 = arith.constant 0 : index
    %c3_54 = arith.constant 3 : index
    %c0_55 = arith.constant 0 : index
    %c0_56 = arith.constant 0 : index
    %88 = vector.load %arg4[%c0_53, %c3_54, %c0_55, %c0_56] : memref<1x4x1x272xf32, #tpu.memory_space<vmem>>, vector<1x1x1x272xf32>
    %89 = vector.shape_cast %88 : vector<1x1x1x272xf32> to vector<1x272xf32>
    %90 = vector.shape_cast %87 : vector<1x272xf32> to vector<1x1x1x272xf32>
    tpu.vector_store %arg4[%c0_53, %c3_54, %c0_55, %c0_56], %90 {strides = array<i32>} : memref<1x4x1x272xf32, #tpu.memory_space<vmem>>, vector<1x1x1x272xf32>,
    return
  }
  func.func @transform_0(%arg0: i32) -> (i32, i32, i32) {
    %c0_i32 = arith.constant 0 : i32
    %c0_i32_0 = arith.constant 0 : i32
    %c0_i32_1 = arith.constant 0 : i32
    return %arg0, %c0_i32, %c0_i32_0 : i32, i32, i32
  }
  func.func @transform_1(%arg0: i32) -> (i32, i32, i32) {
    %c0_i32 = arith.constant 0 : i32
    %c0_i32_0 = arith.constant 0 : i32
    %c0_i32_1 = arith.constant 0 : i32
    %c0_i32_2 = arith.constant 0 : i32
    return %c0_i32, %c0_i32_0, %c0_i32_1 : i32, i32, i32
  }
  func.func @transform_2(%arg0: i32) -> (i32, i32) {
    %c0_i32 = arith.constant 0 : i32
    %c0_i32_0 = arith.constant 0 : i32
    %c0_i32_1 = arith.constant 0 : i32
    return %c0_i32, %c0_i32_0 : i32, i32
  }
  func.func @transform_3(%arg0: i32) -> (i32, i32, i32, i32) {
    %c0_i32 = arith.constant 0 : i32
    %c0_i32_0 = arith.constant 0 : i32
    %c0_i32_1 = arith.constant 0 : i32
    %c0_i32_2 = arith.constant 0 : i32
    return %arg0, %c0_i32, %c0_i32_0, %c0_i32_1 : i32, i32, i32, i32
  }
}

</mosaic_0001>

<bundles_post_ra>
// kernel: vae_fconnected_forward.7
= control target key start
LH: loop header
LB: loop body
LE: loop exit
PB: predicated region body
PF: predicated region fallthrough
CT: control target
= control target key end

     0   :  { %s579_s12 = smov 0   ;;  %s669_s0 = inlined_call_operand.vmem [shape: bf16[2,4,1,384], index: 0, kind: input, shape index: {}]   ;;  %s670_s1 = inlined_call_operand.vmem [shape: bf16[9,8,1], index: 1, kind: input, shape index: {}]   ;;  %s671_s2 = inlined_call_operand.vmem [shape: f32[8,1], index: 2, kind: input, shape index: {}]   ;;  %s672_s3 = inlined_call_operand.vmem [shape: bf16[2,8,272], index: 3, kind: output, shape index: {}]  }
   0x1 LB: > { %s492_s13 = sadd.s32 4294967295, %s553_s12   ;;  %p496_p0 = scmp.ge.s32.totalorder %s553_s12, 1  ;;  %s553_s12 = sphi %s579_s12, %s13_s12  }
   0x2   : > { %p136_p1 = scmp.lt.s32.totalorder %s553_s12, 3 }
   0x4   : > { %p137_p2 = pnand %p496_p0, %p136_p1 }
   0x5   : > { %p159_p3 = scmp.lt.s32.totalorder (!%p137_p2), %s492_s13, 1  ;;  %s556_s30 = smov (!%p137_p2), 127  }
   0x6   : > { %140 = sbr.rel (%p137_p2) target bundleno = 291 (0x123), region = 32  ;;  %s557_s4 = smov (!%p137_p2), 111  }
   0x7   : > { %s558_s5 = smov (!%p137_p2), 110  }
   0xb   : > { %v506_v0 = vld [vmem:[%s670_s1 + $0x18] sm:$0xff]   ;;  %v502_v1 = vld [vmem:[%s670_s1 + $0x8] sm:$0xff]   ;;  %v505_v2 = vld [vmem:[%s670_s1 + $0x10] sm:$0xff]   ;;  %v555_v3 = vmov 0   ;;  %s674_s13 = smov (!%p159_p3, %s492_s13), 1  ;;  %vm250_vm0 = vcmask 1039360  }
   0xc   : > { %530 = vset.pattern.permute.xlu1 %v555_v3  ;;  %524 = vset.pattern.permute.xlu0 %v555_v3  ;;  %v339_v4 = vunpack.c.l.bf16 %v506_v0  ;;  %v368_v5 = vunpack.c.h.bf16 %v506_v0  ;;  %v232_v6 = vunpack.c.l.bf16 %v502_v1  ;;  %v311_v7 = vunpack.c.h.bf16 %v505_v2  ;;  %v181_v8 = vld [vmem:[%s670_s1] sm:$0xff]   ;;  %s511_s26 = smul.u32 12, %s674_s13 }
   0xd   : > { %v508_v9 = vld [vmem:[%s670_s1 + $0x20] sm:$0xf]  ;;  %541 = vset.pattern.permute.xlu2 %v555_v3  ;;  %v207_v10 = vunpack.c.h.bf16 %v181_v8  ;;  %v261_v11 = vunpack.c.h.bf16 %v502_v1  ;;  %v182_v15 = vunpack.c.l.bf16 %v181_v8  ;;  %v286_v19 = vunpack.c.l.bf16 %v505_v2 }
   0xe   : > { %v531_v12 = vpack.i.bf16 %v368_v5, %v339_v4  ;;  %v525_v13 = vpack.i.bf16 %v311_v7, %v232_v6  ;;  %v396_v16 = vunpack.c.l.bf16 %v508_v9  ;;  %v175_v18 = vld [vmem:[%s671_s2] sm:$0xff]  ;;  %s617_s29 = scalar_lea.vmem %s669_s0, %s511_s26  ;;  %s660_s8 = scalar_lea.vmem %s672_s3, %s511_s26  ;;  %vm435_vm2 = vcmask 125952  }
   0xf   : > { %v542_v14 = vpack.i.bf16 %v261_v11, %v207_v10  ;;  %v168_v20 = vld [vmem:[%s617_s29] sm:$0x7]  ;;  %v499_v22 = vld [vmem:[%s617_s29 + $0x6] sm:$0x7]  ;;  %v498_v26 = vld [vmem:[%s617_s29 + $0x3] sm:$0x7] }
  0x10   : > { %532 = vperm.xlu1 %530, %v531_v12   ;;  %526 = vperm.xlu0 %524, %v525_v13   ;;  %v536_v17 = vpack.i.bf16 %v182_v15, %v396_v16  ;;  %v183_v21 = vunpack.c.l.bf16 %v168_v20  ;;  %v262_v27 = vunpack.c.l.bf16 %v499_v22  ;;  %v208_v28 = vunpack.c.l.bf16 %v498_v26  ;;  %v500_v22 = vld [vmem:[%s617_s29 + $0x9] sm:$0x7] }
  0x11   : > { %543 = vperm.xlu2 %541, %v542_v14   ;;  %vm357_vm3 = vcmask 908288   ;;  %vm414_vm4 = vcmask 900096  }
  0x12   : > { %v192_v23 = vperm.slane %v183_v21, 4  ;;  %v191_v24 = vperm.slane %v183_v21, 2  ;;  %v190_v25 = vperm.slane %v183_v21, 0  ;;  %v270_v35 = vperm.slane %v262_v27, 2 }
  0x13   : > { %v216_v37 = vperm.slane %v208_v28, 2  ;;  %v215_v38 = vperm.slane %v208_v28, 0  ;;  %v217_v39 = vperm.slane %v208_v28, 4  ;;  %v269_v43 = vperm.slane %v262_v27, 0 }
  0x14   : > { %v622_v29 = vperm.slane %v192_v23, 0  ;;  %v624_v30 = vperm.slane %v191_v24, 0  ;;  %v626_v31 = vperm.slane %v190_v25, 0  ;;  %v271_v44 = vperm.slane %v262_v27, 4 }
  0x15   : > { %v634_v46 = vperm.slane %v270_v35, 0  ;;  %v222_v48 = vperm.slane %v216_v37, 0  ;;  %v221_v49 = vperm.slane %v215_v38, 0  ;;  %v223_v50 = vperm.slane %v217_v39, 0 }
  0x16   : > { %v636_v51 = vperm.slane %v269_v43, 0  ;;  %v277_v53 = vperm.slane %v271_v44, 0  ;;  %v287_v23 = vunpack.c.l.bf16 %v500_v22 }
  0x18   : > { %537 = vperm.xlu1 %530, %v536_v17   ;;  %178 = vperm.xlu0 %524, %v175_v18   ;;  %v296_v25 = vperm.slane %v287_v23, 4  ;;  %v294_v26 = vperm.slane %v287_v23, 0  ;;  %v295_v27 = vperm.slane %v287_v23, 2 }
  0x19   : > { %290 = vperm.xlu2 %541, %v286_v19  }
  0x6b   : > { %v628_v36 = vpop.permute.xlu2 %543 }
  0x6c   : > { %v545_v45 = vunpack.i.l.bf16 %v628_v36  ;;  %v546_v28 = vunpack.i.h.bf16 %v628_v36 }
  0x6e   : > { %v226_v56 = vmul.f32 %v545_v45, %v223_v50  ;;  %v224_v57 = vmul.f32 %v545_v45, %v221_v49  ;;  %v225_v58 = vmul.f32 %v545_v45, %v222_v48  ;;  %v278_v39 = vmul.f32 %v546_v28, %v636_v51 }
  0x73   : > { %v291_v19 = vpop.permute.xlu2 %290 }
  0x82   : > { %v533_v32 = vpop.permute.xlu1 %532  ;;  %v527_v33 = vpop.permute.xlu0 %526 }
  0x83   : > { %v528_v34 = vunpack.i.l.bf16 %v527_v33  ;;  %v529_v47 = vunpack.i.h.bf16 %v527_v33  ;;  %v534_v1 = vunpack.i.l.bf16 %v533_v32  ;;  %v535_v11 = vunpack.i.h.bf16 %v533_v32 }
  0x84   : > { %v301_v32 = vperm.slane %v295_v27, 0 }
  0x85   : > { %v240_v40 = vmul.f32 %v528_v34, %v622_v29  ;;  %v239_v41 = vmul.f32 %v528_v34, %v624_v30  ;;  %v238_v42 = vmul.f32 %v528_v34, %v626_v31  ;;  %v318_v55 = vmul.f32 %v529_v47, %v634_v46 }
  0x86   : > { %v317_v62 = vmul.f32 %v529_v47, %v636_v51  ;;  %v319_v0 = vmul.f32 %v529_v47, %v277_v53  ;;  %v346_v8 = vmul.f32 %v534_v1, %v624_v30  ;;  %v345_v9 = vmul.f32 %v534_v1, %v626_v31 }
  0x87   : > { %248 = vrot.lane.b32.xlu1 %v240_v40, %s556_s30  ;;  %246 = vrot.lane.b32.xlu0 %v239_v41, %s556_s30  ;;  %v347_v10 = vmul.f32 %v534_v1, %v622_v29  ;;  %v375_v12 = vmul.f32 %v535_v11, %v222_v48  ;;  %v374_v13 = vmul.f32 %v535_v11, %v221_v49 }
  0x88   : > { %244 = vrot.lane.b32.xlu2 %v238_v42, %s556_s30  ;;  %v376_v14 = vmul.f32 %v535_v11, %v223_v50  ;;  %v280_v34 = vmul.f32 %v546_v28, %v277_v53  ;;  %v279_v40 = vmul.f32 %v546_v28, %v634_v46  ;;  %v304_v47 = vmul.f32 %v301_v32, %v291_v19 }
  0x8a   : > { %v538_v52 = vpop.permute.xlu1 %537  ;;  %v179_v63 = vpop.permute.xlu0 %178 }
  0x8b   : > { %v540_v54 = vunpack.i.h.bf16 %v538_v52  ;;  %v539_v15 = vunpack.i.l.bf16 %v538_v52 }
  0x8d   : > { %v199_v59 = vmul.f32 %v540_v54, %v626_v31  ;;  %v200_v60 = vmul.f32 %v540_v54, %v624_v30  ;;  %v201_v61 = vmul.f32 %v540_v54, %v622_v29  ;;  %v403_v16 = vmul.f32 %v539_v15, %v624_v30 }
  0x8e   : > { %v402_v17 = vmul.f32 %v539_v15, %v626_v31  ;;  %v404_v18 = vmul.f32 %v539_v15, %v622_v29  ;;  %v302_v30 = vperm.slane %v296_v25, 0  ;;  %v300_v31 = vperm.slane %v294_v26, 0 }
  0x8f   : > { %v202_v2 = vadd.f32 %v199_v59, %v179_v63  ;;  %v203_v3 = vadd.f32 %v200_v60, %v179_v63  ;;  %v204_v4 = vadd.f32 %v201_v61, %v179_v63  ;;  %325 = vrot.lane.b32.xlu1 %v318_v55, %s556_s30  ;;  %323 = vrot.lane.b32.xlu0 %v317_v62, %s556_s30 }
  0x90   : > { %327 = vrot.lane.b32.xlu2 %v319_v0, %s556_s30  ;;  %v305_v36 = vmul.f32 %v302_v30, %v291_v19  ;;  %v303_v45 = vmul.f32 %v300_v31, %v291_v19 }
  0x91   : > { %v229_v5 = vadd.f32 %v226_v56, %v204_v4  ;;  %v227_v6 = vadd.f32 %v224_v57, %v202_v2  ;;  %v228_v7 = vadd.f32 %v225_v58, %v203_v3 }
  0x97   : > { %353 = vrot.lane.b32.xlu1 %v346_v8, %s557_s4  ;;  %351 = vrot.lane.b32.xlu0 %v345_v9, %s557_s4 }
  0x98   : > { %355 = vrot.lane.b32.xlu2 %v347_v10, %s557_s4 }
  0x9f   : > { %382 = vrot.lane.b32.xlu1 %v375_v12, %s557_s4  ;;  %380 = vrot.lane.b32.xlu0 %v374_v13, %s557_s4 }
  0xa0   : > { %384 = vrot.lane.b32.xlu2 %v376_v14, %s557_s4 }
  0xa7   : > { %410 = vrot.lane.b32.xlu1 %v403_v16, %s558_s5  ;;  %408 = vrot.lane.b32.xlu0 %v402_v17, %s558_s5 }
  0xa8   : > { %412 = vrot.lane.b32.xlu2 %v404_v18, %s558_s5 }
  0xe2   : > { %v245_v20 = vpop.permute.xlu2 %244 }
  0xea   : > { %v328_v21 = vpop.permute.xlu2 %327 }
  0xf2   : > { %v356_v24 = vpop.permute.xlu2 %355 }
  0xf9   : > { %v249_v29 = vpop.permute.xlu1 %248  ;;  %v247_v33 = vpop.permute.xlu0 %246 }
  0xfa   : > { %v258_v35 = vadd.f32 %v249_v29, %v229_v5  ;;  %v251_v37 = vsel %vm250_vm0, %v245_v20, %v247_v33  ;;  %v252_v38 = vsel %vm250_vm0, %v247_v33, %v249_v29  ;;  %v385_v43 = vpop.permute.xlu2 %384 }
  0xfb   : > { %v256_v41 = vadd.f32 %v251_v37, %v227_v6  ;;  %v257_v42 = vadd.f32 %v252_v38, %v228_v7 }
  0xfc   : > { %v283_v44 = vadd.f32 %v280_v34, %v258_v35 }
  0xfd   : > { %v281_v48 = vadd.f32 %v278_v39, %v256_v41  ;;  %v282_v49 = vadd.f32 %v279_v40, %v257_v42 }
  0xfe   : > { %v308_v50 = vadd.f32 %v305_v36, %v283_v44 }
  0xff   : > { %v307_v52 = vadd.f32 %v304_v47, %v282_v49  ;;  %v306_v53 = vadd.f32 %v303_v45, %v281_v48 }
 0x100   : > { %v336_v54 = vadd.f32 %v328_v21, %v308_v50 }
 0x101   : > { %v326_v55 = vpop.permute.xlu1 %325  ;;  %v324_v56 = vpop.permute.xlu0 %323 }
 0x102   : > { %v365_v57 = vadd.f32 %v356_v24, %v336_v54  ;;  %v413_v58 = vpop.permute.xlu2 %412  ;;  %v330_v2 = vsel %vm250_vm0, %v326_v55, %v328_v21  ;;  %v329_v3 = vsel %vm250_vm0, %v324_v56, %v326_v55 }
 0x103   : > { %v335_v6 = vadd.f32 %v330_v2, %v307_v52  ;;  %v334_v7 = vadd.f32 %v329_v3, %v306_v53 }
 0x104   : > { %v393_v51 = vadd.f32 %v385_v43, %v365_v57 }
 0x106   : > { %v422_v46 = vadd.f32 %v413_v58, %v393_v51 }
 0x108   : > { %vm425_vm1 = vcmp.gt.f32.partialorder %v422_v46, 0.0  ;;  %v428_v59 = vmul.f32 0.2, %v422_v46 }
 0x109   : > { %v354_v60 = vpop.permute.xlu1 %353  ;;  %v352_v61 = vpop.permute.xlu0 %351 }
 0x10a   : > { %v431_v62 = vsel %vm425_vm1, %v422_v46, %v428_v59  ;;  %v359_v4 = vsel %vm357_vm3, %v354_v60, %v356_v24  ;;  %v358_v5 = vsel %vm357_vm3, %v352_v61, %v354_v60 }
 0x10b   : > { %v433_v63 = vpack.c.bf16 %v431_v62, %v431_v62  ;;  %v364_v10 = vadd.f32 %v359_v4, %v335_v6  ;;  %v363_v11 = vadd.f32 %v358_v5, %v334_v7 }
 0x10d   : > { %436 = vst.msk [vmem:[%s660_s8 + $0x8] sm:$0xf] %vm435_vm2, %v433_v63 }
 0x111   : > { %v383_v0 = vpop.permute.xlu1 %382  ;;  %v381_v1 = vpop.permute.xlu0 %380 }
 0x112   : > { %v387_v8 = vsel %vm357_vm3, %v383_v0, %v385_v43  ;;  %v386_v9 = vsel %vm357_vm3, %v381_v1, %v383_v0 }
 0x113   : > { %v392_v12 = vadd.f32 %v387_v8, %v364_v10  ;;  %v391_v13 = vadd.f32 %v386_v9, %v363_v11 }
 0x119   : > { %v411_v14 = vpop.permute.xlu1 %410  ;;  %v409_v15 = vpop.permute.xlu0 %408 }
 0x11a   : > { %v416_v16 = vsel %vm414_vm4, %v411_v14, %v413_v58  ;;  %v415_v17 = vsel %vm414_vm4, %v409_v15, %v411_v14 }
 0x11b   : > { %v421_v18 = vadd.f32 %v416_v16, %v392_v12  ;;  %v420_v19 = vadd.f32 %v415_v17, %v391_v13 }
 0x11d   : > { %vm424_vm5 = vcmp.gt.f32.partialorder %v421_v18, 0.0  ;;  %v427_v20 = vmul.f32 0.2, %v421_v18  ;;  %vm423_vm6 = vcmp.gt.f32.partialorder %v420_v19, 0.0  ;;  %v426_v21 = vmul.f32 0.2, %v420_v19 }
 0x11f   : > { %v430_v22 = vsel %vm424_vm5, %v421_v18, %v427_v20  ;;  %v429_v23 = vsel %vm423_vm6, %v420_v19, %v426_v21 }
 0x120   : > { %v432_v24 = vpack.c.bf16 %v430_v22, %v429_v23 }
 0x122   : > { %434 = vst [vmem:[%s660_s8] sm:$0xff] %v432_v24 }
 0x123 PF: > { %s13_s12 = sadd.s32 1, %s553_s12  }
 0x124   : > { %p10_p4 = scmp.ge.s32.totalorder %s13_s12, 4  }
 0x126   :  { %12 = sbr.rel (!%p10_p4) target bundleno = 1 (0x1), region = 73 }

// kernel: vae_fconnected_forward.8
= control target key start
LH: loop header
LB: loop body
LE: loop exit
PB: predicated region body
PF: predicated region fallthrough
CT: control target
= control target key end

     0   :  { %s679_s12 = smov 0   ;;  %s757_s0 = inlined_call_operand.vmem [shape: bf16[2,4,8,128], index: 0, kind: input, shape index: {}]   ;;  %s758_s1 = inlined_call_operand.vmem [shape: bf16[9,16,8], index: 1, kind: input, shape index: {}]   ;;  %s759_s2 = inlined_call_operand.vmem [shape: f32[16,1], index: 2, kind: input, shape index: {}]   ;;  %s760_s3 = inlined_call_operand.vmem [shape: bf16[2,16,72], index: 3, kind: output, shape index: {}]  }
   0x1 LB: > { %s547_s13 = sadd.s32 4294967295, %s653_s12   ;;  %p551_p0 = scmp.ge.s32.totalorder %s653_s12, 1  ;;  %s653_s12 = sphi %s679_s12, %s13_s12  }
   0x2   : > { %p137_p1 = scmp.lt.s32.totalorder %s653_s12, 3 }
   0x4   : > { %p138_p2 = pnand %p551_p0, %p137_p1 }
   0x5   : > { %p161_p3 = scmp.lt.s32.totalorder (!%p138_p2), %s547_s13, 1  ;;  %s655_s22 = smov (!%p138_p2), 127  }
   0x6   : > { %141 = sbr.rel (%p138_p2) target bundleno = 306 (0x132), region = 32  ;;  %s656_s23 = smov (!%p138_p2), 119  }
   0x7   : > { %s657_s24 = smov (!%p138_p2), 118  }
   0xb   : > { %s762_s13 = smov (!%p161_p3, %s547_s13), 1  ;;  %vm202_vm0 = vcmask 1043456   ;;  %v624_v7 = vld [vmem:[%s758_s1] sm:$0xff]  ;;  %vm198_vm1 = vcmask 64512   ;;  %v625_v10 = vld [vmem:[%s758_s1 + $0x8] sm:$0xff]  ;;  %v627_v14 = vld [vmem:[%s758_s1 + $0x18] sm:$0xff] }
   0xc   : > { %s622_s14 = sshll.u32 %s762_s13, 4  ;;  %v628_v17 = vld [vmem:[%s758_s1 + $0x20] sm:$0xff]  ;;  %v658_v18 = vmov 0   ;;  %v180_v19 = vld [vmem:[%s759_s2 + $0x8] sm:$0xff]  ;;  %v626_v27 = vld [vmem:[%s758_s1 + $0x10] sm:$0xff]  ;;  %s623_s18 = sshll.u32 %s762_s13, 3 }
   0xd   : > { %s693_s17 = scalar_lea.vmem %s757_s0, %s622_s14  ;;  %646 = vset.pattern.permute.xlu0 %v658_v18  ;;  %645 = vset.pattern.permute.xlu2 %v658_v18  ;;  %v632_v22 = vld [vmem:[%s758_s1 + $0x40] sm:$0xff]  ;;  %v631_v29 = vld [vmem:[%s758_s1 + $0x38] sm:$0xff]  ;;  %v629_v34 = vld [vmem:[%s758_s1 + $0x28] sm:$0xff]  ;;  %s170_s21 = scalar_lea.vmem %s760_s3, %s623_s18  ;;  %vm489_vm3 = vcmask 584704  }
   0xe   : > { %v172_v0 = vld [vmem:[%s693_s17] sm:$0xf]  ;;  %v556_v1 = vld [vmem:[%s693_s17 + $0x4] sm:$0xf]  ;;  %v557_v5 = vld [vmem:[%s693_s17 + $0x8] sm:$0xf] }
   0xf   : > { %v261_v2 = vunpack.c.l.b16 %v172_v0  ;;  %v423_v3 = vunpack.c.l.b16 %v556_v1  ;;  %v204_v4 = vsel %vm202_vm0, %v172_v0, 0  ;;  %v234_v6 = vsel %vm202_vm0, %v556_v1, 0  ;;  %v558_v15 = vld [vmem:[%s693_s17 + $0xc] sm:$0xf]  ;;  %v179_v23 = vld [vmem:[%s759_s2] sm:$0xff]  ;;  %v630_v35 = vld [vmem:[%s758_s1 + $0x30] sm:$0xff] }
  0x10   : > { %213 = vmatpush.bf16.msra.mxu0 %v204_v4  ;;  %243 = vmatpush.bf16.msra.mxu1 %v234_v6  ;;  %v356_v11 = vunpack.c.l.b16 %v557_v5  ;;  %v299_v13 = vsel %vm202_vm0, %v557_v5, 0  ;;  %v329_v16 = vsel %vm202_vm0, %v558_v15, 0 }
  0x11   : > { %v262_v8 = vpack.c.b16 %v261_v2, %v261_v2  ;;  %v424_v9 = vpack.c.b16 %v423_v3, %v423_v3  ;;  %308 = vmatpush.bf16.msra.mxu3 %v299_v13 }
  0x12   : > { %v357_v12 = vpack.c.b16 %v356_v11, %v356_v11 }
  0x13   : > { %263 = vrot.lane.b32.xlu0 %v262_v8, %s655_s22  ;;  %425 = vrot.lane.b32.xlu1 %v424_v9, %s656_s23 }
  0x14   : > { %457 = vrot.lane.b32.xlu2 %v262_v8, %s657_s24  ;;  %563 = vmatmul.msk.bf16.vlgmr.msra.gmra.mxu0 %vm198_vm1, %v624_v7 }
  0x15   : > { %570 = vmatmul.msk.bf16.vlgmr.msra.gmra.mxu1 %vm198_vm1, %v625_v10  ;;  %584 = vmatmul.msk.bf16.vlgmr.msra.gmra.mxu3 %vm198_vm1, %v627_v14 }
  0x16   : > { %338 = vmatpush.bf16.msrb.mxu0 %v329_v16 }
  0x1b   : > { %390 = vrot.lane.b32.xlu0 %v262_v8, %s656_s23  ;;  %358 = vrot.lane.b32.xlu1 %v357_v12, %s655_s22 }
  0x1c   : > { %183 = vperm.xlu2 %645, %v179_v23  }
  0x23   : > { %188 = vperm.xlu0 %646, %v180_v19  }
  0x24   : > { %591 = vmatmul.msk.bf16.vlgmr.msrb.gmra.mxu0 %vm198_vm1, %v628_v17 }
  0x6e   : > { %v458_v20 = vpop.permute.xlu2 %457 }
  0x6f   : > { %v463_v21 = vsel %vm202_vm0, %v458_v20, 0 }
  0x70   : > { %472 = vmatpush.bf16.msra.mxu0 %v463_v21 }
  0x73   : > { %619 = vmatmul.msk.bf16.vlgmr.msra.gmra.mxu0 %vm198_vm1, %v632_v22 }
  0x76   : > { %v184_v39 = vpop.permute.xlu2 %183 }
  0x85   : > { %v264_v24 = vpop.permute.xlu0 %263  ;;  %v426_v25 = vpop.permute.xlu1 %425 }
  0x86   : > { %v269_v26 = vsel %vm202_vm0, %v264_v24, 0  ;;  %v431_v28 = vsel %vm202_vm0, %v426_v25, 0 }
  0x87   : > { %278 = vmatpush.bf16.msra.mxu2 %v269_v26  ;;  %440 = vmatpush.bf16.msrb.mxu3 %v431_v28 }
  0x8a   : > { %577 = vmatmul.msk.bf16.vlgmr.msra.gmra.mxu2 %vm198_vm1, %v626_v27  ;;  %612 = vmatmul.msk.bf16.vlgmr.msrb.gmra.mxu3 %vm198_vm1, %v631_v29 }
  0x8d   : > { %v391_v30 = vpop.permute.xlu0 %390  ;;  %v359_v31 = vpop.permute.xlu1 %358 }
  0x8e   : > { %v396_v32 = vsel %vm202_vm0, %v391_v30, 0  ;;  %v364_v33 = vsel %vm202_vm0, %v359_v31, 0 }
  0x8f   : > { %405 = vmatpush.bf16.msrb.mxu2 %v396_v32  ;;  %373 = vmatpush.bf16.msrb.mxu1 %v364_v33 }
  0x91   : > { %v215_v36 = vpop.f32.mrf.mxu0 }
  0x92   : > { %598 = vmatmul.msk.bf16.vlgmr.msrb.gmra.mxu1 %vm198_vm1, %v629_v34  ;;  %v245_v38 = vpop.f32.mrf.mxu1  ;;  %v220_v41 = vadd.f32 %v215_v36, %v184_v39 }
  0x94   : > { %v250_v44 = vadd.f32 %v245_v38, %v220_v41 }
  0x95   : > { %v189_v45 = vpop.permute.xlu0 %188 }
  0x98   : > { %v310_v40 = vpop.f32.mrf.mxu3 }
  0x99   : > { %v217_v37 = vpop.f32.mrf.mxu0 }
  0x9a   : > { %605 = vmatmul.msk.bf16.vlgmr.msrb.gmra.mxu2 %vm198_vm1, %v630_v35  ;;  %v247_v46 = vpop.f32.mrf.mxu1  ;;  %v221_v48 = vadd.f32 %v217_v37, %v189_v45 }
  0x9c   : > { %v251_v53 = vadd.f32 %v247_v46, %v221_v48 }
  0xa0   : > { %v312_v49 = vpop.f32.mrf.mxu3 }
  0xa1   : > { %v340_v42 = vpop.f32.mrf.mxu0 }
  0xa9   : > { %v342_v52 = vpop.f32.mrf.mxu0 }
  0xf0   : > { %v474_v62 = vpop.f32.mrf.mxu0 }
  0xf8   : > { %v476_v11 = vpop.f32.mrf.mxu0 }
 0x10d   : > { %v280_v43 = vpop.f32.mrf.mxu2  ;;  %v442_v59 = vpop.f32.mrf.mxu3 }
 0x10e   : > { %v285_v47 = vadd.f32 %v280_v43, %v250_v44 }
 0x10f   : > { %v375_v54 = vpop.f32.mrf.mxu1 }
 0x110   : > { %v315_v50 = vadd.f32 %v310_v40, %v285_v47 }
 0x112   : > { %v345_v55 = vadd.f32 %v340_v42, %v315_v50 }
 0x114   : > { %v380_v57 = vadd.f32 %v375_v54, %v345_v55 }
 0x115   : > { %v282_v51 = vpop.f32.mrf.mxu2  ;;  %v444_v9 = vpop.f32.mrf.mxu3 }
 0x116   : > { %v286_v56 = vadd.f32 %v282_v51, %v251_v53 }
 0x117   : > { %v377_v1 = vpop.f32.mrf.mxu1 }
 0x118   : > { %v316_v58 = vadd.f32 %v312_v49, %v286_v56 }
 0x11a   : > { %v346_v63 = vadd.f32 %v342_v52, %v316_v58 }
 0x11c   : > { %v381_v3 = vadd.f32 %v377_v1, %v346_v63 }
 0x11d   : > { %v407_v60 = vpop.f32.mrf.mxu2 }
 0x11e   : > { %v412_v61 = vadd.f32 %v407_v60, %v380_v57 }
 0x120   : > { %v447_v0 = vadd.f32 %v442_v59, %v412_v61 }
 0x122   : > { %v479_v2 = vadd.f32 %v474_v62, %v447_v0 }
 0x124   : > { %vm481_vm2 = vcmp.gt.f32.partialorder %v479_v2, 0.0  ;;  %v483_v4 = vmul.f32 0.2, %v479_v2 }
 0x125   : > { %v409_v5 = vpop.f32.mrf.mxu2 }
 0x126   : > { %v485_v6 = vsel %vm481_vm2, %v479_v2, %v483_v4  ;;  %v413_v7 = vadd.f32 %v409_v5, %v381_v3 }
 0x127   : > { %v487_v8 = vpack.c.bf16 %v485_v6, %v485_v6 }
 0x128   : > { %v448_v10 = vadd.f32 %v444_v9, %v413_v7 }
 0x129   : > { %490 = vst.msk [vmem:[%s170_s21] sm:$0xf] %vm489_vm3, %v487_v8 }
 0x12a   : > { %v480_v12 = vadd.f32 %v476_v11, %v448_v10 }
 0x12c   : > { %vm482_vm4 = vcmp.gt.f32.partialorder %v480_v12, 0.0  ;;  %v484_v13 = vmul.f32 0.2, %v480_v12 }
 0x12e   : > { %v486_v14 = vsel %vm482_vm4, %v480_v12, %v484_v13 }
 0x12f   : > { %v488_v15 = vpack.c.bf16 %v486_v14, %v486_v14 }
 0x131   : > { %491 = vst.msk [vmem:[%s170_s21 + $0x4] sm:$0xf] %vm489_vm3, %v488_v15 }
 0x132 PF: > { %s13_s12 = sadd.s32 1, %s653_s12  }
 0x133   : > { %p10_p4 = scmp.ge.s32.totalorder %s13_s12, 4  }
 0x135   :  { %12 = sbr.rel (!%p10_p4) target bundleno = 1 (0x1), region = 73 }

// kernel: vae_fconnected_forward.9
= control target key start
LH: loop header
LB: loop body
LE: loop exit
PB: predicated region body
PF: predicated region fallthrough
CT: control target
= control target key end

     0   :  { %s945_s12 = smov 0   ;;  %s1060_s0 = inlined_call_operand.vmem [shape: bf16[2,4,16,128], index: 0, kind: input, shape index: {}]   ;;  %s1061_s1 = inlined_call_operand.vmem [shape: bf16[9,32,16], index: 1, kind: input, shape index: {}]   ;;  %s1062_s2 = inlined_call_operand.vmem [shape: f32[32,1], index: 2, kind: input, shape index: {}]   ;;  %s1063_s3 = inlined_call_operand.vmem [shape: bf16[2,32,20], index: 3, kind: output, shape index: {}]  }
   0x1 LB: > { %s718_s13 = sadd.s32 4294967295, %s919_s12   ;;  %p722_p0 = scmp.ge.s32.totalorder %s919_s12, 1  ;;  %s919_s12 = sphi %s945_s12, %s13_s12  }
   0x2   : > { %p137_p1 = scmp.lt.s32.totalorder %s919_s12, 3 }
   0x4   : > { %p138_p2 = pnand %p722_p0, %p137_p1 }
   0x5   : > { %p161_p3 = scmp.lt.s32.totalorder (!%p138_p2), %s718_s13, 1  ;;  %s921_s18 = smov (!%p138_p2), 127  }
   0x6   : > { %141 = sbr.rel (%p138_p2) target bundleno = 333 (0x14d), region = 32  ;;  %s922_s19 = smov (!%p138_p2), 123  }
   0x7   : > { %s923_s22 = smov (!%p138_p2), 122  }
   0xb   : > { %s1065_s13 = smov (!%p161_p3, %s718_s13), 1  ;;  %v880_v2 = vld [vmem:[%s1061_s1 + $0x8] sm:$0xff]  ;;  %vm227_vm0 = vcmask 130048   ;;  %v879_v4 = vld [vmem:[%s1061_s1] sm:$0xff]  ;;  %v881_v5 = vld [vmem:[%s1061_s1 + $0x10] sm:$0xff]  ;;  %v924_v9 = vmov 0  }
   0xc   : > { %s873_s14 = sshll.u32 %s1065_s13, 5  ;;  %v882_v6 = vld [vmem:[%s1061_s1 + $0x18] sm:$0xff]  ;;  %v885_v7 = vld [vmem:[%s1061_s1 + $0x30] sm:$0xff]  ;;  %912 = vset.pattern.permute.xlu1 %v924_v9  ;;  %911 = vset.pattern.permute.xlu0 %v924_v9  ;;  %v887_v11 = vld [vmem:[%s1061_s1 + $0x40] sm:$0xff]  ;;  %s874_s15 = sshll.u32 %s1065_s13, 4  ;;  %vm658_vm2 = vcmask 158720  }
   0xd   : > { %s165_s17 = scalar_lea.vmem %s1060_s0, %s873_s14  ;;  %v185_v10 = vld [vmem:[%s1062_s2 + $0x10] sm:$0xff]  ;;  %910 = vset.pattern.permute.xlu2 %v924_v9  ;;  %v184_v12 = vld [vmem:[%s1062_s2 + $0x8] sm:$0xff]  ;;  %v886_v14 = vld [vmem:[%s1061_s1 + $0x38] sm:$0xff] }
   0xe   : > { %v875_v0 = vld [vmem:[%s165_s17] sm:$0xff]  ;;  %v876_v1 = vld [vmem:[%s165_s17 + $0x8] sm:$0xff]  ;;  %v877_v3 = vld [vmem:[%s165_s17 + $0x10] sm:$0xff] }
   0xf   : > { %322 = vrot.lane.b32.xlu0 %v875_v0, %s921_s18  ;;  %563 = vrot.lane.b32.xlu1 %v876_v1, %s922_s19  ;;  %v878_v8 = vld [vmem:[%s165_s17 + $0x18] sm:$0xff]  ;;  %v183_v15 = vld [vmem:[%s1062_s2] sm:$0xff] }
  0x10   : > { %610 = vrot.lane.b32.xlu2 %v875_v0, %s923_s22  ;;  %897 = vmatpush.bf16.msra.mxu1 %v875_v0  ;;  %v888_v16 = vld [vmem:[%s1061_s1 + $0x48] sm:$0xff]  ;;  %v186_v17 = vld [vmem:[%s1062_s2 + $0x18] sm:$0xff]  ;;  %v883_v20 = vld [vmem:[%s1061_s1 + $0x20] sm:$0xff] }
  0x11   : > { %241 = vmatpush.bf16.msra.mxu0 %v875_v0  ;;  %388 = vmatpush.bf16.msra.mxu3 %v877_v3  ;;  %v893_v21 = vld [vmem:[%s1061_s1 + $0x70] sm:$0xff]  ;;  %v895_v22 = vld [vmem:[%s1061_s1 + $0x80] sm:$0xff]  ;;  %v884_v26 = vld [vmem:[%s1061_s1 + $0x28] sm:$0xff] }
  0x12   : > { %v889_v25 = vld [vmem:[%s1061_s1 + $0x50] sm:$0xff]  ;;  %v894_v27 = vld [vmem:[%s1061_s1 + $0x78] sm:$0xff]  ;;  %v896_v28 = vld [vmem:[%s1061_s1 + $0x88] sm:$0xff] }
  0x13   : > { %746 = vmatmul.msk.bf16.vlgmr.msra.gmra.mxu1 %vm227_vm0, %v880_v2  ;;  %v890_v29 = vld [vmem:[%s1061_s1 + $0x58] sm:$0xff]  ;;  %v891_v30 = vld [vmem:[%s1061_s1 + $0x60] sm:$0xff]  ;;  %v892_v31 = vld [vmem:[%s1061_s1 + $0x68] sm:$0xff] }
  0x14   : > { %291 = vmatpush.bf16.msrb.mxu1 %v876_v1  ;;  %745 = vmatmul.msk.bf16.vlgmr.msra.gmra.mxu0 %vm227_vm0, %v879_v4 }
  0x15   : > { %795 = vmatmul.msk.bf16.vlgmr.msra.gmra.mxu3 %vm227_vm0, %v885_v7  ;;  %438 = vmatpush.bf16.msrb.mxu0 %v878_v8 }
  0x17   : > { %516 = vrot.lane.b32.xlu0 %v875_v0, %s922_s19  ;;  %469 = vrot.lane.b32.xlu1 %v877_v3, %s921_s18  ;;  %s1047_s18 = scalar_lea.vmem %s1063_s3, %s874_s15 }
  0x18   : > { %189 = vperm.xlu2 %910, %v183_v15  }
  0x1f   : > { %199 = vperm.xlu1 %912, %v185_v10   ;;  %194 = vperm.xlu0 %911, %v184_v12  }
  0x20   : > { %204 = vperm.xlu2 %910, %v186_v17  }
  0x23   : > { %763 = vmatmul.msk.bf16.vlgmr.msrb.gmra.mxu1 %vm227_vm0, %v881_v5 }
  0x24   : > { %813 = vmatmul.msk.bf16.vlgmr.msrb.gmra.mxu0 %vm227_vm0, %v887_v11 }
  0x25   : > { %796 = vmatmul.msk.bf16.gmra.mxu3 %vm227_vm0, %v886_v14 }
  0x33   : > { %764 = vmatmul.msk.bf16.gmra.mxu1 %vm227_vm0, %v882_v6 }
  0x34   : > { %814 = vmatmul.msk.bf16.gmra.mxu0 %vm227_vm0, %v888_v16 }
  0x6a   : > { %v611_v13 = vpop.permute.xlu2 %610 }
  0x6b   : > { %626 = vmatpush.bf16.msra.mxu0 %v611_v13 }
  0x6e   : > { %869 = vmatmul.msk.bf16.vlgmr.msra.gmra.mxu0 %vm227_vm0, %v895_v22 }
  0x72   : > { %v190_v47 = vpop.permute.xlu2 %189 }
  0x7a   : > { %v205_v9 = vpop.permute.xlu2 %204 }
  0x7e   : > { %870 = vmatmul.msk.bf16.gmra.mxu0 %vm227_vm0, %v896_v28 }
  0x81   : > { %v323_v18 = vpop.permute.xlu0 %322  ;;  %v564_v19 = vpop.permute.xlu1 %563 }
  0x82   : > { %338 = vmatpush.bf16.msra.mxu2 %v323_v18  ;;  %579 = vmatpush.bf16.msrb.mxu3 %v564_v19 }
  0x85   : > { %777 = vmatmul.msk.bf16.vlgmr.msra.gmra.mxu2 %vm227_vm0, %v883_v20  ;;  %855 = vmatmul.msk.bf16.vlgmr.msrb.gmra.mxu3 %vm227_vm0, %v893_v21 }
  0x89   : > { %v517_v23 = vpop.permute.xlu0 %516  ;;  %v470_v24 = vpop.permute.xlu1 %469 }
  0x8a   : > { %532 = vmatpush.bf16.msrb.mxu2 %v517_v23  ;;  %485 = vmatpush.bf16.msra.mxu1 %v470_v24 }
  0x8d   : > { %827 = vmatmul.msk.bf16.vlgmr.msra.gmra.mxu1 %vm227_vm0, %v889_v25 }
  0x90   : > { %v248_v32 = vpop.f32.mrf.mxu1 }
  0x91   : > { %v243_v33 = vpop.f32.mrf.mxu0  ;;  %v195_v52 = vpop.permute.xlu0 %194 }
  0x92   : > { %v253_v48 = vadd.f32 %v243_v33, %v190_v47  ;;  %v200_v61 = vpop.permute.xlu1 %199 }
  0x93   : > { %v255_v1 = vadd.f32 %v248_v32, %v200_v61 }
  0x95   : > { %778 = vmatmul.msk.bf16.gmra.mxu2 %vm227_vm0, %v884_v26  ;;  %856 = vmatmul.msk.bf16.gmra.mxu3 %vm227_vm0, %v894_v27 }
  0x98   : > { %v250_v34 = vpop.f32.mrf.mxu1  ;;  %v390_v37 = vpop.f32.mrf.mxu3 }
  0x99   : > { %v245_v35 = vpop.f32.mrf.mxu0  ;;  %v256_v13 = vadd.f32 %v250_v34, %v205_v9 }
  0x9a   : > { %v254_v56 = vadd.f32 %v245_v35, %v195_v52 }
  0x9d   : > { %828 = vmatmul.msk.bf16.gmra.mxu1 %vm227_vm0, %v890_v29 }
  0xa0   : > { %v293_v36 = vpop.f32.mrf.mxu1  ;;  %v392_v40 = vpop.f32.mrf.mxu3 }
  0xa1   : > { %v440_v38 = vpop.f32.mrf.mxu0  ;;  %v303_v51 = vadd.f32 %v293_v36, %v253_v48 }
  0xa5   : > { %841 = vmatmul.msk.bf16.vlgmr.msrb.gmra.mxu2 %vm227_vm0, %v891_v30 }
  0xa8   : > { %v295_v39 = vpop.f32.mrf.mxu1  ;;  %v395_v45 = vpop.f32.mrf.mxu3 }
  0xa9   : > { %v442_v42 = vpop.f32.mrf.mxu0  ;;  %v304_v60 = vadd.f32 %v295_v39, %v254_v56 }
  0xb0   : > { %v298_v43 = vpop.f32.mrf.mxu1  ;;  %v397_v53 = vpop.f32.mrf.mxu3 }
  0xb1   : > { %v445_v46 = vpop.f32.mrf.mxu0  ;;  %v305_v7 = vadd.f32 %v298_v43, %v255_v1 }
  0xb5   : > { %842 = vmatmul.msk.bf16.gmra.mxu2 %vm227_vm0, %v892_v31 }
  0xb8   : > { %v300_v49 = vpop.f32.mrf.mxu1 }
  0xb9   : > { %v447_v55 = vpop.f32.mrf.mxu0  ;;  %v306_v21 = vadd.f32 %v300_v49, %v256_v13 }
  0xeb   : > { %v628_v2 = vpop.f32.mrf.mxu0 }
  0xf3   : > { %v630_v20 = vpop.f32.mrf.mxu0 }
 0x108   : > { %v340_v41 = vpop.f32.mrf.mxu2  ;;  %v581_v0 = vpop.f32.mrf.mxu3 }
 0x109   : > { %v350_v54 = vadd.f32 %v340_v41, %v303_v51 }
 0x10a   : > { %v487_v57 = vpop.f32.mrf.mxu1 }
 0x10b   : > { %v400_v58 = vadd.f32 %v390_v37, %v350_v54 }
 0x10d   : > { %v450_v62 = vadd.f32 %v440_v38, %v400_v58  ;;  %v633_v38 = vpop.f32.mrf.mxu0 }
 0x10f   : > { %v497_v3 = vadd.f32 %v487_v57, %v450_v62 }
 0x110   : > { %v342_v44 = vpop.f32.mrf.mxu2  ;;  %v583_v15 = vpop.f32.mrf.mxu3 }
 0x111   : > { %v351_v63 = vadd.f32 %v342_v44, %v304_v60 }
 0x112   : > { %v489_v5 = vpop.f32.mrf.mxu1 }
 0x113   : > { %v401_v4 = vadd.f32 %v392_v40, %v351_v63 }
 0x115   : > { %v451_v10 = vadd.f32 %v442_v42, %v401_v4  ;;  %v635_v51 = vpop.f32.mrf.mxu0 }
 0x117   : > { %v498_v16 = vadd.f32 %v489_v5, %v451_v10 }
 0x118   : > { %v345_v50 = vpop.f32.mrf.mxu2  ;;  %v586_v33 = vpop.f32.mrf.mxu3 }
 0x119   : > { %v352_v11 = vadd.f32 %v345_v50, %v305_v7 }
 0x11a   : > { %v492_v24 = vpop.f32.mrf.mxu1 }
 0x11b   : > { %v402_v17 = vadd.f32 %v395_v45, %v352_v11 }
 0x11d   : > { %v452_v26 = vadd.f32 %v445_v46, %v402_v17 }
 0x11f   : > { %v499_v30 = vadd.f32 %v492_v24, %v452_v26 }
 0x120   : > { %v347_v59 = vpop.f32.mrf.mxu2  ;;  %v588_v49 = vpop.f32.mrf.mxu3 }
 0x121   : > { %v353_v27 = vadd.f32 %v347_v59, %v306_v21 }
 0x122   : > { %v494_v41 = vpop.f32.mrf.mxu1 }
 0x123   : > { %v403_v31 = vadd.f32 %v397_v53, %v353_v27 }
 0x125   : > { %v453_v39 = vadd.f32 %v447_v55, %v403_v31 }
 0x127   : > { %v500_v43 = vadd.f32 %v494_v41, %v453_v39 }
 0x128   : > { %v534_v6 = vpop.f32.mrf.mxu2 }
 0x129   : > { %v544_v8 = vadd.f32 %v534_v6, %v497_v3 }
 0x12b   : > { %v591_v12 = vadd.f32 %v581_v0, %v544_v8 }
 0x12d   : > { %v638_v14 = vadd.f32 %v628_v2, %v591_v12 }
 0x12f   : > { %vm642_vm1 = vcmp.gt.f32.partialorder %v638_v14, 0.0  ;;  %v646_v18 = vmul.f32 0.2, %v638_v14 }
 0x130   : > { %v536_v19 = vpop.f32.mrf.mxu2 }
 0x131   : > { %v650_v22 = vsel %vm642_vm1, %v638_v14, %v646_v18  ;;  %v545_v23 = vadd.f32 %v536_v19, %v498_v16 }
 0x132   : > { %v654_v25 = vpack.c.bf16 %v650_v22, %v650_v22 }
 0x133   : > { %v592_v28 = vadd.f32 %v583_v15, %v545_v23 }
 0x134   : > { %659 = vst.msk [vmem:[%s1047_s18] sm:$0xf] %vm658_vm2, %v654_v25 }
 0x135   : > { %v639_v29 = vadd.f32 %v630_v20, %v592_v28 }
 0x137   : > { %vm643_vm3 = vcmp.gt.f32.partialorder %v639_v29, 0.0  ;;  %v647_v32 = vmul.f32 0.2, %v639_v29 }
 0x138   : > { %v539_v34 = vpop.f32.mrf.mxu2 }
 0x139   : > { %v651_v35 = vsel %vm643_vm3, %v639_v29, %v647_v32  ;;  %v546_v36 = vadd.f32 %v539_v34, %v499_v30 }
 0x13a   : > { %v655_v37 = vpack.c.bf16 %v651_v35, %v651_v35 }
 0x13b   : > { %v593_v40 = vadd.f32 %v586_v33, %v546_v36 }
 0x13c   : > { %660 = vst.msk [vmem:[%s1047_s18 + $0x4] sm:$0xf] %vm658_vm2, %v655_v37 }
 0x13d   : > { %v640_v42 = vadd.f32 %v633_v38, %v593_v40 }
 0x13f   : > { %vm644_vm4 = vcmp.gt.f32.partialorder %v640_v42, 0.0  ;;  %v648_v44 = vmul.f32 0.2, %v640_v42 }
 0x140   : > { %v541_v45 = vpop.f32.mrf.mxu2 }
 0x141   : > { %v652_v46 = vsel %vm644_vm4, %v640_v42, %v648_v44  ;;  %v547_v47 = vadd.f32 %v541_v45, %v500_v43 }
 0x142   : > { %v656_v48 = vpack.c.bf16 %v652_v46, %v652_v46 }
 0x143   : > { %v594_v50 = vadd.f32 %v588_v49, %v547_v47 }
 0x144   : > { %661 = vst.msk [vmem:[%s1047_s18 + $0x8] sm:$0xf] %vm658_vm2, %v656_v48 }
 0x145   : > { %v641_v52 = vadd.f32 %v635_v51, %v594_v50 }
 0x147   : > { %vm645_vm5 = vcmp.gt.f32.partialorder %v641_v52, 0.0  ;;  %v649_v53 = vmul.f32 0.2, %v641_v52 }
 0x149   : > { %v653_v54 = vsel %vm645_vm5, %v641_v52, %v649_v53 }
 0x14a   : > { %v657_v55 = vpack.c.bf16 %v653_v54, %v653_v54 }
 0x14c   : > { %662 = vst.msk [vmem:[%s1047_s18 + $0xc] sm:$0xf] %vm658_vm2, %v657_v55 }
 0x14d PF: > { %s13_s12 = sadd.s32 1, %s919_s12  }
 0x14e   : > { %p10_p4 = scmp.ge.s32.totalorder %s13_s12, 4  }
 0x150   :  { %12 = sbr.rel (!%p10_p4) target bundleno = 1 (0x1), region = 73 }

// kernel: vae_fconnected_forward.10
= control target key start
LH: loop header
LB: loop body
LE: loop exit
PB: predicated region body
PF: predicated region fallthrough
CT: control target
= control target key end

     0   :  { %18 = vsyncpa [#allocation3], 0  ;;  %s1054_s0 = inlined_call_operand.vmem [shape: bf16[2,512], index: 0, kind: input, shape index: {}]   ;;  %s1055_s1 = inlined_call_operand.vmem [shape: bf16[512,16], index: 1, kind: input, shape index: {}]   ;;  %s1056_s2 = inlined_call_operand.vmem [shape: f32[1,16], index: 2, kind: input, shape index: {}]   ;;  %s1057_s3 = inlined_call_operand.vmem [shape: bf16[16,16], index: 3, kind: input, shape index: {}]   ;;  %s1058_s4 = inlined_call_operand.vmem [shape: f32[1,16], index: 4, kind: input, shape index: {}]   ;;  %s1059_s5 = inlined_call_operand.vmem [shape: bf16[16,16], index: 5, kind: input, shape index: {}]   ;;  %s1060_s6 = inlined_call_operand.vmem [shape: f32[1,16], index: 6, kind: input, shape index: {}]   ;;  %s1061_s7 = inlined_call_operand.vmem [shape: f32[2,16], index: 7, kind: input, shape index: {}]   ;;  %s1062_s8 = inlined_call_operand.vmem [shape: bf16[16,512], index: 8, kind: input, shape index: {}]   ;;  %s1063_s9 = inlined_call_operand.vmem [shape: f32[1,512], index: 9, kind: input, shape index: {}]   ;;  %s1064_s10 = inlined_call_operand.vmem [shape: bf16[2,512], index: 10, kind: output, shape index: {0}]   ;;  %s1065_s11 = inlined_call_operand.hbm [shape: f32[2,16], index: 11, kind: output, shape index: {1}]   ;;  %s1066_s12 = inlined_call_operand.hbm [shape: f32[2,16], index: 12, kind: output, shape index: {2}]  }
   0x1   :  { %v738_v0 = vld [vmem:[%s1055_s1 + $0x38] sm:$0xff]  ;;  %v737_v4 = vld [vmem:[%s1055_s1 + $0x30] sm:$0xff]  ;;  %v736_v8 = vld [vmem:[%s1055_s1 + $0x28] sm:$0xff] }
   0x2   :  { %v746_v1 = vld [vmem:[%s1055_s1 + $0x78] sm:$0xff]  ;;  %312 = vmatpush.bf16.msra.mxu0 %v738_v0  ;;  %v745_v5 = vld [vmem:[%s1055_s1 + $0x70] sm:$0xff]  ;;  %v744_v9 = vld [vmem:[%s1055_s1 + $0x68] sm:$0xff] }
   0x3   :  { %v754_v2 = vld [vmem:[%s1055_s1 + $0xb8] sm:$0xff]  ;;  %325 = vmatpush.bf16.msra.mxu1 %v746_v1  ;;  %v753_v6 = vld [vmem:[%s1055_s1 + $0xb0] sm:$0xff]  ;;  %v752_v10 = vld [vmem:[%s1055_s1 + $0xa8] sm:$0xff] }
   0x4   :  { %v762_v3 = vld [vmem:[%s1055_s1 + $0xf8] sm:$0xff]  ;;  %338 = vmatpush.bf16.msra.mxu2 %v754_v2  ;;  %v761_v7 = vld [vmem:[%s1055_s1 + $0xf0] sm:$0xff]  ;;  %v760_v11 = vld [vmem:[%s1055_s1 + $0xe8] sm:$0xff] }
   0x5   :  { %351 = vmatpush.bf16.msra.mxu3 %v762_v3  ;;  %v735_v12 = vld [vmem:[%s1055_s1 + $0x20] sm:$0xff] }
   0x6   :  { %313 = vmatpush.bf16.msra.mxu0 %v737_v4  ;;  %v743_v13 = vld [vmem:[%s1055_s1 + $0x60] sm:$0xff] }
   0x7   :  { %326 = vmatpush.bf16.msra.mxu1 %v745_v5  ;;  %v41_v14 = vld [vmem:[%s1054_s0] sm:$0xf] }
   0x8   :  { %339 = vmatpush.bf16.msra.mxu2 %v753_v6  ;;  %v751_v15 = vld [vmem:[%s1055_s1 + $0xa0] sm:$0xff]  ;;  %111 = vst [vmem:[#allocation1] ss:$9 sm:$0xff] %v41_v14 }
   0x9   :  { %352 = vmatpush.bf16.msra.mxu3 %v761_v7  ;;  %v759_v16 = vld [vmem:[%s1055_s1 + $0xe0] sm:$0xff] }
   0xa   :  { %314 = vmatpush.bf16.msra.mxu0 %v736_v8 }
   0xb   :  { %327 = vmatpush.bf16.msra.mxu1 %v744_v9 }
   0xc   :  { %340 = vmatpush.bf16.msra.mxu2 %v752_v10 }
   0xd   :  { %353 = vmatpush.bf16.msra.mxu3 %v760_v11 }
   0xe   :  { %19 = vsyncpa [#allocation5], 0  ;;  %315 = vmatpush.bf16.msra.mxu0 %v735_v12  ;;  %v734_v17 = vld [vmem:[%s1055_s1 + $0x18] sm:$0xff]  ;;  %v733_v21 = vld [vmem:[%s1055_s1 + $0x10] sm:$0xff]  ;;  %vm377_vm0 = vcmask 130048   ;;  %vm534_vm1 = vcmask 123904  }
   0xf   :  { %328 = vmatpush.bf16.msra.mxu1 %v743_v13  ;;  %v742_v18 = vld [vmem:[%s1055_s1 + $0x58] sm:$0xff]  ;;  %v741_v22 = vld [vmem:[%s1055_s1 + $0x50] sm:$0xff]  ;;  %v732_v25 = vld [vmem:[%s1055_s1 + $0x8] sm:$0xff]  ;;  %s557_s19 = sshll.u32 %s1066_s12, 4  ;;  %vm526_vm2 = vcmask 1042434   ;;  %vm522_vm3 = vcmask 1040384   ;;  %s558_s19 = int_to_ptr.hbm [resolvable:$true] %s557_s19 }
  0x10   :  { %341 = vmatpush.bf16.msra.mxu2 %v751_v15  ;;  %v750_v19 = vld [vmem:[%s1055_s1 + $0x98] sm:$0xff]  ;;  %v749_v23 = vld [vmem:[%s1055_s1 + $0x90] sm:$0xff]  ;;  %v740_v26 = vld [vmem:[%s1055_s1 + $0x48] sm:$0xff]  ;;  %vm530_vm4 = vcmask 1041408  }
  0x11   :  { %354 = vmatpush.bf16.msra.mxu3 %v759_v16  ;;  %v758_v20 = vld [vmem:[%s1055_s1 + $0xd8] sm:$0xff]  ;;  %v757_v24 = vld [vmem:[%s1055_s1 + $0xd0] sm:$0xff]  ;;  %v748_v27 = vld [vmem:[%s1055_s1 + $0x88] sm:$0xff] }
  0x12   :  { %316 = vmatpush.bf16.msra.mxu0 %v734_v17  ;;  %v756_v28 = vld [vmem:[%s1055_s1 + $0xc8] sm:$0xff]  ;;  %v731_v29 = vld [vmem:[%s1055_s1] sm:$0xff]  ;;  %v114_v36 = vld [vmem:[#allocation1 + $0x12] sm:$0xff] }
  0x13   :  { %329 = vmatpush.bf16.msra.mxu1 %v742_v18  ;;  %v739_v30 = vld [vmem:[%s1055_s1 + $0x40] sm:$0xff]  ;;  %v113_v35 = vld [vmem:[#allocation1 + $0x9] sm:$0xff]  ;;  %v715_v57 = vld [vmem:[%s1062_s8 + $0x10] sm:$0xf0] }
  0x14   :  { %342 = vmatpush.bf16.msra.mxu2 %v750_v19  ;;  %v747_v31 = vld [vmem:[%s1055_s1 + $0x80] sm:$0xff]  ;;  %v767_v54 = vld [vmem:[%s1062_s8 + $0xc] sm:$0xf0]  ;;  %v721_v58 = vld [vmem:[%s1062_s8 + $0x8] sm:$0xf] }
  0x15   :  { %355 = vmatpush.bf16.msra.mxu3 %v758_v20  ;;  %v755_v32 = vld [vmem:[%s1055_s1 + $0xc0] sm:$0xff]  ;;  %v768_v59 = vld [vmem:[%s1062_s8 + $0x14] sm:$0xf0]  ;;  %v766_v62 = vld [vmem:[%s1062_s8 + $0xc] sm:$0xf] }
  0x16   :  { %317 = vmatpush.bf16.msra.mxu0 %v733_v21  ;;  %v764_v33 = vld [vmem:[%s1059_s5] sm:$0xff]  ;;  %v722_v61 = vor.u32 %v768_v59, %v721_v58  ;;  %v723_v63 = vld [vmem:[%s1062_s8 + $0x18] sm:$0xf0] }
  0x17   :  { %330 = vmatpush.bf16.msra.mxu1 %v741_v22  ;;  %v112_v34 = vld [vmem:[#allocation1] sm:$0xff]  ;;  %v726_v0 = vor.u32 %v766_v62, %v723_v63 }
  0x18   :  { %343 = vmatpush.bf16.msra.mxu2 %v749_v23  ;;  %v115_v37 = vld [vmem:[#allocation1 + $0x1b] sm:$0xff]  ;;  %v765_v55 = vld [vmem:[%s1062_s8 + $0x4] sm:$0xf] }
  0x19   :  { %356 = vmatpush.bf16.msra.mxu3 %v757_v24  ;;  %v763_v38 = vld [vmem:[%s1057_s3] sm:$0xff]  ;;  %v718_v60 = vor.u32 %v765_v55, %v715_v57  ;;  %s546_s3 = sshll.u32 %s1065_s11, 4  ;;  %s547_s3 = int_to_ptr.hbm [resolvable:$true] %s546_s3 }
  0x1a   :  { %318 = vmatpush.bf16.msra.mxu0 %v732_v25  ;;  %v771_v39 = vld [vmem:[%s1056_s2] ss:$0 sm:$0xff] }
  0x1b   :  { %331 = vmatpush.bf16.msra.mxu1 %v740_v26  ;;  %v713_v53 = vld [vmem:[%s1062_s8] sm:$0xf] }
  0x1c   :  { %344 = vmatpush.bf16.msra.mxu2 %v748_v27  ;;  %v714_v56 = vor.u32 %v767_v54, %v713_v53  ;;  %v772_v1 = vld [vmem:[%s1058_s4] ss:$0 sm:$0xff]  ;;  %s828_s4 = smov [#allocation2]  }
  0x1d   :  { %357 = vmatpush.bf16.msra.mxu3 %v756_v28  ;;  %v773_v2 = vld [vmem:[%s1060_s6] ss:$0 sm:$0xff]  ;;  %s544_s6 = sshll.u32 %s828_s4, 4  ;;  %s545_s6 = int_to_ptr.vmem [resolvable:$true] %s544_s6 }
  0x1e   :  { %319 = vmatpush.bf16.msra.mxu0 %v731_v29  ;;  %v422_v11 = vld [vmem:[%s1061_s7] sm:$0x3]  ;;  %s829_s7 = smov [#allocation4]  }
  0x1f   :  { %332 = vmatpush.bf16.msra.mxu1 %v739_v30  ;;  %s555_s2 = sshll.u32 %s829_s7, 4  ;;  %v430_v16 = vld [vmem:[%s1063_s9] sm:$0xf]  ;;  %s556_s2 = int_to_ptr.vmem [resolvable:$true] %s555_s2 }
  0x20   :  { %345 = vmatpush.bf16.msra.mxu2 %v747_v31  ;;  %v434_v17 = vperm.slane %v430_v16, 2  ;;  %v435_v18 = vperm.slane %v430_v16, 3  ;;  %v432_v23 = vperm.slane %v430_v16, 0  ;;  %v433_v24 = vperm.slane %v430_v16, 1 }
  0x21   :  { %358 = vmatpush.bf16.msra.mxu3 %v755_v32  ;;  %320 = vmatmul.bf16.vlgmr.msra.gmra.mxu0 %v112_v34 }
  0x22   :  { %333 = vmatmul.bf16.vlgmr.msra.gmra.mxu1 %v113_v35  ;;  %388 = vmatpush.bf16.msrb.mxu0 %v763_v38 }
  0x23   :  { %413 = vmatpush.bf16.msrb.mxu1 %v764_v33  ;;  %346 = vmatmul.bf16.vlgmr.msra.gmra.mxu2 %v114_v36 }
  0x24   :  { %359 = vmatmul.bf16.vlgmr.msra.gmra.mxu3 %v115_v37  ;;  %470 = vmatpush.bf16.msrb.mxu2 %v714_v56 }
  0x25   :  { %483 = vmatpush.bf16.msrb.mxu3 %v718_v60 }
  0x26   :  { %496 = vmatpush.bf16.msra.mxu0 %v722_v61 }
  0x27   :  { %509 = vmatpush.bf16.msra.mxu1 %v726_v0 }
  0x9e   :  { %v321_v40 = vpop.f32.mrf.mxu0 }
  0x9f   :  { %v334_v41 = vpop.f32.mrf.mxu1  ;;  %v322_v42 = vadd.f32 %v771_v39, %v321_v40 }
  0xa1   :  { %v335_v43 = vadd.f32 %v334_v41, %v322_v42 }
  0xa6   :  { %v347_v44 = vpop.f32.mrf.mxu2  ;;  %v323_v47 = vpop.f32.mrf.mxu0 }
  0xa7   :  { %v360_v45 = vpop.f32.mrf.mxu3  ;;  %v348_v46 = vadd.f32 %v347_v44, %v335_v43  ;;  %v336_v48 = vpop.f32.mrf.mxu1 }
  0xa9   :  { %v361_v49 = vadd.f32 %v360_v45, %v348_v46 }
  0xab   :  { %v364_v50 = vpack.c.bf16 %v361_v49, %v361_v49 }
  0xad   :  { %705 = vmatmul.msk.bf16.vlgmr.msrb.gmra.mxu0 %vm377_vm0, %v364_v50  ;;  %710 = vmatmul.msk.bf16.vlgmr.msrb.gmra.mxu1 %vm377_vm0, %v364_v50 }
  0xae   :  { %v349_v51 = vpop.f32.mrf.mxu2 }
  0xaf   :  { %v362_v52 = vpop.f32.mrf.mxu3 }
 0x12a   :  { %v390_v3 = vpop.f32.mrf.mxu0  ;;  %v415_v4 = vpop.f32.mrf.mxu1 }
 0x12b   :  { %v391_v5 = vadd.f32 %v772_v1, %v390_v3  ;;  %v416_v6 = vadd.f32 %v773_v2, %v415_v4 }
 0x12d   :  { %v419_v7 = vmul.f32 0.5, %v416_v6  ;;  %536 = vst.msk [vmem:[#allocation4] sm:$0x3] %vm534_vm1, %v416_v6 }
 0x12e   :  { %535 = vst.msk [vmem:[#allocation2] sm:$0x3] %vm534_vm1, %v391_v5  ;;  %560 = dma.vmem_to_hbm [thread:$0]  %s556_s2, 32, %s558_s19, [#allocation5]  }
 0x12f   :  { %v420_v8 = vmul.f32 1.442695, %v419_v7  ;;  %549 = dma.vmem_to_hbm [thread:$0]  %s545_s6, 32, %s547_s3, [#allocation3]  }
 0x131   :  { %774 = vpow2.f32 %v420_v8 }
 0x132   :  { %v392_v9 = vpop.f32.mrf.mxu0  ;;  %v417_v10 = vpop.f32.mrf.mxu1 }
 0x137   :  { %v775_v12 = vpop.eup %774 }
 0x138   :  { %v423_v13 = vmul.f32 %v775_v12, %v422_v11 }
 0x13a   :  { %v424_v14 = vadd.f32 %v423_v13, %v391_v5 }
 0x13c   :  { %v425_v15 = vpack.c.bf16 %v424_v14, %v424_v14 }
 0x13e   :  { %727 = vmatmul.msk.bf16.vlgmr.msrb.gmra.mxu2 %vm377_vm0, %v425_v15  ;;  %728 = vmatmul.msk.bf16.vlgmr.msrb.gmra.mxu3 %vm377_vm0, %v425_v15 }
 0x13f   :  { %729 = vmatmul.msk.bf16.vlgmr.msra.gmra.mxu0 %vm377_vm0, %v425_v15  ;;  %730 = vmatmul.msk.bf16.vlgmr.msra.gmra.mxu1 %vm377_vm0, %v425_v15 }
 0x1bc   :  { %v498_v19 = vpop.f32.mrf.mxu0  ;;  %v511_v20 = vpop.f32.mrf.mxu1 }
 0x1bd   :  { %v499_v21 = vadd.f32 %v498_v19, %v434_v17  ;;  %v512_v22 = vadd.f32 %v511_v20, %v435_v18 }
 0x1bf   :  { %v516_v25 = vpack.c.bf16 %v512_v22, %v499_v21 }
 0x1c1   :  { %v472_v26 = vpop.f32.mrf.mxu2  ;;  %v485_v27 = vpop.f32.mrf.mxu3  ;;  %v520_v30 = vrot.slane %v516_v25, 6  ;;  %v521_v31 = vrot.slane %v516_v25, 1 }
 0x1c2   :  { %v473_v28 = vadd.f32 %v472_v26, %v432_v23  ;;  %v486_v29 = vadd.f32 %v485_v27, %v433_v24 }
 0x1c3   :  { %v529_v36 = vsel %vm526_vm2, %v520_v30, %v521_v31 }
 0x1c4   :  { %v515_v32 = vpack.c.bf16 %v486_v29, %v473_v28  ;;  %v500_v33 = vpop.f32.mrf.mxu0  ;;  %v513_v34 = vpop.f32.mrf.mxu1 }
 0x1c6   :  { %v519_v35 = vrot.slane %v515_v32, 3 }
 0x1c8   :  { %v525_v37 = vsel %vm522_vm3, %v515_v32, %v519_v35 }
 0x1c9   :  { %v531_v38 = vsel %vm530_vm4, %v525_v37, %v529_v36  ;;  %v474_v39 = vpop.f32.mrf.mxu2  ;;  %v487_v40 = vpop.f32.mrf.mxu3 }
 0x1ca   :  { %533 = vst [vmem:[%s1064_s10] sm:$0xf] %v531_v38 }
 0x1cb   :  { %824 = dma.done.wait [#allocation3], 32  }
 0x1cc   :  { %825 = vsyncadd [#allocation3], 4294967264 }
 0x1cd   :  { %826 = dma.done.wait [#allocation5], 32  }
 0x1ce   :  { %827 = vsyncadd [#allocation5], 4294967264 }
 0x1cf   :  { %571 = vsyncpa [#allocation3], 1 }
 0x1d0   :  { %572 = vsyncpa [#allocation5], 1 }

// kernel: vae_fconnected_forward.11
= control target key start
LH: loop header
LB: loop body
LE: loop exit
PB: predicated region body
PF: predicated region fallthrough
CT: control target
= control target key end

     0   :  { %s742_s12 = smov 0   ;;  %s826_s0 = inlined_call_operand.vmem [shape: bf16[2,32,128], index: 0, kind: input, shape index: {}]   ;;  %s827_s1 = inlined_call_operand.vmem [shape: bf16[9,16,32], index: 1, kind: input, shape index: {}]   ;;  %s828_s2 = inlined_call_operand.vmem [shape: f32[16,1], index: 2, kind: input, shape index: {}]   ;;  %s829_s3 = inlined_call_operand.vmem [shape: bf16[2,4,16,20], index: 3, kind: output, shape index: {}]  }
   0x1 LB: > { %s596_s13 = sadd.s32 4294967295, %s716_s12   ;;  %p600_p0 = scmp.ge.s32.totalorder %s716_s12, 1  ;;  %s716_s12 = sphi %s742_s12, %s13_s12  }
   0x2   : > { %p137_p1 = scmp.lt.s32.totalorder %s716_s12, 3 }
   0x4   : > { %p138_p2 = pnand %p600_p0, %p137_p1 }
   0x5   : > { %p161_p3 = scmp.lt.s32.totalorder (!%p138_p2), %s596_s13, 1  ;;  %s719_s18 = smov (!%p138_p2), 123  }
   0x6   : > { %141 = sbr.rel (%p138_p2) target bundleno = 309 (0x135), region = 32  ;;  %s720_s19 = smov (!%p138_p2), 122  }
   0x7   : > { %s721_s22 = smov (!%p138_p2), 127  }
   0xb   : > { %v718_v0 = vmov 0   ;;  %s831_s13 = smov (!%p161_p3, %s596_s13), 1  ;;  %v686_v3 = vld [vmem:[%s827_s1 + $0x20] sm:$0xff]  ;;  %vm208_vm0 = vcmask 261120   ;;  %v406_v4 = vld [vmem:[%s828_s2 + $0x8] sm:$0xff]  ;;  %v690_v6 = vld [vmem:[%s827_s1 + $0x38] sm:$0xff] }
   0xc   : > { %708 = vset.pattern.permute.xlu1 %v718_v0  ;;  %709 = vset.pattern.permute.xlu2 %v718_v0  ;;  %s682_s14 = sshll.u32 %s831_s13, 4  ;;  %v688_v5 = vld [vmem:[%s827_s1 + $0x28] sm:$0xff]  ;;  %v176_v7 = vld [vmem:[%s828_s2] sm:$0xff]  ;;  %v692_v12 = vld [vmem:[%s827_s1 + $0x10] sm:$0xff]  ;;  %vm236_vm2 = vcmask 158720  }
   0xd   : > { %707 = vset.pattern.permute.xlu0 %v718_v0  ;;  %s165_s17 = scalar_lea.vmem %s826_s0, %s682_s14  ;;  %v694_v8 = vld [vmem:[%s827_s1 + $0x40] sm:$0xff]  ;;  %v689_v11 = vld [vmem:[%s827_s1 + $0x8] sm:$0xff]  ;;  %v687_v16 = vld [vmem:[%s827_s1 + $0x18] sm:$0xff] }
   0xe   : > { %v685_v1 = vld [vmem:[%s165_s17 + $0x8] sm:$0xff]  ;;  %v684_v2 = vld [vmem:[%s165_s17] sm:$0xff]  ;;  %v693_v18 = vld [vmem:[%s827_s1 + $0x30] sm:$0xff] }
   0xf   : > { %344 = vrot.lane.b32.xlu0 %v685_v1, %s719_s18  ;;  %342 = vrot.lane.b32.xlu1 %v684_v2, %s719_s18  ;;  %v691_v19 = vld [vmem:[%s827_s1] sm:$0xff]  ;;  %s683_s18 = sshll.u32 %s831_s13, 5 }
  0x10   : > { %426 = vrot.lane.b32.xlu2 %v685_v1, %s720_s19  ;;  %218 = vmatpush.bf16.msra.mxu0 %v685_v1  ;;  %s804_s21 = scalar_lea.vmem %s829_s3, %s683_s18 }
  0x11   : > { %301 = vmatpush.bf16.msra.mxu2 %v685_v1 }
  0x14   : > { %219 = vmatpush.bf16.msra.mxu0 %v684_v2 }
  0x15   : > { %302 = vmatpush.bf16.msra.mxu2 %v684_v2 }
  0x17   : > { %261 = vrot.lane.b32.xlu0 %v685_v1, %s721_s22  ;;  %259 = vrot.lane.b32.xlu1 %v684_v2, %s721_s22 }
  0x18   : > { %384 = vmatpush.bf16.msrb.mxu0 %v685_v1  ;;  %424 = vrot.lane.b32.xlu2 %v684_v2, %s720_s19 }
  0x19   : > { %619 = vmatmul.msk.bf16.vlgmr.msra.gmra.mxu0 %vm208_vm0, %v686_v3  ;;  %633 = vmatmul.msk.bf16.vlgmr.msra.gmra.mxu2 %vm208_vm0, %v688_v5 }
  0x1c   : > { %385 = vmatpush.bf16.msrb.mxu0 %v684_v2 }
  0x1f   : > { %414 = vperm.xlu1 %708, %v406_v4   ;;  %409 = vperm.xlu0 %707, %v176_v7  }
  0x20   : > { %520 = vmatpush.bf16.msra.mxu0 %v685_v1  ;;  %243 = vperm.xlu2 %709, %v176_v7  }
  0x24   : > { %521 = vmatpush.bf16.msra.mxu0 %v684_v2 }
  0x27   : > { %248 = vperm.xlu1 %708, %v406_v4   ;;  %331 = vperm.xlu0 %707, %v406_v4  }
  0x28   : > { %326 = vperm.xlu2 %709, %v176_v7  }
  0x29   : > { %649 = vmatmul.msk.bf16.vlgmr.msrb.gmra.mxu0 %vm208_vm0, %v690_v6 }
  0x2f   : > { %180 = vperm.xlu1 %708, %v176_v7  }
  0x30   : > { %185 = vperm.xlu2 %709, %v406_v4  }
  0x39   : > { %677 = vmatmul.msk.bf16.vlgmr.msra.gmra.mxu0 %vm208_vm0, %v694_v8 }
  0x6a   : > { %v427_v13 = vpop.permute.xlu2 %426 }
  0x72   : > { %v425_v17 = vpop.permute.xlu2 %424 }
  0x7a   : > { %v244_v20 = vpop.permute.xlu2 %243 }
  0x81   : > { %v345_v9 = vpop.permute.xlu0 %344  ;;  %v343_v10 = vpop.permute.xlu1 %342 }
  0x82   : > { %357 = vmatpush.bf16.msra.mxu3 %v345_v9  ;;  %466 = vmatpush.bf16.msrb.mxu2 %v345_v9  ;;  %v327_v23 = vpop.permute.xlu2 %326 }
  0x86   : > { %358 = vmatpush.bf16.msra.mxu3 %v343_v10  ;;  %467 = vmatpush.bf16.msrb.mxu2 %v343_v10 }
  0x89   : > { %v262_v14 = vpop.permute.xlu0 %261  ;;  %642 = vmatmul.msk.bf16.vlgmr.msra.gmra.mxu3 %vm208_vm0, %v689_v11  ;;  %663 = vmatmul.msk.bf16.vlgmr.msrb.gmra.mxu2 %vm208_vm0, %v692_v12  ;;  %v260_v15 = vpop.permute.xlu1 %259 }
  0x8a   : > { %274 = vmatpush.bf16.msra.mxu1 %v262_v14  ;;  %493 = vmatpush.bf16.msrb.mxu3 %v262_v14  ;;  %v186_v26 = vpop.permute.xlu2 %185 }
  0x8e   : > { %275 = vmatpush.bf16.msra.mxu1 %v260_v15  ;;  %494 = vmatpush.bf16.msrb.mxu3 %v260_v15 }
  0x91   : > { %626 = vmatmul.msk.bf16.vlgmr.msra.gmra.mxu1 %vm208_vm0, %v687_v16  ;;  %v798_v21 = vpop.permute.xlu1 %414  ;;  %v410_v36 = vpop.permute.xlu0 %409 }
  0x92   : > { %439 = vmatpush.bf16.msrb.mxu1 %v427_v13 }
  0x96   : > { %440 = vmatpush.bf16.msrb.mxu1 %v425_v17  ;;  %v221_v22 = vpop.f32.mrf.mxu0 }
  0x99   : > { %670 = vmatmul.msk.bf16.vlgmr.msrb.gmra.mxu3 %vm208_vm0, %v693_v18  ;;  %v249_v24 = vpop.permute.xlu1 %248  ;;  %v332_v46 = vpop.permute.xlu0 %331 }
  0x9c   : > { %v304_v37 = vpop.f32.mrf.mxu2 }
  0x9e   : > { %v223_v25 = vpop.f32.mrf.mxu0 }
  0x9f   : > { %v227_v27 = vadd.f32 %v223_v25, %v186_v26 }
  0xa1   : > { %656 = vmatmul.msk.bf16.vlgmr.msrb.gmra.mxu1 %vm208_vm0, %v691_v19  ;;  %vm229_vm1 = vcmp.gt.f32.partialorder %v227_v27, 0.0  ;;  %v231_v28 = vmul.f32 0.2, %v227_v27  ;;  %v181_v31 = vpop.permute.xlu1 %180 }
  0xa2   : > { %v226_v32 = vadd.f32 %v221_v22, %v181_v31 }
  0xa3   : > { %v233_v29 = vsel %vm229_vm1, %v227_v27, %v231_v28 }
  0xa4   : > { %v235_v30 = vpack.c.bf16 %v233_v29, %v233_v29  ;;  %vm228_vm3 = vcmp.gt.f32.partialorder %v226_v32, 0.0  ;;  %v230_v33 = vmul.f32 0.2, %v226_v32  ;;  %v306_v50 = vpop.f32.mrf.mxu2 }
  0xa6   : > { %238 = vst.msk [vmem:[%s804_s21 + $0x4] sm:$0xf] %vm236_vm2, %v235_v30  ;;  %v232_v34 = vsel %vm228_vm3, %v226_v32, %v230_v33  ;;  %v387_v39 = vpop.f32.mrf.mxu0 }
  0xa7   : > { %v234_v35 = vpack.c.bf16 %v232_v34, %v232_v34 }
  0xa9   : > { %237 = vst.msk [vmem:[%s804_s21] sm:$0xf] %vm236_vm2, %v234_v35 }
  0xae   : > { %v389_v55 = vpop.f32.mrf.mxu0 }
  0xb6   : > { %v523_v7 = vpop.f32.mrf.mxu0 }
  0xbe   : > { %v525_v19 = vpop.f32.mrf.mxu0 }
 0x10c   : > { %v360_v38 = vpop.f32.mrf.mxu3  ;;  %v469_v2 = vpop.f32.mrf.mxu2 }
 0x10d   : > { %v365_v40 = vadd.f32 %v360_v38, %v327_v23 }
 0x10e   : > { %v277_v41 = vpop.f32.mrf.mxu1 }
 0x10f   : > { %v392_v42 = vadd.f32 %v387_v39, %v365_v40  ;;  %v282_v43 = vadd.f32 %v277_v41, %v244_v20 }
 0x111   : > { %vm394_vm4 = vcmp.gt.f32.partialorder %v392_v42, 0.0  ;;  %v396_v44 = vmul.f32 0.2, %v392_v42  ;;  %v309_v45 = vadd.f32 %v304_v37, %v282_v43 }
 0x113   : > { %v398_v47 = vsel %vm394_vm4, %v392_v42, %v396_v44  ;;  %vm311_vm5 = vcmp.gt.f32.partialorder %v309_v45, 0.0  ;;  %v313_v48 = vmul.f32 0.2, %v309_v45 }
 0x114   : > { %v400_v49 = vpack.c.bf16 %v398_v47, %v398_v47  ;;  %v362_v51 = vpop.f32.mrf.mxu3  ;;  %v471_v13 = vpop.f32.mrf.mxu2 }
 0x115   : > { %v315_v52 = vsel %vm311_vm5, %v309_v45, %v313_v48  ;;  %v366_v53 = vadd.f32 %v362_v51, %v332_v46 }
 0x116   : > { %650 = vst.msk [vmem:[%s804_s21 + $0x10] sm:$0xf] %vm236_vm2, %v400_v49  ;;  %v317_v54 = vpack.c.bf16 %v315_v52, %v315_v52  ;;  %v279_v56 = vpop.f32.mrf.mxu1 }
 0x117   : > { %v393_v57 = vadd.f32 %v389_v55, %v366_v53  ;;  %v283_v58 = vadd.f32 %v279_v56, %v249_v24 }
 0x118   : > { %634 = vst.msk [vmem:[%s804_s21 + $0x8] sm:$0xf] %vm236_vm2, %v317_v54 }
 0x119   : > { %vm395_vm6 = vcmp.gt.f32.partialorder %v393_v57, 0.0  ;;  %v397_v59 = vmul.f32 0.2, %v393_v57  ;;  %v310_v60 = vadd.f32 %v306_v50, %v283_v58 }
 0x11b   : > { %v399_v61 = vsel %vm395_vm6, %v393_v57, %v397_v59  ;;  %vm312_vm7 = vcmp.gt.f32.partialorder %v310_v60, 0.0  ;;  %v314_v62 = vmul.f32 0.2, %v310_v60 }
 0x11c   : > { %v401_v63 = vpack.c.bf16 %v399_v61, %v399_v61  ;;  %v496_v5 = vpop.f32.mrf.mxu3 }
 0x11d   : > { %v316_v0 = vsel %vm312_vm7, %v310_v60, %v314_v62 }
 0x11e   : > { %651 = vst.msk [vmem:[%s804_s21 + $0x14] sm:$0xf] %vm236_vm2, %v401_v63  ;;  %v318_v1 = vpack.c.bf16 %v316_v0, %v316_v0  ;;  %v442_v3 = vpop.f32.mrf.mxu1 }
 0x11f   : > { %v447_v4 = vadd.f32 %v442_v3, %v410_v36 }
 0x120   : > { %635 = vst.msk [vmem:[%s804_s21 + $0xc] sm:$0xf] %vm236_vm2, %v318_v1 }
 0x121   : > { %v474_v6 = vadd.f32 %v469_v2, %v447_v4 }
 0x123   : > { %v501_v8 = vadd.f32 %v496_v5, %v474_v6 }
 0x124   : > { %v498_v17 = vpop.f32.mrf.mxu3 }
 0x125   : > { %v528_v9 = vadd.f32 %v523_v7, %v501_v8 }
 0x126   : > { %v444_v10 = vpop.f32.mrf.mxu1 }
 0x127   : > { %vm530_vm8 = vcmp.gt.f32.partialorder %v528_v9, 0.0  ;;  %v532_v11 = vmul.f32 0.2, %v528_v9  ;;  %v448_v12 = vadd.f32 %v444_v10, %v798_v21 }
 0x129   : > { %v534_v14 = vsel %vm530_vm8, %v528_v9, %v532_v11  ;;  %v475_v15 = vadd.f32 %v471_v13, %v448_v12 }
 0x12a   : > { %v536_v16 = vpack.c.bf16 %v534_v14, %v534_v14 }
 0x12b   : > { %v502_v18 = vadd.f32 %v498_v17, %v475_v15 }
 0x12c   : > { %678 = vst.msk [vmem:[%s804_s21 + $0x18] sm:$0xf] %vm236_vm2, %v536_v16 }
 0x12d   : > { %v529_v20 = vadd.f32 %v525_v19, %v502_v18 }
 0x12f   : > { %vm531_vm9 = vcmp.gt.f32.partialorder %v529_v20, 0.0  ;;  %v533_v22 = vmul.f32 0.2, %v529_v20 }
 0x131   : > { %v535_v23 = vsel %vm531_vm9, %v529_v20, %v533_v22 }
 0x132   : > { %v537_v24 = vpack.c.bf16 %v535_v23, %v535_v23 }
 0x134   : > { %679 = vst.msk [vmem:[%s804_s21 + $0x1c] sm:$0xf] %vm236_vm2, %v537_v24 }
 0x135 PF: > { %s13_s12 = sadd.s32 1, %s716_s12  }
 0x136   : > { %p10_p4 = scmp.ge.s32.totalorder %s13_s12, 4  }
 0x138   :  { %12 = sbr.rel (!%p10_p4) target bundleno = 1 (0x1), region = 73 }

// kernel: vae_fconnected_forward.12
= control target key start
LH: loop header
LB: loop body
LE: loop exit
PB: predicated region body
PF: predicated region fallthrough
CT: control target
= control target key end

     0   :  { %s548_s12 = smov 0   ;;  %s618_s0 = inlined_call_operand.vmem [shape: bf16[2,16,128], index: 0, kind: input, shape index: {}]   ;;  %s619_s1 = inlined_call_operand.vmem [shape: bf16[9,8,16], index: 1, kind: input, shape index: {}]   ;;  %s620_s2 = inlined_call_operand.vmem [shape: f32[8,1], index: 2, kind: input, shape index: {}]   ;;  %s621_s3 = inlined_call_operand.vmem [shape: bf16[2,4,8,72], index: 3, kind: output, shape index: {}]  }
   0x1 LB: > { %s463_s13 = sadd.s32 4294967295, %s522_s12   ;;  %p467_p0 = scmp.ge.s32.totalorder %s522_s12, 1  ;;  %s522_s12 = sphi %s548_s12, %s13_s12  }
   0x2   : > { %p137_p1 = scmp.lt.s32.totalorder %s522_s12, 3 }
   0x4   : > { %p138_p2 = pnand %p467_p0, %p137_p1 }
   0x5   : > { %p161_p3 = scmp.lt.s32.totalorder (!%p138_p2), %s463_s13, 1  ;;  %s524_s18 = smov (!%p138_p2), 119  }
   0x6   : > { %141 = sbr.rel (%p138_p2) target bundleno = 297 (0x129), region = 32  ;;  %s525_s19 = smov (!%p138_p2), 118  }
   0x7   : > { %s526_s22 = smov (!%p138_p2), 127  }
   0xb   : > { %s623_s13 = smov (!%p161_p3, %s463_s13), 1  ;;  %v472_v1 = vld [vmem:[%s619_s1 + $0x10] sm:$0xf]  ;;  %vm188_vm0 = vcmask 130048   ;;  %v480_v2 = vld [vmem:[%s619_s1 + $0x14] sm:$0xf] }
   0xc   : > { %s498_s14 = sshll.u32 %s623_s13, 3  ;;  %v485_v3 = vld [vmem:[%s619_s1 + $0x1c] sm:$0xf]  ;;  %v174_v4 = vld [vmem:[%s620_s2] sm:$0xff]  ;;  %v527_v5 = vmov 0   ;;  %s499_s16 = sshll.u32 %s623_s13, 4 }
   0xd   : > { %s165_s17 = scalar_lea.vmem %s618_s0, %s498_s14  ;;  %515 = vset.pattern.permute.xlu0 %v527_v5  ;;  %513 = vset.pattern.permute.xlu1 %v527_v5  ;;  %v493_v6 = vld [vmem:[%s619_s1 + $0x20] sm:$0xf]  ;;  %v483_v8 = vld [vmem:[%s619_s1 + $0x4] sm:$0xf]  ;;  %v489_v9 = vld [vmem:[%s619_s1 + $0x8] sm:$0xf] }
   0xe   : > { %v500_v0 = vld [vmem:[%s165_s17] sm:$0xff]  ;;  %514 = vset.pattern.permute.xlu2 %v527_v5  ;;  %v478_v12 = vld [vmem:[%s619_s1 + $0xc] sm:$0xf]  ;;  %v491_v14 = vld [vmem:[%s619_s1 + $0x18] sm:$0xf]  ;;  %vm210_vm2 = vcmask 584704  }
   0xf   : > { %273 = vrot.lane.b32.xlu0 %v500_v0, %s524_s18  ;;  %325 = vrot.lane.b32.xlu1 %v500_v0, %s525_s19  ;;  %v324_v16 = vld [vmem:[%s619_s1] sm:$0xf]  ;;  %s605_s19 = scalar_lea.vmem %s621_s3, %s499_s16 }
  0x10   : > { %199 = vmatpush.bf16.msra.mxu0 %v500_v0  ;;  %252 = vmatpush.bf16.msra.mxu2 %v500_v0 }
  0x11   : > { %215 = vperm.xlu2 %514, %v174_v4  }
  0x13   : > { %477 = vmatmul.msk.bf16.vlgmr.msra.gmra.mxu0 %vm188_vm0, %v472_v1  ;;  %481 = vmatmul.msk.bf16.vlgmr.msra.gmra.mxu2 %vm188_vm0, %v480_v2 }
  0x14   : > { %305 = vmatpush.bf16.msrb.mxu0 %v500_v0 }
  0x17   : > { %220 = vrot.lane.b32.xlu0 %v500_v0, %s526_s22  ;;  %321 = vperm.xlu1 %513, %v174_v4  }
  0x18   : > { %395 = vmatpush.bf16.msra.mxu0 %v500_v0 }
  0x19   : > { %268 = vperm.xlu2 %514, %v174_v4  }
  0x1f   : > { %177 = vperm.xlu0 %515, %v174_v4  }
  0x23   : > { %486 = vmatmul.msk.bf16.vlgmr.msrb.gmra.mxu0 %vm188_vm0, %v485_v3 }
  0x33   : > { %494 = vmatmul.msk.bf16.vlgmr.msra.gmra.mxu0 %vm188_vm0, %v493_v6 }
  0x6b   : > { %v216_v27 = vpop.permute.xlu2 %215 }
  0x73   : > { %v269_v29 = vpop.permute.xlu2 %268 }
  0x81   : > { %v274_v7 = vpop.permute.xlu0 %273  ;;  %v326_v10 = vpop.permute.xlu1 %325 }
  0x82   : > { %286 = vmatpush.bf16.msra.mxu3 %v274_v7  ;;  %357 = vmatpush.bf16.msrb.mxu2 %v274_v7 }
  0x85   : > { %484 = vmatmul.msk.bf16.vlgmr.msra.gmra.mxu3 %vm188_vm0, %v483_v8  ;;  %490 = vmatmul.msk.bf16.vlgmr.msrb.gmra.mxu2 %vm188_vm0, %v489_v9 }
  0x89   : > { %v221_v11 = vpop.permute.xlu0 %220  ;;  %v322_v47 = vpop.permute.xlu1 %321 }
  0x8a   : > { %233 = vmatpush.bf16.msra.mxu1 %v221_v11  ;;  %376 = vmatpush.bf16.msrb.mxu3 %v221_v11 }
  0x8d   : > { %479 = vmatmul.msk.bf16.vlgmr.msra.gmra.mxu1 %vm188_vm0, %v478_v12 }
  0x8e   : > { %338 = vmatpush.bf16.msrb.mxu1 %v326_v10 }
  0x90   : > { %v201_v13 = vpop.f32.mrf.mxu0 }
  0x91   : > { %v178_v17 = vpop.permute.xlu0 %177 }
  0x92   : > { %v205_v18 = vadd.f32 %v201_v13, %v178_v17 }
  0x94   : > { %vm206_vm1 = vcmp.gt.f32.partialorder %v205_v18, 0.0  ;;  %v207_v19 = vmul.f32 0.2, %v205_v18 }
  0x95   : > { %492 = vmatmul.msk.bf16.vlgmr.msrb.gmra.mxu3 %vm188_vm0, %v491_v14 }
  0x96   : > { %v208_v20 = vsel %vm206_vm1, %v205_v18, %v207_v19  ;;  %v254_v22 = vpop.f32.mrf.mxu2 }
  0x97   : > { %v209_v21 = vpack.c.bf16 %v208_v20, %v208_v20 }
  0x98   : > { %v203_v15 = vpop.f32.mrf.mxu0 }
  0x99   : > { %211 = vst.msk [vmem:[%s605_s19] sm:$0xf] %vm210_vm2, %v209_v21 }
  0x9d   : > { %488 = vmatmul.msk.bf16.vlgmr.msrb.gmra.mxu1 %vm188_vm0, %v324_v16 }
  0x9e   : > { %v256_v24 = vpop.f32.mrf.mxu2 }
  0xa0   : > { %v307_v23 = vpop.f32.mrf.mxu0 }
  0xa8   : > { %v309_v25 = vpop.f32.mrf.mxu0 }
  0xb0   : > { %v397_v26 = vpop.f32.mrf.mxu0 }
  0xb8   : > { %v399_v28 = vpop.f32.mrf.mxu0 }
 0x108   : > { %v288_v30 = vpop.f32.mrf.mxu3  ;;  %v359_v31 = vpop.f32.mrf.mxu2 }
 0x109   : > { %v292_v32 = vadd.f32 %v288_v30, %v269_v29 }
 0x10a   : > { %v235_v33 = vpop.f32.mrf.mxu1 }
 0x10b   : > { %v239_v34 = vadd.f32 %v235_v33, %v216_v27  ;;  %v311_v35 = vadd.f32 %v307_v23, %v292_v32 }
 0x10d   : > { %v258_v36 = vadd.f32 %v254_v22, %v239_v34  ;;  %vm312_vm3 = vcmp.gt.f32.partialorder %v311_v35, 0.0  ;;  %v313_v37 = vmul.f32 0.2, %v311_v35 }
 0x10f   : > { %vm259_vm4 = vcmp.gt.f32.partialorder %v258_v36, 0.0  ;;  %v260_v38 = vmul.f32 0.2, %v258_v36  ;;  %v314_v39 = vsel %vm312_vm3, %v311_v35, %v313_v37 }
 0x110   : > { %v315_v40 = vpack.c.bf16 %v314_v39, %v314_v39  ;;  %v290_v41 = vpop.f32.mrf.mxu3  ;;  %v361_v42 = vpop.f32.mrf.mxu2 }
 0x111   : > { %v261_v43 = vsel %vm259_vm4, %v258_v36, %v260_v38 }
 0x112   : > { %v262_v44 = vpack.c.bf16 %v261_v43, %v261_v43  ;;  %487 = vst.msk [vmem:[%s605_s19 + $0x8] sm:$0xf] %vm210_vm2, %v315_v40  ;;  %v237_v45 = vpop.f32.mrf.mxu1 }
 0x114   : > { %482 = vst.msk [vmem:[%s605_s19 + $0x4] sm:$0xf] %vm210_vm2, %v262_v44 }
 0x118   : > { %v378_v46 = vpop.f32.mrf.mxu3 }
 0x11a   : > { %v340_v48 = vpop.f32.mrf.mxu1 }
 0x11b   : > { %v344_v49 = vadd.f32 %v340_v48, %v322_v47 }
 0x11d   : > { %v363_v50 = vadd.f32 %v359_v31, %v344_v49 }
 0x11f   : > { %v382_v51 = vadd.f32 %v378_v46, %v363_v50 }
 0x120   : > { %v380_v52 = vpop.f32.mrf.mxu3 }
 0x121   : > { %v401_v53 = vadd.f32 %v397_v26, %v382_v51 }
 0x122   : > { %v342_v54 = vpop.f32.mrf.mxu1 }
 0x123   : > { %vm402_vm5 = vcmp.gt.f32.partialorder %v401_v53, 0.0  ;;  %v403_v55 = vmul.f32 0.2, %v401_v53 }
 0x125   : > { %v404_v56 = vsel %vm402_vm5, %v401_v53, %v403_v55 }
 0x126   : > { %v405_v57 = vpack.c.bf16 %v404_v56, %v404_v56 }
 0x128   : > { %495 = vst.msk [vmem:[%s605_s19 + $0xc] sm:$0xf] %vm210_vm2, %v405_v57 }
 0x129 PF: > { %s13_s12 = sadd.s32 1, %s522_s12  }
 0x12a   : > { %p10_p4 = scmp.ge.s32.totalorder %s13_s12, 4  }
 0x12c   :  { %12 = sbr.rel (!%p10_p4) target bundleno = 1 (0x1), region = 73 }

// kernel: vae_fconnected_forward.13
= control target key start
LH: loop header
LB: loop body
LE: loop exit
PB: predicated region body
PF: predicated region fallthrough
CT: control target
= control target key end

     0   :  { %s1180_s14 = smov 0   ;;  %s1410_s0 = inlined_call_operand.vmem [shape: bf16[2,8,384], index: 0, kind: input, shape index: {}]   ;;  %s1411_s1 = inlined_call_operand.vmem [shape: bf16[9,1,8], index: 1, kind: input, shape index: {}]   ;;  %s1412_s2 = inlined_call_operand.<no memory space> [shape: f32[1,1], index: 2, kind: input, shape index: {}]   ;;  %s1413_s3 = inlined_call_operand.vmem [shape: f32[2,4,1,272], index: 3, kind: output, shape index: {}]  }
   0x1   :  { %v8_v0 = vstv %s1412_s2 }
   0x2   :  { %9 = vst [vmem:[#allocation2] sm:$0x1] %v8_v0 }
   0x3 LB: > { %s1023_s15 = sadd.s32 4294967295, %s1151_s14   ;;  %p1027_p0 = scmp.ge.s32.totalorder %s1151_s14, 1  ;;  %s1151_s14 = sphi %s1180_s14, %s15_s14  }
   0x4   : > { %p139_p1 = scmp.lt.s32.totalorder %s1151_s14, 3 }
   0x6   : > { %p140_p2 = pnand %p1027_p0, %p139_p1 }
   0x7   : > { %p162_p3 = scmp.lt.s32.totalorder (!%p140_p2), %s1023_s15, 1  ;;  %s1154_s19 = smov (!%p140_p2), 127  }
   0x8   : > { %143 = sbr.rel (%p140_p2) target bundleno = 398 (0x18e), region = 32  ;;  %s1155_s20 = smov (!%p140_p2), 111  }
   0x9   : > { %s1156_s23 = smov (!%p140_p2), 110  }
   0xd   : > { %s1427_s15 = smov (!%p162_p3, %s1023_s15), 1  ;;  %v1153_v1 = vmov 0   ;;  %vm195_vm0 = vcmask 1043456   ;;  %v1029_v13 = vld [vmem:[%s1411_s1 + $0x4] sm:$0x1]  ;;  %vm191_vm1 = vcmask 64512  }
   0xe   : > { %1095 = vset.pattern.permute.xlu1 %v1153_v1  ;;  %1096 = vset.pattern.permute.xlu2 %v1153_v1  ;;  %s1081_s2 = smul.u32 12, %s1427_s15  ;;  %v1040_v14 = vld [vmem:[%s1411_s1 + $0x5] sm:$0x1]  ;;  %v319_v15 = vld [vmem:[#allocation2] sm:$0x1]  ;;  %vm520_vm2 = vcmask 908288  }
   0xf   : > { %1094 = vset.pattern.permute.xlu0 %v1153_v1  ;;  %v174_v16 = vld [vmem:[#allocation2] sm:$0x1]  ;;  %v1036_v21 = vld [vmem:[%s1411_s1 + $0x3] sm:$0x1]  ;;  %vm334_vm3 = vcmask 1039360   ;;  %vm705_vm4 = vcmask 900096  }
  0x10   : > { %s166_s18 = scalar_lea.vmem %s1410_s0, %s1081_s2  ;;  %v1048_v34 = vld [vmem:[%s1411_s1 + $0x1] sm:$0x1]  ;;  %v1052_v41 = vld [vmem:[%s1411_s1 + $0x7] sm:$0x1]  ;;  %v505_v44 = vld [vmem:[#allocation2] sm:$0x1]  ;;  %s1297_s17 = scalar_lea.vmem %s1413_s3, %s1081_s2 }
  0x11   : > { %v173_v2 = vld [vmem:[%s166_s18 + $0x8] sm:$0xf]  ;;  %v172_v3 = vld [vmem:[%s166_s18] sm:$0xff] }
  0x12   : > { %v187_v4 = vunpack.c.l.b16 %v173_v2  ;;  %v185_v5 = vunpack.c.l.b16 %v172_v3  ;;  %v186_v6 = vunpack.c.h.b16 %v172_v3  ;;  %v1063_v45 = vld [vmem:[%s1411_s1 + $0x2] sm:$0x1]  ;;  %v691_v46 = vld [vmem:[#allocation2] sm:$0x1]  ;;  %v1067_v48 = vld [vmem:[%s1411_s1 + $0x6] sm:$0x1] }
  0x13   : > { %v698_v47 = vld [vmem:[%s1411_s1] sm:$0x1]  ;;  %v1071_v52 = vld [vmem:[%s1411_s1 + $0x8] sm:$0x1] }
  0x14   : > { %v190_v7 = vpack.c.b16 %v187_v4, %v187_v4  ;;  %v188_v8 = vpack.c.b16 %v185_v5, %v185_v5  ;;  %v189_v9 = vpack.c.b16 %v186_v6, %v186_v6 }
  0x16   : > { %332 = vrot.lane.b32.xlu1 %v190_v7, %s1154_s19  ;;  %328 = vrot.lane.b32.xlu0 %v188_v8, %s1154_s19  ;;  %v1197_v10 = vsel %vm195_vm0, %v190_v7, 0  ;;  %v1200_v11 = vsel %vm195_vm0, %v189_v9, 0  ;;  %v1203_v12 = vsel %vm195_vm0, %v188_v8, 0 }
  0x17   : > { %518 = vrot.lane.b32.xlu2 %v190_v7, %s1155_s20  ;;  %238 = vmatpush.bf16.msra.mxu2 %v1197_v10 }
  0x18   : > { %225 = vmatpush.bf16.msra.mxu1 %v1200_v11  ;;  %212 = vmatpush.bf16.msra.mxu0 %v1203_v12 }
  0x1a   : > { %1032 = vmatmul.msk.bf16.vlgmr.msra.gmra.mxu2 %vm191_vm1, %v1029_v13 }
  0x1b   : > { %403 = vmatpush.bf16.msrb.mxu2 %v1203_v12  ;;  %1031 = vmatmul.msk.bf16.vlgmr.msra.gmra.mxu1 %vm191_vm1, %v1029_v13 }
  0x1c   : > { %1030 = vmatmul.msk.bf16.vlgmr.msra.gmra.mxu0 %vm191_vm1, %v1029_v13 }
  0x1e   : > { %516 = vrot.lane.b32.xlu1 %v189_v9, %s1155_s20  ;;  %330 = vrot.lane.b32.xlu0 %v189_v9, %s1154_s19 }
  0x1f   : > { %514 = vrot.lane.b32.xlu2 %v188_v8, %s1155_s20 }
  0x26   : > { %701 = vrot.lane.b32.xlu1 %v189_v9, %s1156_s23  ;;  %699 = vrot.lane.b32.xlu0 %v188_v8, %s1156_s23 }
  0x27   : > { %703 = vrot.lane.b32.xlu2 %v190_v7, %s1156_s23 }
  0x2a   : > { %1041 = vmatmul.msk.bf16.vlgmr.msrb.gmra.mxu2 %vm191_vm1, %v1040_v14 }
  0x2e   : > { %322 = vperm.xlu1 %1095, %v319_v15   ;;  %694 = vperm.xlu0 %1094, %v691_v46  }
  0x2f   : > { %508 = vperm.xlu2 %1096, %v505_v44  }
  0x36   : > { %177 = vperm.xlu1 %1095, %v174_v16  }
  0x71   : > { %v519_v17 = vpop.permute.xlu2 %518 }
  0x72   : > { %v533_v33 = vsel %vm195_vm0, %v519_v17, 0 }
  0x79   : > { %v515_v22 = vpop.permute.xlu2 %514 }
  0x81   : > { %v704_v35 = vpop.permute.xlu2 %703 }
  0x82   : > { %v718_v36 = vsel %vm195_vm0, %v704_v35, 0 }
  0x88   : > { %v333_v18 = vpop.permute.xlu1 %332  ;;  %v329_v19 = vpop.permute.xlu0 %328 }
  0x89   : > { %v1220_v20 = vsel %vm195_vm0, %v333_v18, 0 }
  0x8a   : > { %382 = vmatpush.bf16.msrb.mxu1 %v1220_v20 }
  0x8d   : > { %1039 = vmatmul.msk.bf16.vlgmr.msrb.gmra.mxu1 %vm191_vm1, %v1036_v21 }
  0x90   : > { %v517_v23 = vpop.permute.xlu1 %516  ;;  %v331_v24 = vpop.permute.xlu0 %330 }
  0x91   : > { %v522_v25 = vsel %vm520_vm2, %v517_v23, %v519_v17  ;;  %v335_v26 = vsel %vm334_vm3, %v329_v19, %v331_v24  ;;  %v336_v27 = vsel %vm334_vm3, %v331_v24, %v333_v18  ;;  %v521_v28 = vsel %vm520_vm2, %v515_v22, %v517_v23 }
  0x92   : > { %v530_v29 = vsel %vm195_vm0, %v522_v25, 0  ;;  %v341_v30 = vsel %vm195_vm0, %v335_v26, 0  ;;  %v344_v31 = vsel %vm195_vm0, %v336_v27, 0  ;;  %v527_v32 = vsel %vm195_vm0, %v521_v28, 0 }
  0x93   : > { %356 = vmatpush.bf16.msra.mxu3 %v341_v30  ;;  %369 = vmatpush.bf16.msrb.mxu0 %v344_v31  ;;  %vm311_vm2 = vcmask 1041408  }
  0x94   : > { %555 = vmatpush.bf16.msra.mxu2 %v530_v29  ;;  %542 = vmatpush.bf16.msra.mxu1 %v527_v32 }
  0x96   : > { %1037 = vmatmul.msk.bf16.vlgmr.msra.gmra.mxu3 %vm191_vm1, %v1036_v21  ;;  %1038 = vmatmul.msk.bf16.vlgmr.msrb.gmra.mxu0 %vm191_vm1, %v1036_v21 }
  0x97   : > { %416 = vmatpush.bf16.msrb.mxu3 %v1200_v11  ;;  %1050 = vmatmul.msk.bf16.vlgmr.msra.gmra.mxu2 %vm191_vm1, %v1048_v34 }
  0x98   : > { %615 = vmatpush.bf16.msrb.mxu2 %v1197_v10  ;;  %429 = vmatpush.bf16.msra.mxu0 %v1197_v10  ;;  %v702_v37 = vpop.permute.xlu1 %701  ;;  %v700_v38 = vpop.permute.xlu0 %699 }
  0x99   : > { %602 = vmatpush.bf16.msrb.mxu1 %v1200_v11  ;;  %v706_v39 = vsel %vm705_vm4, %v700_v38, %v702_v37  ;;  %v707_v40 = vsel %vm705_vm4, %v702_v37, %v704_v35  ;;  %v227_v49 = vpop.f32.mrf.mxu1  ;;  %v214_v56 = vpop.f32.mrf.mxu0  ;;  %v314_v35 = vlaneseq }
  0x9a   : > { %v712_v42 = vsel %vm195_vm0, %v706_v39, 0  ;;  %v715_v43 = vsel %vm195_vm0, %v707_v40, 0 }
  0x9b   : > { %568 = vmatpush.bf16.msra.mxu3 %v533_v33  ;;  %vm1299_vm3 = vcmp.lt.s32.totalorder %v314_v35, 272 }
  0x9c   : > { %774 = vmatpush.bf16.msra.mxu2 %v527_v32  ;;  %589 = vmatpush.bf16.msrb.mxu0 %v1203_v12 }
  0x9d   : > { %1049 = vmatmul.msk.bf16.vlgmr.msra.gmra.mxu1 %vm191_vm1, %v1048_v34  ;;  %v240_v55 = vpop.f32.mrf.mxu2 }
  0x9e   : > { %753 = vmatpush.bf16.msra.mxu1 %v718_v36 }
  0xa0   : > { %v1275_v51 = vpop.permute.xlu1 %322 }
  0xa1   : > { %v229_v50 = vpop.f32.mrf.mxu1  ;;  %v216_v0 = vpop.f32.mrf.mxu0 }
  0xa5   : > { %v242_v63 = vpop.f32.mrf.mxu2 }
  0xa6   : > { %1042 = vmatmul.msk.bf16.vlgmr.msrb.gmra.mxu3 %vm191_vm1, %v1040_v14  ;;  %1043 = vmatmul.msk.bf16.vlgmr.msra.gmra.mxu0 %vm191_vm1, %v1040_v14 }
  0xa7   : > { %1055 = vmatmul.msk.bf16.vlgmr.msrb.gmra.mxu2 %vm191_vm1, %v1052_v41  ;;  %727 = vmatpush.bf16.msrb.mxu3 %v712_v42 }
  0xa8   : > { %834 = vmatpush.bf16.msrb.mxu2 %v344_v31  ;;  %740 = vmatpush.bf16.msra.mxu0 %v715_v43  ;;  %v178_v53 = vpop.permute.xlu1 %177 }
  0xa9   : > { %v180_v54 = vperm.slane %v178_v53, 0 }
  0xab   : > { %v245_v57 = vadd.f32 %v227_v49, %v180_v54  ;;  %v246_v58 = vadd.f32 %v240_v55, %v180_v54  ;;  %v244_v59 = vadd.f32 %v214_v56, %v180_v54  ;;  %v325_v49 = vperm.slane %v1275_v51, 0 }
  0xad   : > { %1054 = vmatmul.msk.bf16.vlgmr.msrb.gmra.mxu1 %vm191_vm1, %v1052_v41  ;;  %v1034_v60 = vmul.f32 -1.442695, %v245_v57  ;;  %v1035_v61 = vmul.f32 -1.442695, %v246_v58  ;;  %v1033_v62 = vmul.f32 -1.442695, %v244_v59  ;;  %v405_v15 = vpop.f32.mrf.mxu2  ;;  %v509_v58 = vpop.permute.xlu2 %508 }
  0xae   : > { %821 = vmatpush.bf16.msrb.mxu1 %v341_v30  ;;  %v511_v0 = vperm.slane %v509_v58, 0 }
  0xaf   : > { %1097 = vpow2.f32 %v1034_v60 }
  0xb0   : > { %1099 = vpow2.f32 %v1035_v61 }
  0xb1   : > { %1101 = vpow2.f32 %v1033_v62 }
  0xb5   : > { %v1098_v1 = vpop.eup %1097  ;;  %v407_v39 = vpop.f32.mrf.mxu2 }
  0xb6   : > { %1051 = vmatmul.msk.bf16.vlgmr.msra.gmra.mxu3 %vm191_vm1, %v1048_v34  ;;  %1053 = vmatmul.msk.bf16.vlgmr.msrb.gmra.mxu0 %vm191_vm1, %v1052_v41  ;;  %v1100_v2 = vpop.eup %1099  ;;  %v257_v3 = vadd.f32 1.0, %v1098_v1 }
  0xb7   : > { %787 = vmatpush.bf16.msra.mxu3 %v530_v29  ;;  %800 = vmatpush.bf16.msrb.mxu0 %v533_v33  ;;  %v1102_v4 = vpop.eup %1101  ;;  %v258_v5 = vadd.f32 1.0, %v1100_v2 }
  0xb8   : > { %1064 = vmatmul.msk.bf16.vlgmr.msra.gmra.mxu2 %vm191_vm1, %v1063_v45  ;;  %1103 = vrcp.f32 %v257_v3  ;;  %v256_v6 = vadd.f32 1.0, %v1102_v4  ;;  %vm279_vm5 = vweird.f32 %v257_v3 }
  0xb9   : > { %894 = vmatpush.bf16.msra.mxu2 %v1197_v10  ;;  %1105 = vrcp.f32 %v258_v5  ;;  %v283_v10 = vand.u32 2147483647, %v257_v3  ;;  %v300_v13 = vand.u32 2147483648, %v258_v5  ;;  %vm294_vm7 = vweird.f32 %v258_v5 }
  0xba   : > { %1107 = vrcp.f32 %v256_v6  ;;  %v298_v18 = vand.u32 2147483647, %v258_v5  ;;  %vm264_vm11 = vweird.f32 %v256_v6  ;;  %v270_v25 = vand.u32 2147483648, %v256_v6 }
  0xbb   : > { %vm1286_vm9 = vcmp.eq.f32.partialorder %v283_v10, 8.507059e+37  ;;  %v301_v24 = vor.u32 1.1754944e-38, %v300_v13  ;;  %v268_v28 = vand.u32 2147483647, %v256_v6 }
  0xbc   : > { %vm299_vm14 = vcmp.eq.f32.partialorder %v298_v18, 8.507059e+37  ;;  %v271_v34 = vor.u32 1.1754944e-38, %v270_v25 }
  0xbd   : > { %1062 = vmatmul.msk.bf16.vlgmr.msra.gmra.mxu1 %vm191_vm1, %v698_v47  ;;  %vm269_vm0 = vcmp.eq.f32.partialorder %v268_v28, 8.507059e+37 }
  0xbe   : > { %881 = vmatpush.bf16.msra.mxu1 %v1200_v11  ;;  %v1104_v7 = vpop.eup %1103  ;;  %v285_v11 = vand.u32 2147483648, %v257_v3 }
  0xbf   : > { %v1106_v8 = vpop.eup %1105  ;;  %v275_v9 = vmul.f32 %v1104_v7, %v257_v3  ;;  %vm280_vm6 = vweird.f32 %v1104_v7 }
  0xc0   : > { %v1108_v16 = vpop.eup %1107  ;;  %vm295_vm8 = vweird.f32 %v1106_v8  ;;  %v286_v21 = vor.u32 1.1754944e-38, %v285_v11  ;;  %vm281_vm10 = vmor %vm279_vm5, %vm280_vm6 }
  0xc1   : > { %v276_v14 = vsub.f32 1.0, %v275_v9  ;;  %v260_v22 = vmul.f32 %v1108_v16, %v256_v6  ;;  %vm296_vm12 = vmor %vm294_vm7, %vm295_vm8  ;;  %vm265_vm13 = vweird.f32 %v1108_v16 }
  0xc2   : > { %vm266_vm15 = vmor %vm264_vm11, %vm265_vm13 }
  0xc3   : > { %v277_v19 = vmul.f32 %v1104_v7, %v276_v14  ;;  %v261_v27 = vsub.f32 1.0, %v260_v22 }
  0xc5   : > { %v278_v26 = vadd.f32 %v1104_v7, %v277_v19  ;;  %v262_v31 = vmul.f32 %v1108_v16, %v261_v27 }
  0xc6   : > { %1060 = vmatmul.msk.bf16.vlgmr.msrb.gmra.mxu3 %vm191_vm1, %v698_v47  ;;  %1061 = vmatmul.msk.bf16.vlgmr.msra.gmra.mxu0 %vm191_vm1, %v698_v47 }
  0xc7   : > { %847 = vmatpush.bf16.msrb.mxu3 %v1220_v20  ;;  %868 = vmatpush.bf16.msra.mxu0 %v1203_v12  ;;  %v290_v12 = vmul.f32 %v1106_v8, %v258_v5  ;;  %v282_v30 = vsel %vm281_vm10, %v1104_v7, %v278_v26  ;;  %v263_v38 = vadd.f32 %v1108_v16, %v262_v31 }
  0xc8   : > { %1069 = vmatmul.msk.bf16.vlgmr.msrb.gmra.mxu2 %vm191_vm1, %v1067_v48  ;;  %v287_v32 = vsel %vm1286_vm9, %v286_v21, %v282_v30 }
  0xc9   : > { %v291_v17 = vsub.f32 1.0, %v290_v12  ;;  %v307_v36 = vrot.slane %v287_v32, 7  ;;  %v267_v41 = vsel %vm266_vm15, %v1108_v16, %v263_v38 }
  0xca   : > { %v272_v42 = vsel %vm269_vm0, %v271_v34, %v267_v41 }
  0xcb   : > { %v292_v23 = vmul.f32 %v1106_v8, %v291_v17 }
  0xcd   : > { %1068 = vmatmul.msk.bf16.vlgmr.msrb.gmra.mxu1 %vm191_vm1, %v1067_v48  ;;  %v293_v29 = vadd.f32 %v1106_v8, %v292_v23 }
  0xcf   : > { %v297_v33 = vsel %vm296_vm12, %v1106_v8, %v293_v29 }
  0xd0   : > { %v302_v37 = vsel %vm299_vm14, %v301_v24, %v297_v33 }
  0xd1   : > { %v308_v40 = vrot.slane %v302_v37, 6 }
  0xd6   : > { %1065 = vmatmul.msk.bf16.vlgmr.msra.gmra.mxu3 %vm191_vm1, %v1063_v45  ;;  %1066 = vmatmul.msk.bf16.vlgmr.msrb.gmra.mxu0 %vm191_vm1, %v1063_v45 }
  0xd8   : > { %1074 = vmatmul.msk.bf16.vlgmr.msra.gmra.mxu2 %vm191_vm1, %v1071_v52 }
  0xdd   : > { %1073 = vmatmul.msk.bf16.vlgmr.msra.gmra.mxu1 %vm191_vm1, %v1071_v52 }
  0xe6   : > { %1070 = vmatmul.msk.bf16.vlgmr.msrb.gmra.mxu3 %vm191_vm1, %v1067_v48  ;;  %1072 = vmatmul.msk.bf16.vlgmr.msra.gmra.mxu0 %vm191_vm1, %v1071_v52  ;;  %vm309_vm1 = vcmask 1040384  }
  0xe7   : > { %v310_v44 = vsel %vm309_vm1, %v272_v42, %v307_v36 }
  0xe8   : > { %v312_v45 = vsel %vm311_vm2, %v310_v44, %v308_v40 }
  0xe9   : > { %318 = vst.msk [vmem:[%s1297_s17] sm:$0x7] %vm1299_vm3, %v312_v45 }
 0x10a   : > { %v384_v46 = vpop.f32.mrf.mxu1 }
 0x10b   : > { %v390_v60 = vadd.f32 %v384_v46, %v325_v49 }
 0x112   : > { %v386_v47 = vpop.f32.mrf.mxu1 }
 0x113   : > { %v371_v48 = vpop.f32.mrf.mxu0 }
 0x114   : > { %v389_v51 = vadd.f32 %v371_v48, %v325_v49 }
 0x119   : > { %v358_v50 = vpop.f32.mrf.mxu3 }
 0x11a   : > { %v388_v52 = vadd.f32 %v358_v50, %v325_v49  ;;  %v544_v53 = vpop.f32.mrf.mxu1  ;;  %v557_v54 = vpop.f32.mrf.mxu2 }
 0x11b   : > { %v373_v55 = vpop.f32.mrf.mxu0  ;;  %v575_v4 = vadd.f32 %v557_v54, %v511_v0  ;;  %v574_v17 = vadd.f32 %v544_v53, %v511_v0 }
 0x11c   : > { %v435_v56 = vadd.f32 %v405_v15, %v388_v52 }
 0x11e   : > { %v1044_v57 = vmul.f32 -1.442695, %v435_v56 }
 0x120   : > { %1109 = vpow2.f32 %v1044_v57 }
 0x121   : > { %v360_v59 = vpop.f32.mrf.mxu3 }
 0x122   : > { %v546_v61 = vpop.f32.mrf.mxu1  ;;  %v559_v62 = vpop.f32.mrf.mxu2 }
 0x123   : > { %v431_v63 = vpop.f32.mrf.mxu0 }
 0x124   : > { %v437_v1 = vadd.f32 %v431_v63, %v390_v60 }
 0x126   : > { %v1110_v2 = vpop.eup %1109  ;;  %v1046_v3 = vmul.f32 -1.442695, %v437_v1 }
 0x127   : > { %v1309_v5 = vadd.f32 1.0, %v1110_v2 }
 0x128   : > { %1111 = vpow2.f32 %v1046_v3 }
 0x129   : > { %v418_v6 = vpop.f32.mrf.mxu3  ;;  %1113 = vrcp.f32 %v1309_v5  ;;  %vm455_vm4 = vweird.f32 %v1309_v5  ;;  %v459_v60 = vand.u32 2147483647, %v1309_v5  ;;  %v461_v61 = vand.u32 2147483648, %v1309_v5 }
 0x12a   : > { %v436_v7 = vadd.f32 %v418_v6, %v389_v51  ;;  %v604_v8 = vpop.f32.mrf.mxu1  ;;  %v617_v9 = vpop.f32.mrf.mxu2 }
 0x12b   : > { %v622_v10 = vadd.f32 %v604_v8, %v575_v4  ;;  %v433_v11 = vpop.f32.mrf.mxu0  ;;  %vm460_vm15 = vcmp.eq.f32.partialorder %v459_v60, 8.507059e+37 }
 0x12c   : > { %v1045_v12 = vmul.f32 -1.442695, %v436_v7 }
 0x12d   : > { %v1057_v13 = vmul.f32 -1.442695, %v622_v10 }
 0x12e   : > { %v1112_v14 = vpop.eup %1111  ;;  %1115 = vpow2.f32 %v1045_v12 }
 0x12f   : > { %v1312_v15 = vadd.f32 1.0, %v1112_v14  ;;  %1117 = vpow2.f32 %v1057_v13  ;;  %v1315_v20 = vpop.eup %1113 }
 0x130   : > { %v451_v26 = vmul.f32 %v1315_v20, %v1309_v5  ;;  %vm456_vm6 = vweird.f32 %v1315_v20 }
 0x131   : > { %1119 = vrcp.f32 %v1312_v15  ;;  %v420_v16 = vpop.f32.mrf.mxu3  ;;  %vm485_vm7 = vweird.f32 %v1312_v15  ;;  %v491_v47 = vand.u32 2147483648, %v1312_v15  ;;  %v489_v50 = vand.u32 2147483647, %v1312_v15  ;;  %vm1353_vm10 = vmor %vm455_vm4, %vm456_vm6 }
 0x132   : > { %v606_v18 = vpop.f32.mrf.mxu1  ;;  %v619_v19 = vpop.f32.mrf.mxu2  ;;  %v452_v32 = vsub.f32 1.0, %v451_v26 }
 0x133   : > { %v591_v21 = vpop.f32.mrf.mxu0  ;;  %v492_v2 = vor.u32 1.1754944e-38, %v491_v47  ;;  %vm490_vm12 = vcmp.eq.f32.partialorder %v489_v50, 8.507059e+37 }
 0x134   : > { %v1116_v22 = vpop.eup %1115  ;;  %v621_v23 = vadd.f32 %v591_v21, %v574_v17  ;;  %v453_v41 = vmul.f32 %v1315_v20, %v452_v32 }
 0x135   : > { %v1118_v24 = vpop.eup %1117  ;;  %v448_v25 = vadd.f32 1.0, %v1116_v22 }
 0x136   : > { %v1056_v27 = vmul.f32 -1.442695, %v621_v23  ;;  %v1319_v29 = vadd.f32 1.0, %v1118_v24  ;;  %v454_v55 = vadd.f32 %v1315_v20, %v453_v41 }
 0x137   : > { %v1120_v28 = vpop.eup %1119  ;;  %1121 = vrcp.f32 %v448_v25  ;;  %v476_v52 = vand.u32 2147483648, %v448_v25  ;;  %v474_v58 = vand.u32 2147483647, %v448_v25  ;;  %vm470_vm11 = vweird.f32 %v448_v25 }
 0x138   : > { %v481_v30 = vmul.f32 %v1120_v28, %v1312_v15  ;;  %1123 = vpow2.f32 %v1056_v27  ;;  %vm486_vm5 = vweird.f32 %v1120_v28  ;;  %v458_v6 = vsel %vm1353_vm10, %v1315_v20, %v454_v55 }
 0x139   : > { %v570_v31 = vpop.f32.mrf.mxu3  ;;  %1125 = vrcp.f32 %v1319_v29  ;;  %vm1338_vm8 = vmor %vm485_vm7, %vm486_vm5  ;;  %v477_v51 = vor.u32 1.1754944e-38, %v476_v52  ;;  %vm475_vm14 = vcmp.eq.f32.partialorder %v474_v58, 8.507059e+37  ;;  %vm656_vm4 = vweird.f32 %v1319_v29 }
 0x13a   : > { %v482_v33 = vsub.f32 1.0, %v481_v30  ;;  %v1322_v34 = vpop.f32.mrf.mxu1  ;;  %v576_v35 = vadd.f32 %v570_v31, %v511_v0  ;;  %v662_v30 = vand.u32 2147483648, %v1319_v29 }
 0x13b   : > { %v593_v36 = vpop.f32.mrf.mxu0  ;;  %v1325_v37 = vpop.f32.mrf.mxu2 }
 0x13c   : > { %v483_v38 = vmul.f32 %v1120_v28, %v482_v33  ;;  %v623_v40 = vadd.f32 %v617_v9, %v576_v35  ;;  %v462_v9 = vor.u32 1.1754944e-38, %v461_v61  ;;  %v660_v33 = vand.u32 2147483647, %v1319_v29  ;;  %v695_v36 = vpop.permute.xlu0 %694 }
 0x13d   : > { %v1122_v39 = vpop.eup %1121  ;;  %v663_v47 = vor.u32 1.1754944e-38, %v662_v30  ;;  %v697_v55 = vperm.slane %v695_v36, 0 }
 0x13e   : > { %v466_v42 = vmul.f32 %v1122_v39, %v448_v25  ;;  %v484_v44 = vadd.f32 %v1120_v28, %v483_v38  ;;  %v1058_v45 = vmul.f32 -1.442695, %v623_v40  ;;  %v1124_v46 = vpop.eup %1123  ;;  %vm471_vm9 = vweird.f32 %v1122_v39 }
 0x13f   : > { %v1332_v49 = vpop.eup %1125  ;;  %v1335_v53 = vadd.f32 1.0, %v1124_v46  ;;  %vm472_vm13 = vmor %vm470_vm11, %vm471_vm9  ;;  %v463_v15 = vsel %vm460_vm15, %v462_v9, %v458_v6  ;;  %vm661_vm10 = vcmp.eq.f32.partialorder %v660_v33, 8.507059e+37 }
 0x140   : > { %v467_v48 = vsub.f32 1.0, %v466_v42  ;;  %1127 = vpow2.f32 %v1058_v45  ;;  %v488_v62 = vsel %vm1338_vm8, %v1120_v28, %v484_v44  ;;  %v652_v4 = vmul.f32 %v1332_v49, %v1319_v29 }
 0x141   : > { %v572_v54 = vpop.f32.mrf.mxu3  ;;  %1129 = vrcp.f32 %v1335_v53  ;;  %v493_v7 = vsel %vm490_vm12, %v492_v2, %v488_v62  ;;  %vm657_vm0 = vweird.f32 %v1332_v49  ;;  %v647_v40 = vand.u32 2147483648, %v1335_v53 }
 0x142   : > { %v468_v57 = vmul.f32 %v1122_v39, %v467_v48  ;;  %v757_v59 = vpop.f32.mrf.mxu1  ;;  %v653_v12 = vsub.f32 1.0, %v652_v4  ;;  %v499_v16 = vrot.slane %v493_v7, 6  ;;  %vm1377_vm6 = vmor %vm656_vm4, %vm657_vm0  ;;  %vm641_vm7 = vweird.f32 %v1335_v53 }
 0x143   : > { %v1347_v63 = vpop.f32.mrf.mxu0  ;;  %v778_v0 = vpop.f32.mrf.mxu2  ;;  %v645_v29 = vand.u32 2147483647, %v1335_v53 }
 0x144   : > { %v469_v3 = vadd.f32 %v1122_v39, %v468_v57  ;;  %v654_v24 = vmul.f32 %v1332_v49, %v653_v12  ;;  %v760_v58 = vadd.f32 %v1347_v63, %v697_v55 }
 0x145   : > { %vm646_vm12 = vcmp.eq.f32.partialorder %v645_v29, 8.507059e+37 }
 0x146   : > { %v473_v5 = vsel %vm472_vm13, %v1122_v39, %v469_v3  ;;  %v1128_v8 = vpop.eup %1127  ;;  %v655_v28 = vadd.f32 %v1332_v49, %v654_v24 }
 0x147   : > { %v478_v10 = vsel %vm475_vm14, %v477_v51, %v473_v5  ;;  %v635_v13 = vadd.f32 1.0, %v1128_v8  ;;  %v1130_v14 = vpop.eup %1129 }
 0x148   : > { %v498_v11 = vrot.slane %v478_v10, 7  ;;  %v637_v19 = vmul.f32 %v1130_v14, %v1335_v53  ;;  %vm642_vm5 = vweird.f32 %v1130_v14  ;;  %v659_v45 = vsel %vm1377_vm6, %v1332_v49, %v655_v28 }
 0x149   : > { %v729_v17 = vpop.f32.mrf.mxu3  ;;  %1131 = vrcp.f32 %v635_v13  ;;  %v677_v46 = vand.u32 2147483648, %v635_v13  ;;  %vm1387_vm8 = vmor %vm641_vm7, %vm642_vm5  ;;  %v675_v52 = vand.u32 2147483647, %v635_v13  ;;  %v664_v56 = vsel %vm661_vm10, %v663_v47, %v659_v45 }
 0x14a   : > { %v500_v18 = vsel %vm309_vm1, %v463_v15, %v498_v11  ;;  %v1365_v20 = vpop.f32.mrf.mxu1  ;;  %v638_v25 = vsub.f32 1.0, %v637_v19  ;;  %v648_v49 = vor.u32 1.1754944e-38, %v647_v40  ;;  %vm671_vm11 = vweird.f32 %v635_v13 }
 0x14b   : > { %v501_v21 = vsel %vm311_vm2, %v500_v18, %v499_v16  ;;  %v744_v22 = vpop.f32.mrf.mxu0  ;;  %v836_v23 = vpop.f32.mrf.mxu2  ;;  %v678_v53 = vor.u32 1.1754944e-38, %v677_v46  ;;  %vm676_vm14 = vcmp.eq.f32.partialorder %v675_v52, 8.507059e+37  ;;  %v684_v62 = vrot.slane %v664_v56, 7 }
 0x14c   : > { %1047 = vst.msk [vmem:[%s1297_s17 + $0x3] sm:$0x7] %vm1299_vm3, %v501_v21  ;;  %v639_v26 = vmul.f32 %v1130_v14, %v638_v25  ;;  %v759_v1 = vadd.f32 %v729_v17, %v697_v55  ;;  %v761_v17 = vadd.f32 %v1322_v34, %v697_v55 }
 0x14e   : > { %v640_v35 = vadd.f32 %v1130_v14, %v639_v26  ;;  %v806_v63 = vadd.f32 %v1325_v37, %v759_v1 }
 0x14f   : > { %v1132_v27 = vpop.eup %1131 }
 0x150   : > { %v667_v31 = vmul.f32 %v1132_v27, %v635_v13  ;;  %vm672_vm9 = vweird.f32 %v1132_v27  ;;  %v644_v54 = vsel %vm1387_vm8, %v1130_v14, %v640_v35  ;;  %v853_v12 = vadd.f32 %v1365_v20, %v806_v63 }
 0x151   : > { %v731_v32 = vpop.f32.mrf.mxu3  ;;  %vm673_vm13 = vmor %vm671_vm11, %vm672_vm9  ;;  %v649_v59 = vsel %vm646_vm12, %v648_v49, %v644_v54 }
 0x152   : > { %v825_v38 = vpop.f32.mrf.mxu1  ;;  %v668_v41 = vsub.f32 1.0, %v667_v31  ;;  %v686_v7 = vsel %vm309_vm1, %v649_v59, %v684_v62 }
 0x153   : > { %v802_v42 = vpop.f32.mrf.mxu0  ;;  %v838_v44 = vpop.f32.mrf.mxu2 }
 0x154   : > { %v669_v50 = vmul.f32 %v1132_v27, %v668_v41  ;;  %v808_v21 = vadd.f32 %v802_v42, %v761_v17 }
 0x156   : > { %v670_v57 = vadd.f32 %v1132_v27, %v669_v50 }
 0x158   : > { %v674_v60 = vsel %vm673_vm13, %v1132_v27, %v670_v57 }
 0x159   : > { %v789_v61 = vpop.f32.mrf.mxu3  ;;  %v679_v0 = vsel %vm676_vm14, %v678_v53, %v674_v60 }
 0x15a   : > { %v807_v2 = vadd.f32 %v789_v61, %v760_v58  ;;  %v883_v3 = vpop.f32.mrf.mxu1  ;;  %v685_v4 = vrot.slane %v679_v0, 6 }
 0x15b   : > { %v804_v51 = vpop.f32.mrf.mxu0  ;;  %v896_v6 = vpop.f32.mrf.mxu2 }
 0x15c   : > { %v854_v5 = vadd.f32 %v836_v23, %v807_v2  ;;  %v687_v8 = vsel %vm311_vm2, %v686_v7, %v685_v4 }
 0x15d   : > { %1059 = vst.msk [vmem:[%s1297_s17 + $0x6] sm:$0x7] %vm1299_vm3, %v687_v8 }
 0x15e   : > { %v901_v9 = vadd.f32 %v883_v3, %v854_v5 }
 0x160   : > { %v1076_v10 = vmul.f32 -1.442695, %v901_v9 }
 0x161   : > { %v791_v11 = vpop.f32.mrf.mxu3 }
 0x162   : > { %1133 = vpow2.f32 %v1076_v10  ;;  %v885_v13 = vpop.f32.mrf.mxu1 }
 0x163   : > { %v870_v14 = vpop.f32.mrf.mxu0  ;;  %v898_v15 = vpop.f32.mrf.mxu2 }
 0x164   : > { %v900_v16 = vadd.f32 %v870_v14, %v853_v12 }
 0x166   : > { %v1075_v18 = vmul.f32 -1.442695, %v900_v16 }
 0x168   : > { %v1134_v19 = vpop.eup %1133  ;;  %1135 = vpow2.f32 %v1075_v18 }
 0x169   : > { %v913_v22 = vadd.f32 1.0, %v1134_v19  ;;  %v849_v23 = vpop.f32.mrf.mxu3 }
 0x16a   : > { %v855_v24 = vadd.f32 %v849_v23, %v808_v21 }
 0x16b   : > { %1137 = vrcp.f32 %v913_v22  ;;  %v872_v37 = vpop.f32.mrf.mxu0  ;;  %v941_v44 = vand.u32 2147483648, %v913_v22  ;;  %vm935_vm0 = vweird.f32 %v913_v22  ;;  %v939_v29 = vand.u32 2147483647, %v913_v22 }
 0x16c   : > { %v902_v25 = vadd.f32 %v896_v6, %v855_v24 }
 0x16d   : > { %v942_v55 = vor.u32 1.1754944e-38, %v941_v44  ;;  %vm940_vm9 = vcmp.eq.f32.partialorder %v939_v29, 8.507059e+37 }
 0x16e   : > { %v1136_v26 = vpop.eup %1135  ;;  %v1077_v27 = vmul.f32 -1.442695, %v902_v25 }
 0x16f   : > { %v912_v20 = vadd.f32 1.0, %v1136_v26 }
 0x170   : > { %1139 = vpow2.f32 %v1077_v27 }
 0x171   : > { %v1138_v28 = vpop.eup %1137  ;;  %1141 = vrcp.f32 %v912_v20  ;;  %v851_v30 = vpop.f32.mrf.mxu3  ;;  %v926_v47 = vand.u32 2147483648, %v912_v20  ;;  %vm920_vm6 = vweird.f32 %v912_v20  ;;  %v924_v52 = vand.u32 2147483647, %v912_v20 }
 0x172   : > { %v931_v31 = vmul.f32 %v1138_v28, %v913_v22  ;;  %vm936_vm15 = vweird.f32 %v1138_v28 }
 0x173   : > { %vm937_vm5 = vmor %vm935_vm0, %vm936_vm15  ;;  %v927_v58 = vor.u32 1.1754944e-38, %v926_v47  ;;  %vm925_vm11 = vcmp.eq.f32.partialorder %v924_v52, 8.507059e+37 }
 0x174   : > { %v932_v33 = vsub.f32 1.0, %v931_v31 }
 0x176   : > { %v1140_v32 = vpop.eup %1139  ;;  %v933_v39 = vmul.f32 %v1138_v28, %v932_v33 }
 0x177   : > { %v1142_v34 = vpop.eup %1141  ;;  %v914_v35 = vadd.f32 1.0, %v1140_v32 }
 0x178   : > { %v916_v36 = vmul.f32 %v1142_v34, %v912_v20  ;;  %v934_v42 = vadd.f32 %v1138_v28, %v933_v39  ;;  %vm921_vm4 = vweird.f32 %v1142_v34 }
 0x179   : > { %1143 = vrcp.f32 %v914_v35  ;;  %v956_v54 = vand.u32 2147483648, %v914_v35  ;;  %vm922_vm7 = vmor %vm920_vm6, %vm921_vm4  ;;  %v954_v49 = vand.u32 2147483647, %v914_v35  ;;  %vm950_vm10 = vweird.f32 %v914_v35 }
 0x17a   : > { %v917_v38 = vsub.f32 1.0, %v916_v36  ;;  %v938_v50 = vsel %vm937_vm5, %v1138_v28, %v934_v42 }
 0x17b   : > { %v943_v53 = vsel %vm940_vm9, %v942_v55, %v938_v50  ;;  %v957_v60 = vor.u32 1.1754944e-38, %v956_v54  ;;  %vm955_vm13 = vcmp.eq.f32.partialorder %v954_v49, 8.507059e+37 }
 0x17c   : > { %v918_v40 = vmul.f32 %v1142_v34, %v917_v38  ;;  %v963_v0 = vrot.slane %v943_v53, 7 }
 0x17e   : > { %v919_v46 = vadd.f32 %v1142_v34, %v918_v40 }
 0x17f   : > { %v1144_v41 = vpop.eup %1143 }
 0x180   : > { %v946_v45 = vmul.f32 %v1144_v41, %v914_v35  ;;  %vm951_vm8 = vweird.f32 %v1144_v41  ;;  %v923_v57 = vsel %vm922_vm7, %v1142_v34, %v919_v46 }
 0x181   : > { %vm952_vm12 = vmor %vm950_vm10, %vm951_vm8  ;;  %v928_v61 = vsel %vm925_vm11, %v927_v58, %v923_v57 }
 0x182   : > { %v947_v48 = vsub.f32 1.0, %v946_v45  ;;  %v965_v3 = vsel %vm309_vm1, %v928_v61, %v963_v0 }
 0x184   : > { %v948_v56 = vmul.f32 %v1144_v41, %v947_v48 }
 0x186   : > { %v949_v59 = vadd.f32 %v1144_v41, %v948_v56 }
 0x188   : > { %v953_v62 = vsel %vm952_vm12, %v1144_v41, %v949_v59 }
 0x189   : > { %v958_v1 = vsel %vm955_vm13, %v957_v60, %v953_v62 }
 0x18a   : > { %v964_v2 = vrot.slane %v958_v1, 6 }
 0x18c   : > { %v966_v4 = vsel %vm311_vm2, %v965_v3, %v964_v2 }
 0x18d   : > { %1078 = vst.msk [vmem:[%s1297_s17 + $0x9] sm:$0x7] %vm1299_vm3, %v966_v4 }
 0x18e PF: > { %s15_s14 = sadd.s32 1, %s1151_s14  }
 0x18f   : > { %p12_p4 = scmp.ge.s32.totalorder %s15_s14, 4  }
 0x191   :  { %14 = sbr.rel (!%p12_p4) target bundleno = 3 (0x3), region = 73 }

</bundles_post_ra>
